<compile_context>
chip_gen: v5e
topology: v5e:2x2
jax: 0.10.0
libtpu: 0.0.40
codegen_flags: <defaults>
</compile_context>

<pallas_src>
import functools

import jax
import jax.numpy as jnp
from jax import lax
from jax.experimental import pallas as pl
from jax.experimental.pallas import tpu as pltpu


# ----------------------------- helpers ------------------------------------

def _round_up(x, m):
    return (x + m - 1) // m * m


def _pick_div_tile(m):
    """Largest 'nice' tile that divides m, preferring >= 2 grid steps."""
    best = None
    for t in (1024, 512, 256, 128, 64, 32, 16, 8):
        if m % t == 0:
            if best is None:
                best = t
            if m // t >= 2:
                return t
    return best if best is not None else m


def _pick_row_tile(r):
    """Row tile for the fused conv kernel (rows of the padded grid)."""
    if r >= 8 * 512:
        return 512
    if r >= 8 * 256:
        return 256
    return 128


# ------------------- fused 3x3 conv + bias + BN-stats kernel ---------------

def _conv3x3_kernel(a_hbm, m_hbm, w_ref, b_ref, y_ref, ps_ref, qs_ref,
                    xbuf, mbuf, sem, *, tr, wp, halo, guard, win):
    i = pl.program_id(0)
    # window of the extended, row-flattened padded activation covering the
    # halo needed by all 9 taps of this tile's output rows.
    row0 = guard - halo + i * tr          # always >= 0 (guard >= halo)

    cx = pltpu.make_async_copy(a_hbm.at[pl.ds(row0, win)], xbuf, sem.at[0])
    cm = pltpu.make_async_copy(m_hbm.at[pl.ds(row0, win)], mbuf, sem.at[1])
    cx.start()
    cm.start()
    cx.wait()
    cm.wait()

    mw = mbuf[...]                                        # (win, 1) f32
    xv = xbuf[...]                                        # (win, Cin) bf16
    # Zero every non-interior row: this IS the conv's zero padding, and it
    # also discards garbage in border/guard rows of intermediate activations.
    xw = jnp.where(mw > 0.0, xv, jnp.zeros_like(xv))

    base = halo - (wp + 1)
    acc = None
    for dh in range(3):
        for dw in range(3):
            off = base + dh * wp + dw                     # static offset
            a_t = xw[off:off + tr, :]                     # (tr, Cin)
            c = jnp.dot(a_t, w_ref[dh, dw],
                        preferred_element_type=jnp.float32)
            acc = c if acc is None else acc + c
    y = acc + b_ref[...]                                  # (tr, Cout) f32

    # fused BatchNorm batch statistics over interior pixels of this tile
    cout = y.shape[-1]
    mo = mw[halo:halo + tr, :]                            # output-row mask
    ym = jnp.where(mo > 0.0, y, 0.0)
    ps_ref[...] = jnp.broadcast_to(
        jnp.sum(ym, axis=0, keepdims=True), (8, cout))
    qs_ref[...] = jnp.broadcast_to(
        jnp.sum(ym * ym, axis=0, keepdims=True), (8, cout))

    y_ref[...] = y.astype(y_ref.dtype)


def conv3x3_stats(a_ext, mask_ext, w, b, *, wp, tr, guard):
    """3x3 conv (stride 1, pad 1) on the extended padded-grid layout.

    a_ext:    (L, Cin) bf16, L = guard + R_pad + guard rows.
    mask_ext: (L, 1)  f32, 1.0 on interior pixels, 0.0 elsewhere.
    Returns y (L, Cout) bf16 plus per-tile partial sum / sum-of-squares.
    """
    L, cin = a_ext.shape
    cout = w.shape[-1]
    r_pad = L - 2 * guard
    assert r_pad % tr == 0 and guard % tr == 0
    ntiles = r_pad // tr
    halo = _round_up(wp + 1, 8)           # sublane-aligned DMA offsets
    assert guard >= halo
    win = tr + 2 * halo
    gb = guard // tr

    kernel = functools.partial(_conv3x3_kernel, tr=tr, wp=wp, halo=halo,
                               guard=guard, win=win)
    return pl.pallas_call(
        kernel,
        out_shape=(
            jax.ShapeDtypeStruct((L, cout), jnp.bfloat16),
            jax.ShapeDtypeStruct((ntiles * 8, cout), jnp.float32),
            jax.ShapeDtypeStruct((ntiles * 8, cout), jnp.float32),
        ),
        grid_spec=pltpu.PrefetchScalarGridSpec(
            num_scalar_prefetch=0,
            grid=(ntiles,),
            in_specs=[
                pl.BlockSpec(memory_space=pl.ANY),     # activation (manual DMA)
                pl.BlockSpec(memory_space=pl.ANY),     # interior mask
                pl.BlockSpec((3, 3, cin, cout), lambda i: (0, 0, 0, 0)),
                pl.BlockSpec((1, cout), lambda i: (0, 0)),
            ],
            out_specs=(
                pl.BlockSpec((tr, cout), lambda i: (i + gb, 0)),
                pl.BlockSpec((8, cout), lambda i: (i, 0)),
                pl.BlockSpec((8, cout), lambda i: (i, 0)),
            ),
            scratch_shapes=[
                pltpu.VMEM((win, cin), jnp.bfloat16),
                pltpu.VMEM((win, 1), jnp.float32),
                pltpu.SemaphoreType.DMA((2,)),
            ],
        ),
        compiler_params=pltpu.CompilerParams(
            dimension_semantics=("parallel",),
            vmem_limit_bytes=32 * 1024 * 1024),
    )(a_ext, mask_ext, w, b.reshape(1, cout))
    # TODO(synk): the halo window DMA is issued and waited within the same
    # grid step (no cross-step prefetch) so it stays safe under megacore
    # parallel partitioning; a per-core double-buffered variant would hide it.


# --------------------------- 1x1 conv (matmul + bias) ----------------------

def _matmul_bias_kernel(a_ref, w_ref, b_ref, o_ref):
    acc = jnp.dot(a_ref[...], w_ref[...], preferred_element_type=jnp.float32)
    o_ref[...] = (acc + b_ref[...]).astype(o_ref.dtype)


def matmul_bias(a, w, b, out_dtype=jnp.float32):
    m, k = a.shape
    _, n = w.shape
    tm = _pick_div_tile(m)
    return pl.pallas_call(
        _matmul_bias_kernel,
        out_shape=jax.ShapeDtypeStruct((m, n), out_dtype),
        grid_spec=pltpu.PrefetchScalarGridSpec(
            num_scalar_prefetch=0,
            grid=(m // tm,),
            in_specs=[
                pl.BlockSpec((tm, k), lambda i: (i, 0)),
                pl.BlockSpec((k, n), lambda i: (0, 0)),
                pl.BlockSpec((1, n), lambda i: (0, 0)),
            ],
            out_specs=pl.BlockSpec((tm, n), lambda i: (i, 0)),
        ),
        compiler_params=pltpu.CompilerParams(
            dimension_semantics=("parallel",),
            vmem_limit_bytes=32 * 1024 * 1024),
    )(a, w, b.reshape(1, n))


# ----------------------- BN affine + ReLU (lane-dense) ---------------------

def _affine_relu_kernel(x_ref, s_ref, t_ref, o_ref):
    y = x_ref[...].astype(jnp.float32) * s_ref[...] + t_ref[...]
    o_ref[...] = jnp.maximum(y, 0.0).astype(o_ref.dtype)


def affine_relu(x, scale, shift, out_dtype):
    """relu(x * scale + shift) with per-channel scale/shift.

    When C < 128 and 128 % C == 0 the tensor is viewed lane-densely as
    (L*C/128, 128) with the scale/shift tiled across lanes, so stores are
    full-width instead of masked.
    """
    L, C = x.shape
    scale = scale.reshape(1, C).astype(jnp.float32)
    shift = shift.reshape(1, C).astype(jnp.float32)
    if C % 128 != 0 and 128 % C == 0 and (L * C) % 128 == 0:
        rep = 128 // C
        rows, lanes = (L * C) // 128, 128
        x2 = x.reshape(rows, lanes)
        s2 = jnp.tile(scale, (1, rep))
        t2 = jnp.tile(shift, (1, rep))
    else:
        rows, lanes = L, C
        x2, s2, t2 = x, scale, shift
    tr = _pick_div_tile(rows)
    out = pl.pallas_call(
        _affine_relu_kernel,
        out_shape=jax.ShapeDtypeStruct((rows, lanes), out_dtype),
        grid_spec=pltpu.PrefetchScalarGridSpec(
            num_scalar_prefetch=0,
            grid=(rows // tr,),
            in_specs=[
                pl.BlockSpec((tr, lanes), lambda i: (i, 0)),
                pl.BlockSpec((1, lanes), lambda i: (0, 0)),
                pl.BlockSpec((1, lanes), lambda i: (0, 0)),
            ],
            out_specs=pl.BlockSpec((tr, lanes), lambda i: (i, 0)),
        ),
        compiler_params=pltpu.CompilerParams(
            dimension_semantics=("parallel",),
            vmem_limit_bytes=32 * 1024 * 1024),
    )(x2, s2, t2)
    return out.reshape(L, C)


# ----------------------------- JAX glue -----------------------------------

def _bn_scale_shift(ps, qs, count, gamma, beta, eps=1e-5):
    c = ps.shape[-1]
    s = ps.reshape(-1, 8, c)[:, 0, :].sum(axis=0)
    q = qs.reshape(-1, 8, c)[:, 0, :].sum(axis=0)
    mean = s / count
    var = jnp.maximum(q / count - mean * mean, 0.0)   # clamp fp cancellation
    scale = gamma * lax.rsqrt(var + eps)
    shift = beta - mean * scale
    return scale, shift


def bilinear_upsample_x2(x):
    """NHWC bilinear x2 upsample, align_corners=True (matches nn.Upsample)."""
    # TODO(synk): gather-based interpolation kept in plain JAX (index math is
    # awkward as a rectangular BlockSpec); heavy compute is in the conv kernels.
    N, H, W, C = x.shape
    Ho, Wo = 2 * H, 2 * W

    def coords(out_size, in_size):
        if in_size == 1 or out_size == 1:
            src = jnp.zeros((out_size,), jnp.float32)
        else:
            src = jnp.arange(out_size, dtype=jnp.float32) * (
                (in_size - 1) / (out_size - 1))
        i0 = jnp.clip(jnp.floor(src).astype(jnp.int32), 0, in_size - 1)
        i1 = jnp.clip(i0 + 1, 0, in_size - 1)
        w = src - i0.astype(jnp.float32)
        return i0, i1, w

    h0, h1, wh = coords(Ho, H)
    w0, w1, ww = coords(Wo, W)
    xh = (x[:, h0, :, :] * (1.0 - wh)[None, :, None, None]
          + x[:, h1, :, :] * wh[None, :, None, None])
    out = (xh[:, :, w0, :] * (1.0 - ww)[None, None, :, None]
           + xh[:, :, w1, :] * ww[None, None, :, None])
    return out


def up_block_forward(params, x_up_nchw, x_down_nchw):
    # NCHW -> NHWC
    x_up = jnp.transpose(x_up_nchw, (0, 2, 3, 1))
    x_down = jnp.transpose(x_down_nchw, (0, 2, 3, 1))
    N, h, w, cin = x_up.shape

    # 1x1 conv BEFORE the upsample (commutes exactly with align_corners
    # bilinear interpolation: per-pixel affine map, interp weights sum to 1).
    y = matmul_bias(x_up.reshape(N * h * w, cin).astype(jnp.bfloat16),
                    params["up_w"].astype(jnp.bfloat16),
                    params["up_b"], out_dtype=jnp.float32)
    x_upc = bilinear_upsample_x2(y.reshape(N, h, w, cin // 2))

    # F.pad to match x_down spatial size (no-op when sizes already match)
    dy = x_down.shape[1] - x_upc.shape[1]
    dx = x_down.shape[2] - x_upc.shape[2]
    if dy or dx:
        x_upc = jnp.pad(x_upc, ((0, 0),
                                (dy // 2, dy - dy // 2),
                                (dx // 2, dx - dx // 2),
                                (0, 0)))

    # ---- build the extended padded-grid layout used by both 3x3 convs ----
    H, W = x_down.shape[1], x_down.shape[2]
    Hp, Wp = H + 2, W + 2
    R = N * Hp * Wp
    TR = _pick_row_tile(R)
    R_pad = _round_up(R, TR)
    G = _round_up(Wp + 1, TR)              # guard rows, multiple of TR
    L = R_pad + 2 * G

    # channel concat [x_down, x_up] folded into the one padded-layout build.
    # TODO(synk): could be written by the producers directly via out_specs /
    # input_output_aliases to avoid this single plain-JAX materialization.
    x_cat = jnp.concatenate([x_down, x_upc], axis=-1)
    x_padded = jnp.pad(x_cat, ((0, 0), (1, 1), (1, 1), (0, 0))
                       ).astype(jnp.bfloat16)
    c1 = x_padded.shape[-1]
    a1 = jnp.pad(x_padded.reshape(R, c1), ((G, L - G - R), (0, 0)))

    mask = jnp.pad(
        jnp.pad(jnp.ones((N, H, W), jnp.float32),
                ((0, 0), (1, 1), (1, 1))).reshape(R),
        (G, L - G - R)).reshape(L, 1)

    count = N * H * W

    # ConvBlock: conv3x3 -> BN -> ReLU -> conv3x3 -> BN -> ReLU
    y1, s1, q1 = conv3x3_stats(a1, mask,
                               params["c1_w"].astype(jnp.bfloat16),
                               params["c1_b"], wp=Wp, tr=TR, guard=G)
    sc1, sh1 = _bn_scale_shift(s1, q1, count, params["bn1_g"], params["bn1_b"])
    act1 = affine_relu(y1, sc1, sh1, out_dtype=jnp.bfloat16)

    y2, s2, q2 = conv3x3_stats(act1, mask,
                               params["c2_w"].astype(jnp.bfloat16),
                               params["c2_b"], wp=Wp, tr=TR, guard=G)
    sc2, sh2 = _bn_scale_shift(s2, q2, count, params["bn2_g"], params["bn2_b"])
    act2 = affine_relu(y2, sc2, sh2, out_dtype=jnp.float32)

    # extract interior pixels and return NCHW
    out = act2[G:G + R].reshape(N, Hp, Wp, -1)[:, 1:H + 1, 1:W + 1, :]
    return jnp.transpose(out, (0, 3, 1, 2))


def init_params(key, in_channel, out_channel):
    mid = in_channel // 2
    ks = jax.random.split(key, 6)

    def u(k, shape, fan_in):
        bound = 1.0 / (fan_in ** 0.5)
        return jax.random.uniform(k, shape, jnp.float32, -bound, bound)

    return {
        # 1x1 conv (in_channel -> in_channel//2): weight as (Cin, Cout)
        "up_w": u(ks[0], (in_channel, in_channel // 2), in_channel),
        "up_b": u(ks[1], (in_channel // 2,), in_channel),
        # conv1 3x3 (in_channel -> mid): weight as (kh, kw, Cin, Cout)
        "c1_w": u(ks[2], (3, 3, in_channel, mid), 9 * in_channel),
        "c1_b": u(ks[3], (mid,), 9 * in_channel),
        "bn1_g": jnp.ones((mid,), jnp.float32),
        "bn1_b": jnp.zeros((mid,), jnp.float32),
        # conv2 3x3 (mid -> out_channel)
        "c2_w": u(ks[4], (3, 3, mid, out_channel), 9 * mid),
        "c2_b": u(ks[5], (out_channel,), 9 * mid),
        "bn2_g": jnp.ones((out_channel,), jnp.float32),
        "bn2_b": jnp.zeros((out_channel,), jnp.float32),
    }


if __name__ == "__main__":
    key = jax.random.PRNGKey(0)
    in_channel, out_channel = 8, 4
    k1, k2, k3 = jax.random.split(key, 3)

    # UNet convention: x_up comes from the coarser level (half spatial size,
    # in_channel channels); x_down is the skip (in_channel//2 channels).
    x_up = jax.random.normal(k1, (2, in_channel, 8, 8), jnp.float32)
    x_down = jax.random.normal(k2, (2, in_channel // 2, 16, 16), jnp.float32)
    params = init_params(k3, in_channel, out_channel)

    out = jax.jit(up_block_forward)(params, x_up, x_down)
    out = jax.block_until_ready(out)
    assert out.shape == (2, out_channel, 16, 16), out.shape
    assert bool(jnp.all(jnp.isfinite(out)))
    print("KERNEL_OK")
</pallas_src>

<mosaic_0001>
module attributes {stable_mosaic.version = 11 : i64} {
  func.func @_matmul_bias_kernel(%arg0: i32, %arg1: memref<64x8xbf16, #tpu.memory_space<vmem>>, %arg2: memref<8x4xbf16, #tpu.memory_space<vmem>>, %arg3: memref<1x4xf32, #tpu.memory_space<vmem>>, %arg4: memref<64x4xf32, #tpu.memory_space<vmem>>) attributes {dimension_semantics = [#tpu.dimension_semantics<parallel>], iteration_bounds = array<i64: 2>, scalar_prefetch = 0 : i64, scratch_operands = 0 : i64, tpu.core_type = #tpu.core_type<tc>, window_params = [{transform_indices = @transform_0, window_bounds = array<i64: 64, 8>}, {pipeline_mode = #tpu.pipeline_mode<synchronous>, transform_indices = @transform_1, window_bounds = array<i64: 8, 4>}, {pipeline_mode = #tpu.pipeline_mode<synchronous>, transform_indices = @transform_2, window_bounds = array<i64: 1, 4>}, {transform_indices = @transform_3, window_bounds = array<i64: 64, 4>}]} {
    %c0 = arith.constant 0 : index
    %c0_0 = arith.constant 0 : index
    %0 = vector.load %arg1[%c0, %c0_0] : memref<64x8xbf16, #tpu.memory_space<vmem>>, vector<64x8xbf16>
    %c0_1 = arith.constant 0 : index
    %c0_2 = arith.constant 0 : index
    %1 = vector.load %arg2[%c0_1, %c0_2] : memref<8x4xbf16, #tpu.memory_space<vmem>>, vector<8x4xbf16>
    %cst = arith.constant dense<0.000000e+00> : vector<64x4xf32>
    %2 = tpu.matmul %0, %1, %cst {dimension_numbers = #tpu.dot_dimension_numbers<[1], [0], [0], [1], [0, 0, 1, 1], [], []>} : vector<64x8xbf16>, vector<8x4xbf16>, vector<64x4xf32> -> vector<64x4xf32>
    %c0_3 = arith.constant 0 : index
    %c0_4 = arith.constant 0 : index
    %3 = vector.load %arg3[%c0_3, %c0_4] : memref<1x4xf32, #tpu.memory_space<vmem>>, vector<1x4xf32>
    %4 = vector.broadcast %3 : vector<1x4xf32> to vector<64x4xf32>
    %5 = arith.addf %2, %4 : vector<64x4xf32>
    %c0_5 = arith.constant 0 : index
    %c0_6 = arith.constant 0 : index
    %6 = vector.load %arg4[%c0_5, %c0_6] : memref<64x4xf32, #tpu.memory_space<vmem>>, vector<64x4xf32>
    tpu.vector_store %arg4[%c0_5, %c0_6], %5 {strides = array<i32>} : memref<64x4xf32, #tpu.memory_space<vmem>>, vector<64x4xf32>,
    return
  }
  func.func @transform_0(%arg0: i32) -> (i32, i32) {
    %c0_i32 = arith.constant 0 : i32
    %c0_i32_0 = arith.constant 0 : i32
    return %arg0, %c0_i32 : i32, i32
  }
  func.func @transform_1(%arg0: i32) -> (i32, i32) {
    %c0_i32 = arith.constant 0 : i32
    %c0_i32_0 = arith.constant 0 : i32
    %c0_i32_1 = arith.constant 0 : i32
    return %c0_i32, %c0_i32_0 : i32, i32
  }
  func.func @transform_2(%arg0: i32) -> (i32, i32) {
    %c0_i32 = arith.constant 0 : i32
    %c0_i32_0 = arith.constant 0 : i32
    %c0_i32_1 = arith.constant 0 : i32
    return %c0_i32, %c0_i32_0 : i32, i32
  }
  func.func @transform_3(%arg0: i32) -> (i32, i32) {
    %c0_i32 = arith.constant 0 : i32
    %c0_i32_0 = arith.constant 0 : i32
    return %arg0, %c0_i32 : i32, i32
  }
}

module attributes {stable_mosaic.version = 11 : i64} {
  func.func @_conv3x3_kernel(%arg0: i32, %arg1: memref<1024x8xbf16, #tpu.memory_space<any>>, %arg2: memref<1024x1xf32, #tpu.memory_space<any>>, %arg3: memref<3x3x8x4xbf16, #tpu.memory_space<vmem>>, %arg4: memref<1x4xf32, #tpu.memory_space<vmem>>, %arg5: memref<128x4xbf16, #tpu.memory_space<vmem>>, %arg6: memref<8x4xf32, #tpu.memory_space<vmem>>, %arg7: memref<8x4xf32, #tpu.memory_space<vmem>>, %arg8: memref<176x8xbf16, #tpu.memory_space<vmem>>, %arg9: memref<176x1xf32, #tpu.memory_space<vmem>>, %arg10: memref<2x!tpu.dma_semaphore, #tpu.memory_space<semaphore_mem>>) attributes {dimension_semantics = [#tpu.dimension_semantics<parallel>], iteration_bounds = array<i64: 6>, scalar_prefetch = 0 : i64, scratch_operands = 3 : i64, tpu.core_type = #tpu.core_type<tc>, window_params = [{}, {}, {pipeline_mode = #tpu.pipeline_mode<synchronous>, transform_indices = @transform_2, window_bounds = array<i64: 3, 3, 8, 4>}, {pipeline_mode = #tpu.pipeline_mode<synchronous>, transform_indices = @transform_3, window_bounds = array<i64: 1, 4>}, {transform_indices = @transform_4, window_bounds = array<i64: 128, 4>}, {transform_indices = @transform_5, window_bounds = array<i64: 8, 4>}, {transform_indices = @transform_6, window_bounds = array<i64: 8, 4>}]} {
    %c128_i32 = arith.constant 128 : i32
    %0 = arith.muli %arg0, %c128_i32 : i32
    %c104_i32 = arith.constant 104 : i32
    %1 = arith.addi %c104_i32, %0 : i32
    %c0_i32 = arith.constant 0 : i32
    %c0_i32_0 = arith.constant 0 : i32
    %2 = tpu.memref_slice %arg1[%1, %c0_i32_0] : memref<1024x8xbf16, #tpu.memory_space<any>> -> memref<176x8xbf16, #tpu.memory_space<any>>
    %3 = tpu.memref_slice %arg10[%c0_i32] : memref<2x!tpu.dma_semaphore, #tpu.memory_space<semaphore_mem>> -> memref<1x!tpu.dma_semaphore, #tpu.memory_space<semaphore_mem>>
    %4 = tpu.memref_squeeze %3 : memref<1x!tpu.dma_semaphore, #tpu.memory_space<semaphore_mem>> -> memref<!tpu.dma_semaphore, #tpu.memory_space<semaphore_mem>>
    tpu.enqueue_dma source(%2 : memref<176x8xbf16, #tpu.memory_space<any>>) target(%arg8 : memref<176x8xbf16, #tpu.memory_space<vmem>>) target_semaphore(%4 : memref<!tpu.dma_semaphore, #tpu.memory_space<semaphore_mem>>)
    %c1_i32 = arith.constant 1 : i32
    %c0_i32_1 = arith.constant 0 : i32
    %5 = tpu.memref_slice %arg2[%1, %c0_i32_1] : memref<1024x1xf32, #tpu.memory_space<any>> -> memref<176x1xf32, #tpu.memory_space<any>>
    %6 = tpu.memref_slice %arg10[%c1_i32] : memref<2x!tpu.dma_semaphore, #tpu.memory_space<semaphore_mem>> -> memref<1x!tpu.dma_semaphore, #tpu.memory_space<semaphore_mem>>
    %7 = tpu.memref_squeeze %6 : memref<1x!tpu.dma_semaphore, #tpu.memory_space<semaphore_mem>> -> memref<!tpu.dma_semaphore, #tpu.memory_space<semaphore_mem>>
    tpu.enqueue_dma source(%5 : memref<176x1xf32, #tpu.memory_space<any>>) target(%arg9 : memref<176x1xf32, #tpu.memory_space<vmem>>) target_semaphore(%7 : memref<!tpu.dma_semaphore, #tpu.memory_space<semaphore_mem>>)
    %c0_i32_2 = arith.constant 0 : i32
    %c0_i32_3 = arith.constant 0 : i32
    %8 = tpu.memref_slice %arg1[%1, %c0_i32_3] : memref<1024x8xbf16, #tpu.memory_space<any>> -> memref<176x8xbf16, #tpu.memory_space<any>>
    %9 = tpu.memref_slice %arg10[%c0_i32_2] : memref<2x!tpu.dma_semaphore, #tpu.memory_space<semaphore_mem>> -> memref<1x!tpu.dma_semaphore, #tpu.memory_space<semaphore_mem>>
    %10 = tpu.memref_squeeze %9 : memref<1x!tpu.dma_semaphore, #tpu.memory_space<semaphore_mem>> -> memref<!tpu.dma_semaphore, #tpu.memory_space<semaphore_mem>>
    tpu.wait_dma2 semaphore(%10 : memref<!tpu.dma_semaphore, #tpu.memory_space<semaphore_mem>>) src(%8 : memref<176x8xbf16, #tpu.memory_space<any>>) dst(%arg8 : memref<176x8xbf16, #tpu.memory_space<vmem>>)
    %c1_i32_4 = arith.constant 1 : i32
    %c0_i32_5 = arith.constant 0 : i32
    %11 = tpu.memref_slice %arg2[%1, %c0_i32_5] : memref<1024x1xf32, #tpu.memory_space<any>> -> memref<176x1xf32, #tpu.memory_space<any>>
    %12 = tpu.memref_slice %arg10[%c1_i32_4] : memref<2x!tpu.dma_semaphore, #tpu.memory_space<semaphore_mem>> -> memref<1x!tpu.dma_semaphore, #tpu.memory_space<semaphore_mem>>
    %13 = tpu.memref_squeeze %12 : memref<1x!tpu.dma_semaphore, #tpu.memory_space<semaphore_mem>> -> memref<!tpu.dma_semaphore, #tpu.memory_space<semaphore_mem>>
    tpu.wait_dma2 semaphore(%13 : memref<!tpu.dma_semaphore, #tpu.memory_space<semaphore_mem>>) src(%11 : memref<176x1xf32, #tpu.memory_space<any>>) dst(%arg9 : memref<176x1xf32, #tpu.memory_space<vmem>>)
    %c0 = arith.constant 0 : index
    %c0_6 = arith.constant 0 : index
    %14 = vector.load %arg9[%c0, %c0_6] : memref<176x1xf32, #tpu.memory_space<vmem>>, vector<176x1xf32>
    %c0_7 = arith.constant 0 : index
    %c0_8 = arith.constant 0 : index
    %15 = vector.load %arg8[%c0_7, %c0_8] : memref<176x8xbf16, #tpu.memory_space<vmem>>, vector<176x8xbf16>
    %cst = arith.constant 0.000000e+00 : f32
    %16 = vector.broadcast %cst : f32 to vector<176x1xf32>
    %17 = arith.cmpf ogt, %14, %16 : vector<176x1xf32>
    %cst_9 = arith.constant 0.000000e+00 : bf16
    %18 = vector.broadcast %cst_9 : bf16 to vector<176x8xbf16>
    %19 = vector.shape_cast %17 : vector<176x1xi1> to vector<176x1xi1>
    %20 = vector.broadcast %19 : vector<176x1xi1> to vector<176x8xi1>
    %21 = arith.select %20, %15, %18 : vector<176x8xi1>, vector<176x8xbf16>
    %22 = vector.extract_strided_slice %21 {offsets = [5, 0], sizes = [128, 8], strides = [1, 1]} : vector<176x8xbf16> to vector<128x8xbf16>
    %c0_10 = arith.constant 0 : index
    %c0_11 = arith.constant 0 : index
    %c0_12 = arith.constant 0 : index
    %c0_13 = arith.constant 0 : index
    %23 = vector.load %arg3[%c0_10, %c0_11, %c0_12, %c0_13] : memref<3x3x8x4xbf16, #tpu.memory_space<vmem>>, vector<1x1x8x4xbf16>
    %24 = vector.shape_cast %23 : vector<1x1x8x4xbf16> to vector<8x4xbf16>
    %cst_14 = arith.constant dense<0.000000e+00> : vector<128x4xf32>
    %25 = tpu.matmul %22, %24, %cst_14 {dimension_numbers = #tpu.dot_dimension_numbers<[1], [0], [0], [1], [0, 0, 1, 1], [], []>} : vector<128x8xbf16>, vector<8x4xbf16>, vector<128x4xf32> -> vector<128x4xf32>
    %26 = vector.extract_strided_slice %21 {offsets = [6, 0], sizes = [128, 8], strides = [1, 1]} : vector<176x8xbf16> to vector<128x8xbf16>
    %c0_15 = arith.constant 0 : index
    %c1 = arith.constant 1 : index
    %c0_16 = arith.constant 0 : index
    %c0_17 = arith.constant 0 : index
    %27 = vector.load %arg3[%c0_15, %c1, %c0_16, %c0_17] : memref<3x3x8x4xbf16, #tpu.memory_space<vmem>>, vector<1x1x8x4xbf16>
    %28 = vector.shape_cast %27 : vector<1x1x8x4xbf16> to vector<8x4xbf16>
    %cst_18 = arith.constant dense<0.000000e+00> : vector<128x4xf32>
    %29 = tpu.matmul %26, %28, %cst_18 {dimension_numbers = #tpu.dot_dimension_numbers<[1], [0], [0], [1], [0, 0, 1, 1], [], []>} : vector<128x8xbf16>, vector<8x4xbf16>, vector<128x4xf32> -> vector<128x4xf32>
    %30 = arith.addf %25, %29 : vector<128x4xf32>
    %31 = vector.extract_strided_slice %21 {offsets = [7, 0], sizes = [128, 8], strides = [1, 1]} : vector<176x8xbf16> to vector<128x8xbf16>
    %c0_19 = arith.constant 0 : index
    %c2 = arith.constant 2 : index
    %c0_20 = arith.constant 0 : index
    %c0_21 = arith.constant 0 : index
    %32 = vector.load %arg3[%c0_19, %c2, %c0_20, %c0_21] : memref<3x3x8x4xbf16, #tpu.memory_space<vmem>>, vector<1x1x8x4xbf16>
    %33 = vector.shape_cast %32 : vector<1x1x8x4xbf16> to vector<8x4xbf16>
    %cst_22 = arith.constant dense<0.000000e+00> : vector<128x4xf32>
    %34 = tpu.matmul %31, %33, %cst_22 {dimension_numbers = #tpu.dot_dimension_numbers<[1], [0], [0], [1], [0, 0, 1, 1], [], []>} : vector<128x8xbf16>, vector<8x4xbf16>, vector<128x4xf32> -> vector<128x4xf32>
    %35 = arith.addf %30, %34 : vector<128x4xf32>
    %36 = vector.extract_strided_slice %21 {offsets = [23, 0], sizes = [128, 8], strides = [1, 1]} : vector<176x8xbf16> to vector<128x8xbf16>
    %c1_23 = arith.constant 1 : index
    %c0_24 = arith.constant 0 : index
    %c0_25 = arith.constant 0 : index
    %c0_26 = arith.constant 0 : index
    %37 = vector.load %arg3[%c1_23, %c0_24, %c0_25, %c0_26] : memref<3x3x8x4xbf16, #tpu.memory_space<vmem>>, vector<1x1x8x4xbf16>
    %38 = vector.shape_cast %37 : vector<1x1x8x4xbf16> to vector<8x4xbf16>
    %cst_27 = arith.constant dense<0.000000e+00> : vector<128x4xf32>
    %39 = tpu.matmul %36, %38, %cst_27 {dimension_numbers = #tpu.dot_dimension_numbers<[1], [0], [0], [1], [0, 0, 1, 1], [], []>} : vector<128x8xbf16>, vector<8x4xbf16>, vector<128x4xf32> -> vector<128x4xf32>
    %40 = arith.addf %35, %39 : vector<128x4xf32>
    %41 = vector.extract_strided_slice %21 {offsets = [24, 0], sizes = [128, 8], strides = [1, 1]} : vector<176x8xbf16> to vector<128x8xbf16>
    %c1_28 = arith.constant 1 : index
    %c1_29 = arith.constant 1 : index
    %c0_30 = arith.constant 0 : index
    %c0_31 = arith.constant 0 : index
    %42 = vector.load %arg3[%c1_28, %c1_29, %c0_30, %c0_31] : memref<3x3x8x4xbf16, #tpu.memory_space<vmem>>, vector<1x1x8x4xbf16>
    %43 = vector.shape_cast %42 : vector<1x1x8x4xbf16> to vector<8x4xbf16>
    %cst_32 = arith.constant dense<0.000000e+00> : vector<128x4xf32>
    %44 = tpu.matmul %41, %43, %cst_32 {dimension_numbers = #tpu.dot_dimension_numbers<[1], [0], [0], [1], [0, 0, 1, 1], [], []>} : vector<128x8xbf16>, vector<8x4xbf16>, vector<128x4xf32> -> vector<128x4xf32>
    %45 = arith.addf %40, %44 : vector<128x4xf32>
    %46 = vector.extract_strided_slice %21 {offsets = [25, 0], sizes = [128, 8], strides = [1, 1]} : vector<176x8xbf16> to vector<128x8xbf16>
    %c1_33 = arith.constant 1 : index
    %c2_34 = arith.constant 2 : index
    %c0_35 = arith.constant 0 : index
    %c0_36 = arith.constant 0 : index
    %47 = vector.load %arg3[%c1_33, %c2_34, %c0_35, %c0_36] : memref<3x3x8x4xbf16, #tpu.memory_space<vmem>>, vector<1x1x8x4xbf16>
    %48 = vector.shape_cast %47 : vector<1x1x8x4xbf16> to vector<8x4xbf16>
    %cst_37 = arith.constant dense<0.000000e+00> : vector<128x4xf32>
    %49 = tpu.matmul %46, %48, %cst_37 {dimension_numbers = #tpu.dot_dimension_numbers<[1], [0], [0], [1], [0, 0, 1, 1], [], []>} : vector<128x8xbf16>, vector<8x4xbf16>, vector<128x4xf32> -> vector<128x4xf32>
    %50 = arith.addf %45, %49 : vector<128x4xf32>
    %51 = vector.extract_strided_slice %21 {offsets = [41, 0], sizes = [128, 8], strides = [1, 1]} : vector<176x8xbf16> to vector<128x8xbf16>
    %c2_38 = arith.constant 2 : index
    %c0_39 = arith.constant 0 : index
    %c0_40 = arith.constant 0 : index
    %c0_41 = arith.constant 0 : index
    %52 = vector.load %arg3[%c2_38, %c0_39, %c0_40, %c0_41] : memref<3x3x8x4xbf16, #tpu.memory_space<vmem>>, vector<1x1x8x4xbf16>
    %53 = vector.shape_cast %52 : vector<1x1x8x4xbf16> to vector<8x4xbf16>
    %cst_42 = arith.constant dense<0.000000e+00> : vector<128x4xf32>
    %54 = tpu.matmul %51, %53, %cst_42 {dimension_numbers = #tpu.dot_dimension_numbers<[1], [0], [0], [1], [0, 0, 1, 1], [], []>} : vector<128x8xbf16>, vector<8x4xbf16>, vector<128x4xf32> -> vector<128x4xf32>
    %55 = arith.addf %50, %54 : vector<128x4xf32>
    %56 = vector.extract_strided_slice %21 {offsets = [42, 0], sizes = [128, 8], strides = [1, 1]} : vector<176x8xbf16> to vector<128x8xbf16>
    %c2_43 = arith.constant 2 : index
    %c1_44 = arith.constant 1 : index
    %c0_45 = arith.constant 0 : index
    %c0_46 = arith.constant 0 : index
    %57 = vector.load %arg3[%c2_43, %c1_44, %c0_45, %c0_46] : memref<3x3x8x4xbf16, #tpu.memory_space<vmem>>, vector<1x1x8x4xbf16>
    %58 = vector.shape_cast %57 : vector<1x1x8x4xbf16> to vector<8x4xbf16>
    %cst_47 = arith.constant dense<0.000000e+00> : vector<128x4xf32>
    %59 = tpu.matmul %56, %58, %cst_47 {dimension_numbers = #tpu.dot_dimension_numbers<[1], [0], [0], [1], [0, 0, 1, 1], [], []>} : vector<128x8xbf16>, vector<8x4xbf16>, vector<128x4xf32> -> vector<128x4xf32>
    %60 = arith.addf %55, %59 : vector<128x4xf32>
    %61 = vector.extract_strided_slice %21 {offsets = [43, 0], sizes = [128, 8], strides = [1, 1]} : vector<176x8xbf16> to vector<128x8xbf16>
    %c2_48 = arith.constant 2 : index
    %c2_49 = arith.constant 2 : index
    %c0_50 = arith.constant 0 : index
    %c0_51 = arith.constant 0 : index
    %62 = vector.load %arg3[%c2_48, %c2_49, %c0_50, %c0_51] : memref<3x3x8x4xbf16, #tpu.memory_space<vmem>>, vector<1x1x8x4xbf16>
    %63 = vector.shape_cast %62 : vector<1x1x8x4xbf16> to vector<8x4xbf16>
    %cst_52 = arith.constant dense<0.000000e+00> : vector<128x4xf32>
    %64 = tpu.matmul %61, %63, %cst_52 {dimension_numbers = #tpu.dot_dimension_numbers<[1], [0], [0], [1], [0, 0, 1, 1], [], []>} : vector<128x8xbf16>, vector<8x4xbf16>, vector<128x4xf32> -> vector<128x4xf32>
    %65 = arith.addf %60, %64 : vector<128x4xf32>
    %c0_53 = arith.constant 0 : index
    %c0_54 = arith.constant 0 : index
    %66 = vector.load %arg4[%c0_53, %c0_54] : memref<1x4xf32, #tpu.memory_space<vmem>>, vector<1x4xf32>
    %67 = vector.broadcast %66 : vector<1x4xf32> to vector<128x4xf32>
    %68 = arith.addf %65, %67 : vector<128x4xf32>
    %69 = vector.extract_strided_slice %14 {offsets = [24, 0], sizes = [128, 1], strides = [1, 1]} : vector<176x1xf32> to vector<128x1xf32>
    %cst_55 = arith.constant 0.000000e+00 : f32
    %70 = vector.broadcast %cst_55 : f32 to vector<128x1xf32>
    %71 = arith.cmpf ogt, %69, %70 : vector<128x1xf32>
    %cst_56 = arith.constant 0.000000e+00 : f32
    %72 = vector.shape_cast %71 : vector<128x1xi1> to vector<128x1xi1>
    %73 = vector.broadcast %72 : vector<128x1xi1> to vector<128x4xi1>
    %74 = vector.broadcast %cst_56 : f32 to vector<128x4xf32>
    %75 = arith.select %73, %68, %74 : vector<128x4xi1>, vector<128x4xf32>
    %cst_57 = arith.constant dense<0.000000e+00> : vector<4xf32>
    %76 = vector.multi_reduction <add>, %75, %cst_57 [0] : vector<128x4xf32> to vector<4xf32>
    %77 = vector.shape_cast %76 : vector<4xf32> to vector<1x4xf32>
    %78 = vector.shape_cast %77 : vector<1x4xf32> to vector<1x4xf32>
    %79 = vector.broadcast %78 : vector<1x4xf32> to vector<8x4xf32>
    %c0_58 = arith.constant 0 : index
    %c0_59 = arith.constant 0 : index
    %80 = vector.load %arg6[%c0_58, %c0_59] : memref<8x4xf32, #tpu.memory_space<vmem>>, vector<8x4xf32>
    tpu.vector_store %arg6[%c0_58, %c0_59], %79 {strides = array<i32>} : memref<8x4xf32, #tpu.memory_space<vmem>>, vector<8x4xf32>,
    %81 = arith.mulf %75, %75 : vector<128x4xf32>
    %cst_60 = arith.constant dense<0.000000e+00> : vector<4xf32>
    %82 = vector.multi_reduction <add>, %81, %cst_60 [0] : vector<128x4xf32> to vector<4xf32>
    %83 = vector.shape_cast %82 : vector<4xf32> to vector<1x4xf32>
    %84 = vector.shape_cast %83 : vector<1x4xf32> to vector<1x4xf32>
    %85 = vector.broadcast %84 : vector<1x4xf32> to vector<8x4xf32>
    %c0_61 = arith.constant 0 : index
    %c0_62 = arith.constant 0 : index
    %86 = vector.load %arg7[%c0_61, %c0_62] : memref<8x4xf32, #tpu.memory_space<vmem>>, vector<8x4xf32>
    tpu.vector_store %arg7[%c0_61, %c0_62], %85 {strides = array<i32>} : memref<8x4xf32, #tpu.memory_space<vmem>>, vector<8x4xf32>,
    %87 = arith.truncf %68 : vector<128x4xf32> to vector<128x4xbf16>
    %c0_63 = arith.constant 0 : index
    %c0_64 = arith.constant 0 : index
    %88 = vector.load %arg5[%c0_63, %c0_64] : memref<128x4xbf16, #tpu.memory_space<vmem>>, vector<128x4xbf16>
    tpu.vector_store %arg5[%c0_63, %c0_64], %87 {strides = array<i32>} : memref<128x4xbf16, #tpu.memory_space<vmem>>, vector<128x4xbf16>,
    return
  }
  func.func @transform_2(%arg0: i32) -> (i32, i32, i32, i32) {
    %c0_i32 = arith.constant 0 : i32
    %c0_i32_0 = arith.constant 0 : i32
    %c0_i32_1 = arith.constant 0 : i32
    %c0_i32_2 = arith.constant 0 : i32
    %c0_i32_3 = arith.constant 0 : i32
    return %c0_i32, %c0_i32_0, %c0_i32_1, %c0_i32_2 : i32, i32, i32, i32
  }
  func.func @transform_3(%arg0: i32) -> (i32, i32) {
    %c0_i32 = arith.constant 0 : i32
    %c0_i32_0 = arith.constant 0 : i32
    %c0_i32_1 = arith.constant 0 : i32
    return %c0_i32, %c0_i32_0 : i32, i32
  }
  func.func @transform_4(%arg0: i32) -> (i32, i32) {
    %c1_i32 = arith.constant 1 : i32
    %0 = arith.addi %arg0, %c1_i32 : i32
    %c0_i32 = arith.constant 0 : i32
    %c0_i32_0 = arith.constant 0 : i32
    return %0, %c0_i32 : i32, i32
  }
  func.func @transform_5(%arg0: i32) -> (i32, i32) {
    %c0_i32 = arith.constant 0 : i32
    %c0_i32_0 = arith.constant 0 : i32
    return %arg0, %c0_i32 : i32, i32
  }
  func.func @transform_6(%arg0: i32) -> (i32, i32) {
    %c0_i32 = arith.constant 0 : i32
    %c0_i32_0 = arith.constant 0 : i32
    return %arg0, %c0_i32 : i32, i32
  }
}

module attributes {stable_mosaic.version = 11 : i64} {
  func.func @_affine_relu_kernel(%arg0: i32, %arg1: memref<16x128xbf16, #tpu.memory_space<vmem>>, %arg2: memref<1x128xf32, #tpu.memory_space<vmem>>, %arg3: memref<1x128xf32, #tpu.memory_space<vmem>>, %arg4: memref<16x128xbf16, #tpu.memory_space<vmem>>) attributes {dimension_semantics = [#tpu.dimension_semantics<parallel>], iteration_bounds = array<i64: 2>, scalar_prefetch = 0 : i64, scratch_operands = 0 : i64, tpu.core_type = #tpu.core_type<tc>, window_params = [{transform_indices = @transform_0, window_bounds = array<i64: 16, 128>}, {pipeline_mode = #tpu.pipeline_mode<synchronous>, transform_indices = @transform_1, window_bounds = array<i64: 1, 128>}, {pipeline_mode = #tpu.pipeline_mode<synchronous>, transform_indices = @transform_2, window_bounds = array<i64: 1, 128>}, {transform_indices = @transform_3, window_bounds = array<i64: 16, 128>}]} {
    %c0 = arith.constant 0 : index
    %c0_0 = arith.constant 0 : index
    %0 = vector.load %arg1[%c0, %c0_0] : memref<16x128xbf16, #tpu.memory_space<vmem>>, vector<16x128xbf16>
    %1 = arith.extf %0 : vector<16x128xbf16> to vector<16x128xf32>
    %c0_1 = arith.constant 0 : index
    %c0_2 = arith.constant 0 : index
    %2 = vector.load %arg2[%c0_1, %c0_2] : memref<1x128xf32, #tpu.memory_space<vmem>>, vector<1x128xf32>
    %3 = vector.broadcast %2 : vector<1x128xf32> to vector<16x128xf32>
    %4 = arith.mulf %1, %3 : vector<16x128xf32>
    %c0_3 = arith.constant 0 : index
    %c0_4 = arith.constant 0 : index
    %5 = vector.load %arg3[%c0_3, %c0_4] : memref<1x128xf32, #tpu.memory_space<vmem>>, vector<1x128xf32>
    %6 = vector.broadcast %5 : vector<1x128xf32> to vector<16x128xf32>
    %7 = arith.addf %4, %6 : vector<16x128xf32>
    %cst = arith.constant 0.000000e+00 : f32
    %8 = vector.broadcast %cst : f32 to vector<16x128xf32>
    %9 = arith.maximumf %7, %8 : vector<16x128xf32>
    %10 = arith.truncf %9 : vector<16x128xf32> to vector<16x128xbf16>
    %c0_5 = arith.constant 0 : index
    %c0_6 = arith.constant 0 : index
    %11 = vector.load %arg4[%c0_5, %c0_6] : memref<16x128xbf16, #tpu.memory_space<vmem>>, vector<16x128xbf16>
    tpu.vector_store %arg4[%c0_5, %c0_6], %10 {strides = array<i32>} : memref<16x128xbf16, #tpu.memory_space<vmem>>, vector<16x128xbf16>,
    return
  }
  func.func @transform_0(%arg0: i32) -> (i32, i32) {
    %c0_i32 = arith.constant 0 : i32
    %c0_i32_0 = arith.constant 0 : i32
    return %arg0, %c0_i32 : i32, i32
  }
  func.func @transform_1(%arg0: i32) -> (i32, i32) {
    %c0_i32 = arith.constant 0 : i32
    %c0_i32_0 = arith.constant 0 : i32
    %c0_i32_1 = arith.constant 0 : i32
    return %c0_i32, %c0_i32_0 : i32, i32
  }
  func.func @transform_2(%arg0: i32) -> (i32, i32) {
    %c0_i32 = arith.constant 0 : i32
    %c0_i32_0 = arith.constant 0 : i32
    %c0_i32_1 = arith.constant 0 : i32
    return %c0_i32, %c0_i32_0 : i32, i32
  }
  func.func @transform_3(%arg0: i32) -> (i32, i32) {
    %c0_i32 = arith.constant 0 : i32
    %c0_i32_0 = arith.constant 0 : i32
    return %arg0, %c0_i32 : i32, i32
  }
}

module attributes {stable_mosaic.version = 11 : i64} {
  func.func @_conv3x3_kernel(%arg0: i32, %arg1: memref<1024x4xbf16, #tpu.memory_space<any>>, %arg2: memref<1024x1xf32, #tpu.memory_space<any>>, %arg3: memref<3x3x4x4xbf16, #tpu.memory_space<vmem>>, %arg4: memref<1x4xf32, #tpu.memory_space<vmem>>, %arg5: memref<128x4xbf16, #tpu.memory_space<vmem>>, %arg6: memref<8x4xf32, #tpu.memory_space<vmem>>, %arg7: memref<8x4xf32, #tpu.memory_space<vmem>>, %arg8: memref<176x4xbf16, #tpu.memory_space<vmem>>, %arg9: memref<176x1xf32, #tpu.memory_space<vmem>>, %arg10: memref<2x!tpu.dma_semaphore, #tpu.memory_space<semaphore_mem>>) attributes {dimension_semantics = [#tpu.dimension_semantics<parallel>], iteration_bounds = array<i64: 6>, scalar_prefetch = 0 : i64, scratch_operands = 3 : i64, tpu.core_type = #tpu.core_type<tc>, window_params = [{}, {}, {pipeline_mode = #tpu.pipeline_mode<synchronous>, transform_indices = @transform_2, window_bounds = array<i64: 3, 3, 4, 4>}, {pipeline_mode = #tpu.pipeline_mode<synchronous>, transform_indices = @transform_3, window_bounds = array<i64: 1, 4>}, {transform_indices = @transform_4, window_bounds = array<i64: 128, 4>}, {transform_indices = @transform_5, window_bounds = array<i64: 8, 4>}, {transform_indices = @transform_6, window_bounds = array<i64: 8, 4>}]} {
    %c128_i32 = arith.constant 128 : i32
    %0 = arith.muli %arg0, %c128_i32 : i32
    %c104_i32 = arith.constant 104 : i32
    %1 = arith.addi %c104_i32, %0 : i32
    %c0_i32 = arith.constant 0 : i32
    %c0_i32_0 = arith.constant 0 : i32
    %2 = tpu.memref_slice %arg1[%1, %c0_i32_0] : memref<1024x4xbf16, #tpu.memory_space<any>> -> memref<176x4xbf16, #tpu.memory_space<any>>
    %3 = tpu.memref_slice %arg10[%c0_i32] : memref<2x!tpu.dma_semaphore, #tpu.memory_space<semaphore_mem>> -> memref<1x!tpu.dma_semaphore, #tpu.memory_space<semaphore_mem>>
    %4 = tpu.memref_squeeze %3 : memref<1x!tpu.dma_semaphore, #tpu.memory_space<semaphore_mem>> -> memref<!tpu.dma_semaphore, #tpu.memory_space<semaphore_mem>>
    tpu.enqueue_dma source(%2 : memref<176x4xbf16, #tpu.memory_space<any>>) target(%arg8 : memref<176x4xbf16, #tpu.memory_space<vmem>>) target_semaphore(%4 : memref<!tpu.dma_semaphore, #tpu.memory_space<semaphore_mem>>)
    %c1_i32 = arith.constant 1 : i32
    %c0_i32_1 = arith.constant 0 : i32
    %5 = tpu.memref_slice %arg2[%1, %c0_i32_1] : memref<1024x1xf32, #tpu.memory_space<any>> -> memref<176x1xf32, #tpu.memory_space<any>>
    %6 = tpu.memref_slice %arg10[%c1_i32] : memref<2x!tpu.dma_semaphore, #tpu.memory_space<semaphore_mem>> -> memref<1x!tpu.dma_semaphore, #tpu.memory_space<semaphore_mem>>
    %7 = tpu.memref_squeeze %6 : memref<1x!tpu.dma_semaphore, #tpu.memory_space<semaphore_mem>> -> memref<!tpu.dma_semaphore, #tpu.memory_space<semaphore_mem>>
    tpu.enqueue_dma source(%5 : memref<176x1xf32, #tpu.memory_space<any>>) target(%arg9 : memref<176x1xf32, #tpu.memory_space<vmem>>) target_semaphore(%7 : memref<!tpu.dma_semaphore, #tpu.memory_space<semaphore_mem>>)
    %c0_i32_2 = arith.constant 0 : i32
    %c0_i32_3 = arith.constant 0 : i32
    %8 = tpu.memref_slice %arg1[%1, %c0_i32_3] : memref<1024x4xbf16, #tpu.memory_space<any>> -> memref<176x4xbf16, #tpu.memory_space<any>>
    %9 = tpu.memref_slice %arg10[%c0_i32_2] : memref<2x!tpu.dma_semaphore, #tpu.memory_space<semaphore_mem>> -> memref<1x!tpu.dma_semaphore, #tpu.memory_space<semaphore_mem>>
    %10 = tpu.memref_squeeze %9 : memref<1x!tpu.dma_semaphore, #tpu.memory_space<semaphore_mem>> -> memref<!tpu.dma_semaphore, #tpu.memory_space<semaphore_mem>>
    tpu.wait_dma2 semaphore(%10 : memref<!tpu.dma_semaphore, #tpu.memory_space<semaphore_mem>>) src(%8 : memref<176x4xbf16, #tpu.memory_space<any>>) dst(%arg8 : memref<176x4xbf16, #tpu.memory_space<vmem>>)
    %c1_i32_4 = arith.constant 1 : i32
    %c0_i32_5 = arith.constant 0 : i32
    %11 = tpu.memref_slice %arg2[%1, %c0_i32_5] : memref<1024x1xf32, #tpu.memory_space<any>> -> memref<176x1xf32, #tpu.memory_space<any>>
    %12 = tpu.memref_slice %arg10[%c1_i32_4] : memref<2x!tpu.dma_semaphore, #tpu.memory_space<semaphore_mem>> -> memref<1x!tpu.dma_semaphore, #tpu.memory_space<semaphore_mem>>
    %13 = tpu.memref_squeeze %12 : memref<1x!tpu.dma_semaphore, #tpu.memory_space<semaphore_mem>> -> memref<!tpu.dma_semaphore, #tpu.memory_space<semaphore_mem>>
    tpu.wait_dma2 semaphore(%13 : memref<!tpu.dma_semaphore, #tpu.memory_space<semaphore_mem>>) src(%11 : memref<176x1xf32, #tpu.memory_space<any>>) dst(%arg9 : memref<176x1xf32, #tpu.memory_space<vmem>>)
    %c0 = arith.constant 0 : index
    %c0_6 = arith.constant 0 : index
    %14 = vector.load %arg9[%c0, %c0_6] : memref<176x1xf32, #tpu.memory_space<vmem>>, vector<176x1xf32>
    %c0_7 = arith.constant 0 : index
    %c0_8 = arith.constant 0 : index
    %15 = vector.load %arg8[%c0_7, %c0_8] : memref<176x4xbf16, #tpu.memory_space<vmem>>, vector<176x4xbf16>
    %cst = arith.constant 0.000000e+00 : f32
    %16 = vector.broadcast %cst : f32 to vector<176x1xf32>
    %17 = arith.cmpf ogt, %14, %16 : vector<176x1xf32>
    %cst_9 = arith.constant 0.000000e+00 : bf16
    %18 = vector.broadcast %cst_9 : bf16 to vector<176x4xbf16>
    %19 = vector.shape_cast %17 : vector<176x1xi1> to vector<176x1xi1>
    %20 = vector.broadcast %19 : vector<176x1xi1> to vector<176x4xi1>
    %21 = arith.select %20, %15, %18 : vector<176x4xi1>, vector<176x4xbf16>
    %22 = vector.extract_strided_slice %21 {offsets = [5, 0], sizes = [128, 4], strides = [1, 1]} : vector<176x4xbf16> to vector<128x4xbf16>
    %c0_10 = arith.constant 0 : index
    %c0_11 = arith.constant 0 : index
    %c0_12 = arith.constant 0 : index
    %c0_13 = arith.constant 0 : index
    %23 = vector.load %arg3[%c0_10, %c0_11, %c0_12, %c0_13] : memref<3x3x4x4xbf16, #tpu.memory_space<vmem>>, vector<1x1x4x4xbf16>
    %24 = vector.shape_cast %23 : vector<1x1x4x4xbf16> to vector<4x4xbf16>
    %cst_14 = arith.constant dense<0.000000e+00> : vector<128x4xf32>
    %25 = tpu.matmul %22, %24, %cst_14 {dimension_numbers = #tpu.dot_dimension_numbers<[1], [0], [0], [1], [0, 0, 1, 1], [], []>} : vector<128x4xbf16>, vector<4x4xbf16>, vector<128x4xf32> -> vector<128x4xf32>
    %26 = vector.extract_strided_slice %21 {offsets = [6, 0], sizes = [128, 4], strides = [1, 1]} : vector<176x4xbf16> to vector<128x4xbf16>
    %c0_15 = arith.constant 0 : index
    %c1 = arith.constant 1 : index
    %c0_16 = arith.constant 0 : index
    %c0_17 = arith.constant 0 : index
    %27 = vector.load %arg3[%c0_15, %c1, %c0_16, %c0_17] : memref<3x3x4x4xbf16, #tpu.memory_space<vmem>>, vector<1x1x4x4xbf16>
    %28 = vector.shape_cast %27 : vector<1x1x4x4xbf16> to vector<4x4xbf16>
    %cst_18 = arith.constant dense<0.000000e+00> : vector<128x4xf32>
    %29 = tpu.matmul %26, %28, %cst_18 {dimension_numbers = #tpu.dot_dimension_numbers<[1], [0], [0], [1], [0, 0, 1, 1], [], []>} : vector<128x4xbf16>, vector<4x4xbf16>, vector<128x4xf32> -> vector<128x4xf32>
    %30 = arith.addf %25, %29 : vector<128x4xf32>
    %31 = vector.extract_strided_slice %21 {offsets = [7, 0], sizes = [128, 4], strides = [1, 1]} : vector<176x4xbf16> to vector<128x4xbf16>
    %c0_19 = arith.constant 0 : index
    %c2 = arith.constant 2 : index
    %c0_20 = arith.constant 0 : index
    %c0_21 = arith.constant 0 : index
    %32 = vector.load %arg3[%c0_19, %c2, %c0_20, %c0_21] : memref<3x3x4x4xbf16, #tpu.memory_space<vmem>>, vector<1x1x4x4xbf16>
    %33 = vector.shape_cast %32 : vector<1x1x4x4xbf16> to vector<4x4xbf16>
    %cst_22 = arith.constant dense<0.000000e+00> : vector<128x4xf32>
    %34 = tpu.matmul %31, %33, %cst_22 {dimension_numbers = #tpu.dot_dimension_numbers<[1], [0], [0], [1], [0, 0, 1, 1], [], []>} : vector<128x4xbf16>, vector<4x4xbf16>, vector<128x4xf32> -> vector<128x4xf32>
    %35 = arith.addf %30, %34 : vector<128x4xf32>
    %36 = vector.extract_strided_slice %21 {offsets = [23, 0], sizes = [128, 4], strides = [1, 1]} : vector<176x4xbf16> to vector<128x4xbf16>
    %c1_23 = arith.constant 1 : index
    %c0_24 = arith.constant 0 : index
    %c0_25 = arith.constant 0 : index
    %c0_26 = arith.constant 0 : index
    %37 = vector.load %arg3[%c1_23, %c0_24, %c0_25, %c0_26] : memref<3x3x4x4xbf16, #tpu.memory_space<vmem>>, vector<1x1x4x4xbf16>
    %38 = vector.shape_cast %37 : vector<1x1x4x4xbf16> to vector<4x4xbf16>
    %cst_27 = arith.constant dense<0.000000e+00> : vector<128x4xf32>
    %39 = tpu.matmul %36, %38, %cst_27 {dimension_numbers = #tpu.dot_dimension_numbers<[1], [0], [0], [1], [0, 0, 1, 1], [], []>} : vector<128x4xbf16>, vector<4x4xbf16>, vector<128x4xf32> -> vector<128x4xf32>
    %40 = arith.addf %35, %39 : vector<128x4xf32>
    %41 = vector.extract_strided_slice %21 {offsets = [24, 0], sizes = [128, 4], strides = [1, 1]} : vector<176x4xbf16> to vector<128x4xbf16>
    %c1_28 = arith.constant 1 : index
    %c1_29 = arith.constant 1 : index
    %c0_30 = arith.constant 0 : index
    %c0_31 = arith.constant 0 : index
    %42 = vector.load %arg3[%c1_28, %c1_29, %c0_30, %c0_31] : memref<3x3x4x4xbf16, #tpu.memory_space<vmem>>, vector<1x1x4x4xbf16>
    %43 = vector.shape_cast %42 : vector<1x1x4x4xbf16> to vector<4x4xbf16>
    %cst_32 = arith.constant dense<0.000000e+00> : vector<128x4xf32>
    %44 = tpu.matmul %41, %43, %cst_32 {dimension_numbers = #tpu.dot_dimension_numbers<[1], [0], [0], [1], [0, 0, 1, 1], [], []>} : vector<128x4xbf16>, vector<4x4xbf16>, vector<128x4xf32> -> vector<128x4xf32>
    %45 = arith.addf %40, %44 : vector<128x4xf32>
    %46 = vector.extract_strided_slice %21 {offsets = [25, 0], sizes = [128, 4], strides = [1, 1]} : vector<176x4xbf16> to vector<128x4xbf16>
    %c1_33 = arith.constant 1 : index
    %c2_34 = arith.constant 2 : index
    %c0_35 = arith.constant 0 : index
    %c0_36 = arith.constant 0 : index
    %47 = vector.load %arg3[%c1_33, %c2_34, %c0_35, %c0_36] : memref<3x3x4x4xbf16, #tpu.memory_space<vmem>>, vector<1x1x4x4xbf16>
    %48 = vector.shape_cast %47 : vector<1x1x4x4xbf16> to vector<4x4xbf16>
    %cst_37 = arith.constant dense<0.000000e+00> : vector<128x4xf32>
    %49 = tpu.matmul %46, %48, %cst_37 {dimension_numbers = #tpu.dot_dimension_numbers<[1], [0], [0], [1], [0, 0, 1, 1], [], []>} : vector<128x4xbf16>, vector<4x4xbf16>, vector<128x4xf32> -> vector<128x4xf32>
    %50 = arith.addf %45, %49 : vector<128x4xf32>
    %51 = vector.extract_strided_slice %21 {offsets = [41, 0], sizes = [128, 4], strides = [1, 1]} : vector<176x4xbf16> to vector<128x4xbf16>
    %c2_38 = arith.constant 2 : index
    %c0_39 = arith.constant 0 : index
    %c0_40 = arith.constant 0 : index
    %c0_41 = arith.constant 0 : index
    %52 = vector.load %arg3[%c2_38, %c0_39, %c0_40, %c0_41] : memref<3x3x4x4xbf16, #tpu.memory_space<vmem>>, vector<1x1x4x4xbf16>
    %53 = vector.shape_cast %52 : vector<1x1x4x4xbf16> to vector<4x4xbf16>
    %cst_42 = arith.constant dense<0.000000e+00> : vector<128x4xf32>
    %54 = tpu.matmul %51, %53, %cst_42 {dimension_numbers = #tpu.dot_dimension_numbers<[1], [0], [0], [1], [0, 0, 1, 1], [], []>} : vector<128x4xbf16>, vector<4x4xbf16>, vector<128x4xf32> -> vector<128x4xf32>
    %55 = arith.addf %50, %54 : vector<128x4xf32>
    %56 = vector.extract_strided_slice %21 {offsets = [42, 0], sizes = [128, 4], strides = [1, 1]} : vector<176x4xbf16> to vector<128x4xbf16>
    %c2_43 = arith.constant 2 : index
    %c1_44 = arith.constant 1 : index
    %c0_45 = arith.constant 0 : index
    %c0_46 = arith.constant 0 : index
    %57 = vector.load %arg3[%c2_43, %c1_44, %c0_45, %c0_46] : memref<3x3x4x4xbf16, #tpu.memory_space<vmem>>, vector<1x1x4x4xbf16>
    %58 = vector.shape_cast %57 : vector<1x1x4x4xbf16> to vector<4x4xbf16>
    %cst_47 = arith.constant dense<0.000000e+00> : vector<128x4xf32>
    %59 = tpu.matmul %56, %58, %cst_47 {dimension_numbers = #tpu.dot_dimension_numbers<[1], [0], [0], [1], [0, 0, 1, 1], [], []>} : vector<128x4xbf16>, vector<4x4xbf16>, vector<128x4xf32> -> vector<128x4xf32>
    %60 = arith.addf %55, %59 : vector<128x4xf32>
    %61 = vector.extract_strided_slice %21 {offsets = [43, 0], sizes = [128, 4], strides = [1, 1]} : vector<176x4xbf16> to vector<128x4xbf16>
    %c2_48 = arith.constant 2 : index
    %c2_49 = arith.constant 2 : index
    %c0_50 = arith.constant 0 : index
    %c0_51 = arith.constant 0 : index
    %62 = vector.load %arg3[%c2_48, %c2_49, %c0_50, %c0_51] : memref<3x3x4x4xbf16, #tpu.memory_space<vmem>>, vector<1x1x4x4xbf16>
    %63 = vector.shape_cast %62 : vector<1x1x4x4xbf16> to vector<4x4xbf16>
    %cst_52 = arith.constant dense<0.000000e+00> : vector<128x4xf32>
    %64 = tpu.matmul %61, %63, %cst_52 {dimension_numbers = #tpu.dot_dimension_numbers<[1], [0], [0], [1], [0, 0, 1, 1], [], []>} : vector<128x4xbf16>, vector<4x4xbf16>, vector<128x4xf32> -> vector<128x4xf32>
    %65 = arith.addf %60, %64 : vector<128x4xf32>
    %c0_53 = arith.constant 0 : index
    %c0_54 = arith.constant 0 : index
    %66 = vector.load %arg4[%c0_53, %c0_54] : memref<1x4xf32, #tpu.memory_space<vmem>>, vector<1x4xf32>
    %67 = vector.broadcast %66 : vector<1x4xf32> to vector<128x4xf32>
    %68 = arith.addf %65, %67 : vector<128x4xf32>
    %69 = vector.extract_strided_slice %14 {offsets = [24, 0], sizes = [128, 1], strides = [1, 1]} : vector<176x1xf32> to vector<128x1xf32>
    %cst_55 = arith.constant 0.000000e+00 : f32
    %70 = vector.broadcast %cst_55 : f32 to vector<128x1xf32>
    %71 = arith.cmpf ogt, %69, %70 : vector<128x1xf32>
    %cst_56 = arith.constant 0.000000e+00 : f32
    %72 = vector.shape_cast %71 : vector<128x1xi1> to vector<128x1xi1>
    %73 = vector.broadcast %72 : vector<128x1xi1> to vector<128x4xi1>
    %74 = vector.broadcast %cst_56 : f32 to vector<128x4xf32>
    %75 = arith.select %73, %68, %74 : vector<128x4xi1>, vector<128x4xf32>
    %cst_57 = arith.constant dense<0.000000e+00> : vector<4xf32>
    %76 = vector.multi_reduction <add>, %75, %cst_57 [0] : vector<128x4xf32> to vector<4xf32>
    %77 = vector.shape_cast %76 : vector<4xf32> to vector<1x4xf32>
    %78 = vector.shape_cast %77 : vector<1x4xf32> to vector<1x4xf32>
    %79 = vector.broadcast %78 : vector<1x4xf32> to vector<8x4xf32>
    %c0_58 = arith.constant 0 : index
    %c0_59 = arith.constant 0 : index
    %80 = vector.load %arg6[%c0_58, %c0_59] : memref<8x4xf32, #tpu.memory_space<vmem>>, vector<8x4xf32>
    tpu.vector_store %arg6[%c0_58, %c0_59], %79 {strides = array<i32>} : memref<8x4xf32, #tpu.memory_space<vmem>>, vector<8x4xf32>,
    %81 = arith.mulf %75, %75 : vector<128x4xf32>
    %cst_60 = arith.constant dense<0.000000e+00> : vector<4xf32>
    %82 = vector.multi_reduction <add>, %81, %cst_60 [0] : vector<128x4xf32> to vector<4xf32>
    %83 = vector.shape_cast %82 : vector<4xf32> to vector<1x4xf32>
    %84 = vector.shape_cast %83 : vector<1x4xf32> to vector<1x4xf32>
    %85 = vector.broadcast %84 : vector<1x4xf32> to vector<8x4xf32>
    %c0_61 = arith.constant 0 : index
    %c0_62 = arith.constant 0 : index
    %86 = vector.load %arg7[%c0_61, %c0_62] : memref<8x4xf32, #tpu.memory_space<vmem>>, vector<8x4xf32>
    tpu.vector_store %arg7[%c0_61, %c0_62], %85 {strides = array<i32>} : memref<8x4xf32, #tpu.memory_space<vmem>>, vector<8x4xf32>,
    %87 = arith.truncf %68 : vector<128x4xf32> to vector<128x4xbf16>
    %c0_63 = arith.constant 0 : index
    %c0_64 = arith.constant 0 : index
    %88 = vector.load %arg5[%c0_63, %c0_64] : memref<128x4xbf16, #tpu.memory_space<vmem>>, vector<128x4xbf16>
    tpu.vector_store %arg5[%c0_63, %c0_64], %87 {strides = array<i32>} : memref<128x4xbf16, #tpu.memory_space<vmem>>, vector<128x4xbf16>,
    return
  }
  func.func @transform_2(%arg0: i32) -> (i32, i32, i32, i32) {
    %c0_i32 = arith.constant 0 : i32
    %c0_i32_0 = arith.constant 0 : i32
    %c0_i32_1 = arith.constant 0 : i32
    %c0_i32_2 = arith.constant 0 : i32
    %c0_i32_3 = arith.constant 0 : i32
    return %c0_i32, %c0_i32_0, %c0_i32_1, %c0_i32_2 : i32, i32, i32, i32
  }
  func.func @transform_3(%arg0: i32) -> (i32, i32) {
    %c0_i32 = arith.constant 0 : i32
    %c0_i32_0 = arith.constant 0 : i32
    %c0_i32_1 = arith.constant 0 : i32
    return %c0_i32, %c0_i32_0 : i32, i32
  }
  func.func @transform_4(%arg0: i32) -> (i32, i32) {
    %c1_i32 = arith.constant 1 : i32
    %0 = arith.addi %arg0, %c1_i32 : i32
    %c0_i32 = arith.constant 0 : i32
    %c0_i32_0 = arith.constant 0 : i32
    return %0, %c0_i32 : i32, i32
  }
  func.func @transform_5(%arg0: i32) -> (i32, i32) {
    %c0_i32 = arith.constant 0 : i32
    %c0_i32_0 = arith.constant 0 : i32
    return %arg0, %c0_i32 : i32, i32
  }
  func.func @transform_6(%arg0: i32) -> (i32, i32) {
    %c0_i32 = arith.constant 0 : i32
    %c0_i32_0 = arith.constant 0 : i32
    return %arg0, %c0_i32 : i32, i32
  }
}

module attributes {stable_mosaic.version = 11 : i64} {
  func.func @_affine_relu_kernel(%arg0: i32, %arg1: memref<16x128xbf16, #tpu.memory_space<vmem>>, %arg2: memref<1x128xf32, #tpu.memory_space<vmem>>, %arg3: memref<1x128xf32, #tpu.memory_space<vmem>>, %arg4: memref<16x128xf32, #tpu.memory_space<vmem>>) attributes {dimension_semantics = [#tpu.dimension_semantics<parallel>], iteration_bounds = array<i64: 2>, scalar_prefetch = 0 : i64, scratch_operands = 0 : i64, tpu.core_type = #tpu.core_type<tc>, window_params = [{transform_indices = @transform_0, window_bounds = array<i64: 16, 128>}, {pipeline_mode = #tpu.pipeline_mode<synchronous>, transform_indices = @transform_1, window_bounds = array<i64: 1, 128>}, {pipeline_mode = #tpu.pipeline_mode<synchronous>, transform_indices = @transform_2, window_bounds = array<i64: 1, 128>}, {transform_indices = @transform_3, window_bounds = array<i64: 16, 128>}]} {
    %c0 = arith.constant 0 : index
    %c0_0 = arith.constant 0 : index
    %0 = vector.load %arg1[%c0, %c0_0] : memref<16x128xbf16, #tpu.memory_space<vmem>>, vector<16x128xbf16>
    %1 = arith.extf %0 : vector<16x128xbf16> to vector<16x128xf32>
    %c0_1 = arith.constant 0 : index
    %c0_2 = arith.constant 0 : index
    %2 = vector.load %arg2[%c0_1, %c0_2] : memref<1x128xf32, #tpu.memory_space<vmem>>, vector<1x128xf32>
    %3 = vector.broadcast %2 : vector<1x128xf32> to vector<16x128xf32>
    %4 = arith.mulf %1, %3 : vector<16x128xf32>
    %c0_3 = arith.constant 0 : index
    %c0_4 = arith.constant 0 : index
    %5 = vector.load %arg3[%c0_3, %c0_4] : memref<1x128xf32, #tpu.memory_space<vmem>>, vector<1x128xf32>
    %6 = vector.broadcast %5 : vector<1x128xf32> to vector<16x128xf32>
    %7 = arith.addf %4, %6 : vector<16x128xf32>
    %cst = arith.constant 0.000000e+00 : f32
    %8 = vector.broadcast %cst : f32 to vector<16x128xf32>
    %9 = arith.maximumf %7, %8 : vector<16x128xf32>
    %c0_5 = arith.constant 0 : index
    %c0_6 = arith.constant 0 : index
    %10 = vector.load %arg4[%c0_5, %c0_6] : memref<16x128xf32, #tpu.memory_space<vmem>>, vector<16x128xf32>
    tpu.vector_store %arg4[%c0_5, %c0_6], %9 {strides = array<i32>} : memref<16x128xf32, #tpu.memory_space<vmem>>, vector<16x128xf32>,
    return
  }
  func.func @transform_0(%arg0: i32) -> (i32, i32) {
    %c0_i32 = arith.constant 0 : i32
    %c0_i32_0 = arith.constant 0 : i32
    return %arg0, %c0_i32 : i32, i32
  }
  func.func @transform_1(%arg0: i32) -> (i32, i32) {
    %c0_i32 = arith.constant 0 : i32
    %c0_i32_0 = arith.constant 0 : i32
    %c0_i32_1 = arith.constant 0 : i32
    return %c0_i32, %c0_i32_0 : i32, i32
  }
  func.func @transform_2(%arg0: i32) -> (i32, i32) {
    %c0_i32 = arith.constant 0 : i32
    %c0_i32_0 = arith.constant 0 : i32
    %c0_i32_1 = arith.constant 0 : i32
    return %c0_i32, %c0_i32_0 : i32, i32
  }
  func.func @transform_3(%arg0: i32) -> (i32, i32) {
    %c0_i32 = arith.constant 0 : i32
    %c0_i32_0 = arith.constant 0 : i32
    return %arg0, %c0_i32 : i32, i32
  }
}

</mosaic_0001>

<bundles_post_ra>
// kernel: up_block_forward.5
= control target key start
LH: loop header
LB: loop body
LE: loop exit
PB: predicated region body
PF: predicated region fallthrough
CT: control target
= control target key end

     0   :  { %s394_s12 = smov 0   ;;  %s425_s0 = inlined_call_operand.vmem [shape: bf16[128,8], index: 0, kind: input, shape index: {}]   ;;  %s426_s1 = inlined_call_operand.vmem [shape: bf16[8,4], index: 1, kind: input, shape index: {}]   ;;  %s427_s2 = inlined_call_operand.vmem [shape: f32[1,4], index: 2, kind: input, shape index: {}]   ;;  %s428_s3 = inlined_call_operand.vmem [shape: f32[128,4], index: 3, kind: output, shape index: {}]  }
   0x1 LB: > { %s319_s13 = sadd.s32 4294967295, %s372_s12   ;;  %p323_p0 = scmp.ge.s32.totalorder %s372_s12, 1  ;;  %s372_s12 = sphi %s394_s12, %s13_s12  }
   0x2   : > { %p138_p1 = scmp.lt.s32.totalorder %s372_s12, 3 }
   0x4   : > { %p139_p2 = pnand %p323_p0, %p138_p1 }
   0x5   : > { %s324_s16 = sshll.u32 (!%p139_p2), %s319_s13, 3 }
   0x6   : > { %142 = sbr.rel (%p139_p2) target bundleno = 161 (0xa1), region = 32  ;;  %p163_p3 = scmp.lt.s32.totalorder (!%p139_p2), %s324_s16, 15 }
   0xb   : > { %v183_v0 = vld [vmem:[%s426_s1] sm:$0xf]  ;;  %vm221_vm0 = vcmask 1043456   ;;  %s430_s16 = smov (!%p163_p3, %s324_s16), 15  ;;  %vm208_vm1 = vcmask 64512   ;;  %vm254_vm2 = vcmask 31744  }
   0xc   : > { %v223_v1 = vsel %vm221_vm0, %v183_v0, 0  ;;  %s325_s17 = sshll.u32 %s430_s16, 2  ;;  %s327_s21 = sshll.u32 %s430_s16, 3  ;;  %v365_v6 = vld [vmem:[%s427_s2] ss:$0 sm:$0xff] }
   0xd   : > { %232 = vmatpush.bf16.msra.mxu0 %v223_v1  ;;  %354 = vmatpush.bf16.msra.mxu1 %v223_v1  ;;  %s166_s20 = scalar_lea.vmem %s425_s0, %s325_s17  ;;  %s172_s26 = scalar_lea.vmem %s428_s3, %s327_s21 }
   0xe   : > { %355 = vmatpush.bf16.msra.mxu2 %v223_v1  ;;  %356 = vmatpush.bf16.msra.mxu3 %v223_v1  ;;  %v350_v2 = vld [vmem:[%s166_s20] sm:$0xff]  ;;  %v351_v3 = vld [vmem:[%s166_s20 + $0x8] sm:$0xff]  ;;  %v352_v4 = vld [vmem:[%s166_s20 + $0x10] sm:$0xff] }
   0xf   : > { %v353_v5 = vld [vmem:[%s166_s20 + $0x18] sm:$0xff] }
  0x10   : > { %344 = vmatmul.msk.bf16.vlgmr.msra.gmra.mxu0 %vm208_vm1, %v350_v2  ;;  %345 = vmatmul.msk.bf16.vlgmr.msra.gmra.mxu1 %vm208_vm1, %v351_v3 }
  0x11   : > { %346 = vmatmul.msk.bf16.vlgmr.msra.gmra.mxu2 %vm208_vm1, %v352_v4  ;;  %347 = vmatmul.msk.bf16.vlgmr.msra.gmra.mxu3 %vm208_vm1, %v353_v5 }
  0x8d   : > { %v234_v7 = vpop.f32.mrf.mxu0  ;;  %v239_v8 = vpop.f32.mrf.mxu1 }
  0x8e   : > { %v235_v9 = vadd.f32 %v365_v6, %v234_v7  ;;  %v240_v10 = vadd.f32 %v365_v6, %v239_v8 }
  0x90   : > { %255 = vst.msk [vmem:[%s172_s26] sm:$0xff] %vm254_vm2, %v235_v9 }
  0x91   : > { %257 = vst.msk [vmem:[%s172_s26 + $0x10] sm:$0xff] %vm254_vm2, %v240_v10 }
  0x94   : > { %v244_v11 = vpop.f32.mrf.mxu2  ;;  %v249_v12 = vpop.f32.mrf.mxu3 }
  0x95   : > { %v245_v13 = vadd.f32 %v365_v6, %v244_v11  ;;  %v250_v14 = vadd.f32 %v365_v6, %v249_v12  ;;  %v236_v15 = vpop.f32.mrf.mxu0  ;;  %v241_v16 = vpop.f32.mrf.mxu1 }
  0x96   : > { %v237_v17 = vadd.f32 %v365_v6, %v236_v15  ;;  %v242_v18 = vadd.f32 %v365_v6, %v241_v16 }
  0x97   : > { %259 = vst.msk [vmem:[%s172_s26 + $0x20] sm:$0xff] %vm254_vm2, %v245_v13 }
  0x98   : > { %261 = vst.msk [vmem:[%s172_s26 + $0x30] sm:$0xff] %vm254_vm2, %v250_v14 }
  0x99   : > { %256 = vst.msk [vmem:[%s172_s26 + $0x8] sm:$0xff] %vm254_vm2, %v237_v17 }
  0x9a   : > { %258 = vst.msk [vmem:[%s172_s26 + $0x18] sm:$0xff] %vm254_vm2, %v242_v18 }
  0x9c   : > { %v246_v19 = vpop.f32.mrf.mxu2  ;;  %v251_v20 = vpop.f32.mrf.mxu3 }
  0x9d   : > { %v247_v21 = vadd.f32 %v365_v6, %v246_v19  ;;  %v252_v22 = vadd.f32 %v365_v6, %v251_v20 }
  0x9f   : > { %260 = vst.msk [vmem:[%s172_s26 + $0x28] sm:$0xff] %vm254_vm2, %v247_v21 }
  0xa0   : > { %262 = vst.msk [vmem:[%s172_s26 + $0x38] sm:$0xff] %vm254_vm2, %v252_v22 }
  0xa1 PF: > { %s13_s12 = sadd.s32 1, %s372_s12  }
  0xa2   : > { %p10_p4 = scmp.ge.s32.totalorder %s13_s12, 4  }
  0xa4   :  { %12 = sbr.rel (!%p10_p4) target bundleno = 1 (0x1), region = 62 }

// kernel: up_block_forward.7
= control target key start
LH: loop header
LB: loop body
LE: loop exit
PB: predicated region body
PF: predicated region fallthrough
CT: control target
= control target key end

     0   :  { %s310_s12 = smov 0   ;;  %s327_s0 = inlined_call_operand.vmem [shape: bf16[32,128], index: 0, kind: input, shape index: {}]   ;;  %s328_s1 = inlined_call_operand.vmem [shape: f32[1,128], index: 1, kind: input, shape index: {}]   ;;  %s329_s2 = inlined_call_operand.vmem [shape: f32[1,128], index: 2, kind: input, shape index: {}]   ;;  %s330_s3 = inlined_call_operand.vmem [shape: bf16[32,128], index: 3, kind: output, shape index: {}]  }
   0x1 LB: > { %s252_s13 = sadd.s32 4294967295, %s288_s12   ;;  %p256_p0 = scmp.ge.s32.totalorder %s288_s12, 1  ;;  %s288_s12 = sphi %s310_s12, %s13_s12  }
   0x2   : > { %p138_p1 = scmp.lt.s32.totalorder %s288_s12, 3 }
   0x4   : > { %p139_p2 = pnand %p256_p0, %p138_p1 }
   0x5   : > { %s257_s14 = sshll.u32 (!%p139_p2), %s252_s13, 1 }
   0x6   : > { %142 = sbr.rel (%p139_p2) target bundleno = 26 (0x1a), region = 32  ;;  %p163_p3 = scmp.lt.s32.totalorder (!%p139_p2), %s257_s14, 3 }
   0xb   : > { %s332_s14 = smov (!%p163_p3, %s257_s14), 3  ;;  %v280_v0 = vld [vmem:[%s328_s1] ss:$0 sm:$0xff] }
   0xc   : > { %s258_s15 = sshll.u32 %s332_s14, 2  ;;  %v281_v4 = vld [vmem:[%s329_s2] ss:$0 sm:$0xff] }
   0xd   : > { %s166_s18 = scalar_lea.vmem %s327_s0, %s258_s15  ;;  %s172_s25 = scalar_lea.vmem %s330_s3, %s258_s15 }
   0xe   : > { %v264_v1 = vld [vmem:[%s166_s18] sm:$0xff]  }
   0xf   : > { %v265_v2 = vunpack.c.l.bf16 %v264_v1  ;;  %v266_v3 = vunpack.c.h.bf16 %v264_v1 }
  0x11   : > { %v182_v5 = vmul.f32 %v280_v0, %v265_v2  ;;  %v183_v6 = vmul.f32 %v280_v0, %v266_v3 }
  0x13   : > { %v188_v7 = vadd.f32 %v281_v4, %v182_v5  ;;  %v189_v8 = vadd.f32 %v281_v4, %v183_v6 }
  0x15   : > { %v190_v9 = vmax.f32 %v188_v7, 0.0  ;;  %v191_v10 = vmax.f32 %v189_v8, 0.0 }
  0x17   : > { %v270_v11 = vpack.c.bf16 %v191_v10, %v190_v9 }
  0x19   : > { %271 = vst [vmem:[%s172_s25] sm:$0xff] %v270_v11  }
  0x1a PF: > { %s13_s12 = sadd.s32 1, %s288_s12  }
  0x1b   : > { %p10_p4 = scmp.ge.s32.totalorder %s13_s12, 4  }
  0x1d   :  { %12 = sbr.rel (!%p10_p4) target bundleno = 1 (0x1), region = 62 }

// kernel: up_block_forward.6
= control target key start
LH: loop header
LB: loop body
LE: loop exit
PB: predicated region body
PF: predicated region fallthrough
CT: control target
= control target key end

     0   :  { %s2149_s21 = smov 0   ;;  %s2985_s0 = inlined_call_operand.vmem [shape: bf16[1024,8], index: 0, kind: input, shape index: {}]   ;;  %s2986_s1 = inlined_call_operand.vmem [shape: f32[1024,1], index: 1, kind: input, shape index: {}]   ;;  %s2987_s2 = inlined_call_operand.vmem [shape: bf16[3,3,8,4], index: 2, kind: input, shape index: {}]   ;;  %s2988_s3 = inlined_call_operand.vmem [shape: f32[1,4], index: 3, kind: input, shape index: {}]   ;;  %s2989_s4 = inlined_call_operand.vmem [shape: bf16[1024,4], index: 4, kind: output, shape index: {0}]   ;;  %s2990_s5 = inlined_call_operand.vmem [shape: f32[48,4], index: 5, kind: output, shape index: {1}]   ;;  %s2991_s6 = inlined_call_operand.vmem [shape: f32[48,4], index: 6, kind: output, shape index: {2}]  }
   0x1 LB: > { %s2155_s22 = sadd.s32 4294967295, %s2111_s21   ;;  %p1969_p0 = scmp.ge.s32.totalorder %s2111_s21, 1  ;;  %s2111_s21 = sphi %s2149_s21, %s17_s21  }
   0x2   : > { %p161_p1 = scmp.lt.s32.totalorder %s2111_s21, 7 }
   0x4   : > { %p162_p2 = pnand %p1969_p0, %p161_p1 }
   0x6   : > { %165 = sbr.rel (%p162_p2) target bundleno = 643 (0x283), region = 28 }
   0xb   : > { %s2083_s23 = sshll.u32 %s2155_s22, 4  ;;  %p199_p3 = scmp.lt.s32.totalorder %s2155_s22, 5 }
   0xc   : > { %s2084_s24 = sadd.s32 16, %s2083_s23  ;;  %s1974_s25 = sshll.u32 %s2155_s22, 7 }
   0xd   : > { %p193_p4 = scmp.lt.s32.totalorder %s2084_s24, 127  ;;  %s209_s26 = sadd.s32 104, %s1974_s25 }
   0xe   : > { %s200_s27 = scalar_select %p199_p3, %s2155_s22, 5 }
   0xf   : > { %s3040_s24 = smov (!%p193_p4, %s2084_s24), 127  ;;  %s210_s29 = sshra.s32 %s209_s26, 3 }
  0x10   : > { %s1972_s28 = sshll.u32 %s200_s27, 3  ;;  %s1971_s30 = sshll.u32 %s3040_s24, 2 }
  0x11   : > { %s2168_s9 = scalar_lea.vmem %s2990_s5, %s1972_s28  ;;  %s2173_s12 = scalar_lea.vmem %s2989_s4, %s1971_s30 }
  0x12   : > { %s2178_s15 = scalar_lea.vmem %s2991_s6, %s1972_s28  ;;  %s1975_s16 = sshll.u32 %s210_s29, 2 }
  0x13   : > { %s213_s19 = scalar_lea.vmem %s2985_s0, %s1975_s16 }
  0x14   : > { %v224_v0 = vld [vmem:[%s213_s19] sm:$0xff]  ;;  %v226_v1 = vld [vmem:[%s213_s19 + $0x8] sm:$0xff]  ;;  %v228_v2 = vld [vmem:[%s213_s19 + $0x10] sm:$0xff] }
  0x15   : > { %225 = vst [vmem:[#allocation2] sm:$0xff] %v224_v0  ;;  %v230_v3 = vld [vmem:[%s213_s19 + $0x18] sm:$0xff]  ;;  %v232_v4 = vld [vmem:[%s213_s19 + $0x20] sm:$0xff]  ;;  %v234_v5 = vld [vmem:[%s213_s19 + $0x28] sm:$0xff] }
  0x16   : > { %227 = vst [vmem:[#allocation2 + $0x8] sm:$0xff] %v226_v1  ;;  %v236_v6 = vld [vmem:[%s213_s19 + $0x30] sm:$0xff]  ;;  %v238_v7 = vld [vmem:[%s213_s19 + $0x38] sm:$0xff]  ;;  %v240_v8 = vld [vmem:[%s213_s19 + $0x40] sm:$0xff] }
  0x17   : > { %229 = vst [vmem:[#allocation2 + $0x10] sm:$0xff] %v228_v2  ;;  %v242_v9 = vld [vmem:[%s213_s19 + $0x48] sm:$0xff]  ;;  %v244_v10 = vld [vmem:[%s213_s19 + $0x50] sm:$0xff] }
  0x18   : > { %231 = vst [vmem:[#allocation2 + $0x18] sm:$0xff] %v230_v3 }
  0x19   : > { %233 = vst [vmem:[#allocation2 + $0x20] sm:$0xff] %v232_v4 }
  0x1a   : > { %235 = vst [vmem:[#allocation2 + $0x28] sm:$0xff] %v234_v5 }
  0x1b   : > { %237 = vst [vmem:[#allocation2 + $0x30] sm:$0xff] %v236_v6 }
  0x1c   : > { %239 = vst [vmem:[#allocation2 + $0x38] sm:$0xff] %v238_v7 }
  0x1d   : > { %241 = vst [vmem:[#allocation2 + $0x40] sm:$0xff] %v240_v8 }
  0x1e   : > { %243 = vst [vmem:[#allocation2 + $0x48] sm:$0xff] %v242_v9 }
  0x1f   : > { %245 = vst [vmem:[#allocation2 + $0x50] sm:$0xff] %v244_v10 }
  0x20   : > { %251 = vsyncadd [#allocation4], 1408  ;;  %s1912_s24 = scalar_lea.vmem %s2986_s1, %s1974_s25 }
  0x21   : > { %v2188_v11 = vld [vmem:[%s1912_s24 + $0x68] sm:$0xff]  ;;  %v2190_v12 = vld [vmem:[%s1912_s24 + $0x70] sm:$0xff]  ;;  %v2192_v13 = vld [vmem:[%s1912_s24 + $0x78] sm:$0xff] }
  0x22   : > { %v2194_v14 = vld [vmem:[%s1912_s24 + $0x80] sm:$0xff]  ;;  %v1981_v15 = vld [vmem:[%s1912_s24 + $0x88] sm:$0xff]  ;;  %v1982_v16 = vld [vmem:[%s1912_s24 + $0x90] sm:$0xff] }
  0x23   : > { %v1983_v17 = vld [vmem:[%s1912_s24 + $0x98] sm:$0xff]  ;;  %v1984_v18 = vld [vmem:[%s1912_s24 + $0xa0] sm:$0xff]  ;;  %v1985_v19 = vld [vmem:[%s1912_s24 + $0xa8] sm:$0xff] }
  0x24   : > { %v1986_v20 = vld [vmem:[%s1912_s24 + $0xb0] sm:$0xff]  ;;  %v1987_v21 = vld [vmem:[%s1912_s24 + $0xb8] sm:$0xff]  ;;  %v1988_v22 = vld [vmem:[%s1912_s24 + $0xc0] sm:$0xff] }
  0x25   : > { %v1989_v23 = vld [vmem:[%s1912_s24 + $0xc8] sm:$0xff]  ;;  %v1990_v24 = vld [vmem:[%s1912_s24 + $0xd0] sm:$0xff]  ;;  %v1991_v25 = vld [vmem:[%s1912_s24 + $0xd8] sm:$0xff] }
  0x26   : > { %v1992_v26 = vld [vmem:[%s1912_s24 + $0xe0] sm:$0xff]  ;;  %v2196_v27 = vld [vmem:[%s1912_s24 + $0xe8] sm:$0xff]  ;;  %v2198_v28 = vld [vmem:[%s1912_s24 + $0xf0] sm:$0xff] }
  0x27   : > { %v2200_v29 = vld [vmem:[%s1912_s24 + $0xf8] sm:$0xff]  ;;  %v2202_v30 = vld [vmem:[%s1912_s24 + $0x100] sm:$0xff]  ;;  %v2204_v31 = vld [vmem:[%s1912_s24 + $0x108] sm:$0xff] }
  0x28   : > { %v2206_v32 = vld [vmem:[%s1912_s24 + $0x110] sm:$0xff] }
  0x29   : > { %313 = vsyncadd [#allocation4 + $0x1], 2816 }
  0x2a   : > { %2105 = dma.done.wait [#allocation4], 1408 }
  0x2b   : > { %2106 = vsyncadd [#allocation4], 4294965888  ;;  %vm377_vm0 = vcmp.gt.f32.partialorder %v1989_v23, 0.0  ;;  %vm375_vm1 = vcmp.gt.f32.partialorder %v1987_v21, 0.0  ;;  %vm373_vm2 = vcmp.gt.f32.partialorder %v1985_v19, 0.0 }
  0x2c   : > { %2107 = dma.done.wait [#allocation4 + $0x1], 2816 }
  0x2d   : > { %2108 = vsyncadd [#allocation4 + $0x1], 4294964480  ;;  %v2113_v33 = vmov 0   ;;  %vm378_vm3 = vcmp.gt.f32.partialorder %v1990_v24, 0.0  ;;  %vm376_vm4 = vcmp.gt.f32.partialorder %v1988_v22, 0.0  ;;  %vm374_vm5 = vcmp.gt.f32.partialorder %v1986_v20, 0.0 }
  0x2e   : > { %2099 = vset.pattern.permute.xlu2 %v2113_v33  ;;  %2098 = vset.pattern.permute.xlu1 %v2113_v33  ;;  %v399_v34 = vsel %vm377_vm0, 1, %v2113_v33  ;;  %v397_v35 = vsel %vm375_vm1, 1, %v2113_v33  ;;  %v395_v36 = vsel %vm373_vm2, 1, %v2113_v33  ;;  %v400_v37 = vsel %vm378_vm3, 1, %v2113_v33  ;;  %v1999_v58 = vld [vmem:[%s2987_s2 + $0x4] sm:$0xf] }
  0x2f   : > { %2097 = vset.pattern.permute.xlu0 %v2113_v33  ;;  %446 = vperm.xlu2 %2099, %v399_v34   ;;  %v398_v38 = vsel %vm376_vm4, 1, %v2113_v33  ;;  %v396_v39 = vsel %vm374_vm5, 1, %v2113_v33  ;;  %vm369_vm6 = vcmp.gt.f32.partialorder %v1981_v15, 0.0  ;;  %vm380_vm7 = vcmp.gt.f32.partialorder %v1992_v26, 0.0  ;;  %v355_v63 = vld [vmem:[#allocation2 + $0x30] sm:$0xf] }
  0x30   : > { %440 = vperm.xlu1 %2098, %v397_v35   ;;  %434 = vperm.xlu0 %2097, %v395_v36   ;;  %vm379_vm8 = vcmp.gt.f32.partialorder %v1991_v25, 0.0  ;;  %v391_v40 = vsel %vm369_vm6, 1, %v2113_v33  ;;  %v402_v41 = vsel %vm380_vm7, 1, %v2113_v33  ;;  %vm372_vm9 = vcmp.gt.f32.partialorder %v1984_v18, 0.0  ;;  %v356_v0 = vld [vmem:[#allocation2 + $0x34] sm:$0xf] }
  0x31   : > { %v401_v42 = vsel %vm379_vm8, 1, %v2113_v33  ;;  %vm371_vm10 = vcmp.gt.f32.partialorder %v1983_v17, 0.0  ;;  %vm370_vm11 = vcmp.gt.f32.partialorder %v1982_v16, 0.0  ;;  %v394_v43 = vsel %vm372_vm9, 1, %v2113_v33  ;;  %v350_v2 = vld [vmem:[#allocation2 + $0x1c] sm:$0xf] }
  0x32   : > { %v393_v44 = vsel %vm371_vm10, 1, %v2113_v33  ;;  %v392_v45 = vsel %vm370_vm11, 1, %v2113_v33  ;;  %vm367_vm12 = vcmp.gt.f32.partialorder %v2192_v13, 0.0  ;;  %vm366_vm13 = vcmp.gt.f32.partialorder %v2190_v12, 0.0  ;;  %v351_v7 = vld [vmem:[#allocation2 + $0x20] sm:$0xf] }
  0x33   : > { %vm365_vm14 = vcmp.gt.f32.partialorder %v2188_v11, 0.0  ;;  %v389_v46 = vsel %vm367_vm12, 1, %v2113_v33  ;;  %v388_v47 = vsel %vm366_vm13, 1, %v2113_v33  ;;  %vm382_vm15 = vcmp.gt.f32.partialorder %v2198_v28, 0.0  ;;  %v353_v12 = vld [vmem:[#allocation2 + $0x28] sm:$0xf] }
  0x34   : > { %v387_v48 = vsel %vm365_vm14, 1, %v2113_v33  ;;  %vm381_vm0 = vcmp.gt.f32.partialorder %v2196_v27, 0.0  ;;  %vm368_vm1 = vcmp.gt.f32.partialorder %v2194_v14, 0.0  ;;  %v404_v49 = vsel %vm382_vm15, 1, %v2113_v33  ;;  %v354_v19 = vld [vmem:[#allocation2 + $0x2c] sm:$0xf] }
  0x35   : > { %v403_v50 = vsel %vm381_vm0, 1, %v2113_v33  ;;  %v390_v51 = vsel %vm368_vm1, 1, %v2113_v33  ;;  %vm385_vm2 = vcmp.gt.f32.partialorder %v2204_v31, 0.0  ;;  %vm384_vm3 = vcmp.gt.f32.partialorder %v2202_v30, 0.0  ;;  %v352_v21 = vld [vmem:[#allocation2 + $0x24] sm:$0xf] }
  0x36   : > { %vm383_vm4 = vcmp.gt.f32.partialorder %v2200_v29, 0.0  ;;  %v407_v52 = vsel %vm385_vm2, 1, %v2113_v33  ;;  %v406_v53 = vsel %vm384_vm3, 1, %v2113_v33  ;;  %vm386_vm5 = vcmp.gt.f32.partialorder %v2206_v32, 0.0  ;;  %v541_v61 = vld [vmem:[%s2987_s2] sm:$0xf] }
  0x37   : > { %449 = vperm.xlu2 %2099, %v400_v37   ;;  %v405_v54 = vsel %vm383_vm4, 1, %v2113_v33  ;;  %v408_v55 = vsel %vm386_vm5, 1, %v2113_v33  ;;  %vm630_vm6 = vcmask 1043456   ;;  %vm587_vm5 = vcmask 1044480  }
  0x38   : > { %443 = vperm.xlu1 %2098, %v398_v38   ;;  %437 = vperm.xlu0 %2097, %v396_v39   ;;  %v632_v59 = vsel %vm630_vm6, %v1999_v58, 0  ;;  %v358_v38 = vld [vmem:[#allocation2 + $0x3c] sm:$0xf] }
  0x39   : > { %2086 = vmatpush.bf16.msra.mxu2 %v632_v59  ;;  %2087 = vmatpush.bf16.msra.mxu3 %v632_v59 }
  0x3a   : > { %2085 = vmatpush.bf16.msra.mxu1 %v632_v59  ;;  %641 = vmatpush.bf16.msra.mxu0 %v632_v59 }
  0x3f   : > { %422 = vperm.xlu2 %2099, %v391_v40  }
  0x40   : > { %455 = vperm.xlu1 %2098, %v402_v41   ;;  %452 = vperm.xlu0 %2097, %v401_v42  }
  0x47   : > { %431 = vperm.xlu2 %2099, %v394_v43  }
  0x48   : > { %428 = vperm.xlu1 %2098, %v393_v44   ;;  %425 = vperm.xlu0 %2097, %v392_v45   ;;  %v357_v44 = vld [vmem:[#allocation2 + $0x38] sm:$0xf] }
  0x4f   : > { %416 = vperm.xlu2 %2099, %v389_v46  }
  0x50   : > { %413 = vperm.xlu1 %2098, %v388_v47   ;;  %410 = vperm.xlu0 %2097, %v387_v48  }
  0x57   : > { %461 = vperm.xlu2 %2099, %v404_v49  }
  0x58   : > { %458 = vperm.xlu1 %2098, %v403_v50   ;;  %419 = vperm.xlu0 %2097, %v390_v51   ;;  %v2016_v50 = vld [vmem:[%s2987_s2 + $0x8] sm:$0xf]  ;;  %v2025_v51 = vld [vmem:[%s2987_s2 + $0xc] sm:$0xf] }
  0x59   : > { %v903_v59 = vsel %vm630_vm6, %v2016_v50, 0 }
  0x5a   : > { %912 = vmatpush.bf16.msrb.mxu2 %v903_v59 }
  0x5f   : > { %470 = vperm.xlu2 %2099, %v407_v52  }
  0x60   : > { %467 = vperm.xlu1 %2098, %v406_v53   ;;  %464 = vperm.xlu0 %2097, %v405_v54  }
  0x68   : > { %473 = vperm.xlu0 %2097, %v408_v55  }
  0x89   : > { %v2243_v56 = vpop.permute.xlu2 %446 }
  0x8a   : > { %vm2995_vm7 = vcmp.eq.s32.totalorder %v2243_v56, 1 }
  0x8b   : > { %vm2258_vm9 = vmpackc.low %vm2995_vm7, %vm2995_vm7 }
  0x8c   : > { %v531_v5 = vsel %vm2258_vm9, %v355_v63, 0  ;;  %vm605_vm9 = vcmask 64512  }
  0x8d   : > { %v573_v10 = vunpack.c.l.b16 %v531_v5  ;;  %v1003_v5 = vsel %vm630_vm6, %v2025_v51, 0 }
  0x8e   : > { %1012 = vmatpush.bf16.msrb.mxu3 %v1003_v5 }
  0x91   : > { %v2245_v57 = vpop.permute.xlu2 %449 }
  0x92   : > { %vm2994_vm8 = vcmp.eq.s32.totalorder %v2245_v57, 1 }
  0x93   : > { %vm2265_vm10 = vmpackc.low %vm2994_vm8, %vm2994_vm8 }
  0x94   : > { %v532_v6 = vsel %vm2265_vm10, %v356_v0, 0  ;;  %vm842_vm10 = vsmask.f32 4352 }
  0x95   : > { %v2290_v11 = vunpack.c.l.b16 %v532_v6  ;;  %v789_v6 = vsel %vm630_vm6, %v541_v61, 0 }
  0x96   : > { %798 = vmatpush.bf16.msrb.mxu1 %v789_v6 }
  0x97   : > { %v2299_v17 = vpack.c.b16 %v2290_v11, %v573_v10 }
  0x99   : > { %v2251_v60 = vpop.permute.xlu2 %422  ;;  %v738_v24 = vshrl.u32 %v2299_v17, 16  ;;  %v741_v25 = vshll.u32 %v2299_v17, 16  ;;  %v599_v31 = vrot.slane %v2299_v17, 3 }
  0x9b   : > { %v866_v34 = vrot.slane %v738_v24, 3  ;;  %v867_v35 = vrot.slane %v741_v25, 4  ;;  %v740_v41 = vrot.slane %v738_v24, 2  ;;  %v743_v48 = vrot.slane %v741_v25, 3 }
  0x9d   : > { %v2349_v53 = vor.u32 %v867_v35, %v866_v34  ;;  %v744_v34 = vor.u32 %v743_v48, %v740_v41 }
  0xa1   : > { %v2269_v1 = vpop.permute.xlu2 %431 }
  0xa2   : > { %v2271_v3 = vpop.permute.xlu1 %440  ;;  %v2273_v4 = vpop.permute.xlu0 %434  ;;  %vm482_vm11 = vcmp.eq.s32.totalorder %v2269_v1, 1 }
  0xa3   : > { %vm2997_vm12 = vcmp.eq.s32.totalorder %v2271_v3, 1  ;;  %vm483_vm13 = vcmp.eq.s32.totalorder %v2273_v4, 1  ;;  %vm504_vm14 = vmpackc.low %vm482_vm11, %vm482_vm11 }
  0xa4   : > { %v526_v8 = vsel %vm504_vm14, %v350_v2, 0  ;;  %vm505_vm15 = vmpackc.low %vm483_vm13, %vm483_vm13  ;;  %vm479_vm14 = vcmp.eq.s32.totalorder %v2251_v60, 1  ;;  %v347_v2 = vld [vmem:[#allocation2 + $0x10] sm:$0xf] }
  0xa5   : > { %v2288_v9 = vunpack.c.l.b16 %v526_v8  ;;  %vm507_vm0 = vmpackc.low %vm2997_vm12, %vm2997_vm12  ;;  %v527_v13 = vsel %vm505_vm15, %v351_v7, 0 }
  0xa6   : > { %v569_v14 = vunpack.c.l.b16 %v527_v13  ;;  %v529_v15 = vsel %vm507_vm0, %v353_v12, 0 }
  0xa7   : > { %v571_v22 = vunpack.c.l.b16 %v529_v15 }
  0xa8   : > { %v2296_v16 = vpack.c.b16 %v569_v14, %v2288_v9 }
  0xa9   : > { %v2369_v63 = vpop.permute.xlu2 %416 }
  0xaa   : > { %v2301_v18 = vpop.permute.xlu1 %443  ;;  %v2303_v20 = vpop.permute.xlu0 %437 }
  0xab   : > { %vm2996_vm1 = vcmp.eq.s32.totalorder %v2301_v18, 1  ;;  %vm2998_vm2 = vcmp.eq.s32.totalorder %v2303_v20, 1 }
  0xac   : > { %vm508_vm3 = vmpackc.low %vm2996_vm1, %vm2996_vm1  ;;  %vm477_vm1 = vcmp.eq.s32.totalorder %v2369_v63, 1  ;;  %v2061_v63 = vld [vmem:[%s2987_s2 + $0x1c] sm:$0xf] }
  0xad   : > { %v530_v23 = vsel %vm508_vm3, %v354_v19, 0  ;;  %vm506_vm4 = vmpackc.low %vm2998_vm2, %vm2998_vm2 }
  0xae   : > { %v572_v26 = vunpack.c.l.b16 %v530_v23  ;;  %v528_v27 = vsel %vm506_vm4, %v352_v21, 0  ;;  %v349_v23 = vld [vmem:[#allocation2 + $0x18] sm:$0xf] }
  0xaf   : > { %v570_v28 = vunpack.c.l.b16 %v528_v27 }
  0xb0   : > { %v2315_v29 = vpack.c.b16 %v572_v26, %v571_v22  ;;  %v2317_v30 = vpack.c.b16 %v573_v10, %v572_v26 }
  0xb1   : > { %v2320_v32 = vpack.c.b16 %v570_v28, %v569_v14  ;;  %v2322_v33 = vpack.c.b16 %v571_v22, %v570_v28 }
  0xb2   : > { %v729_v36 = vshrl.u32 %v2315_v29, 16  ;;  %v2326_v37 = vpop.permute.xlu1 %455  ;;  %v2328_v39 = vpop.permute.xlu0 %452  ;;  %v597_v40 = vrot.slane %v2315_v29, 3  ;;  %v732_v45 = vshll.u32 %v2315_v29, 16 }
  0xb3   : > { %3010 = vst [vmem:[#allocation9_spill] sm:$0xff] %v2326_v37  ;;  %v720_v42 = vshrl.u32 %v2320_v32, 16  ;;  %v723_v43 = vshll.u32 %v2320_v32, 16  ;;  %vm2992_vm15 = vcmp.eq.s32.totalorder %v2326_v37, 1  ;;  %vm2993_vm0 = vcmp.eq.s32.totalorder %v2328_v39, 1 }
  0xb4   : > { %3011 = vst [vmem:[#allocation10_spill] sm:$0xff] %v2328_v39  ;;  %vm512_vm3 = vmpackc.low %vm2992_vm15, %vm2992_vm15  ;;  %v595_v46 = vrot.slane %v2320_v32, 3  ;;  %v862_v47 = vrot.slane %v729_v36, 3  ;;  %v863_v12 = vrot.slane %v732_v45, 4  ;;  %v731_v13 = vrot.slane %v729_v36, 2 }
  0xb5   : > { %v534_v49 = vsel %vm512_vm3, %v358_v38, 0  ;;  %vm511_vm4 = vmpackc.low %vm2993_vm0, %vm2993_vm0  ;;  %v858_v52 = vrot.slane %v720_v42, 3  ;;  %v859_v7 = vrot.slane %v723_v43, 4  ;;  %v722_v8 = vrot.slane %v720_v42, 2 }
  0xb6   : > { %v2351_v54 = vunpack.c.l.b16 %v534_v49  ;;  %v533_v55 = vsel %vm511_vm4, %v357_v44, 0  ;;  %v598_v58 = vsel %vm587_vm5, %v595_v46, %v597_v40  ;;  %vm2365_vm3 = vmpackc.low %vm479_vm14, %vm479_vm14  ;;  %v725_v10 = vrot.slane %v723_v43, 3  ;;  %v2034_v49 = vld [vmem:[%s2987_s2 + $0x10] sm:$0xf] }
  0xb7   : > { %v575_v0 = vunpack.c.l.b16 %v533_v55  ;;  %2004 = vmatmul.msk.bf16.vlgmr.msra.gmra.mxu2 %vm605_vm9, %v598_v58  ;;  %v2380_v19 = vor.u32 %v859_v7, %v858_v52  ;;  %v734_v21 = vrot.slane %v732_v45, 3  ;;  %v523_v25 = vsel %vm2365_vm3, %v347_v2, 0  ;;  %v2431_v2 = vpop.permute.xlu2 %461 }
  0xb8   : > { %vm683_vm4 = vsmask.f32 5376  ;;  %v2388_v26 = vor.u32 %v725_v10, %v722_v8  ;;  %v864_v27 = vor.u32 %v863_v12, %v862_v47  ;;  %v2405_v44 = vunpack.c.l.b16 %v523_v25  ;;  %3014 = vst [vmem:[#allocation11_spill] sm:$0xff] %v2431_v2  ;;  %v344_v8 = vld [vmem:[#allocation2 + $0x4] sm:$0xf] }
  0xb9   : > { %v2375_v14 = vpack.c.b16 %v2351_v54, %v575_v0  ;;  %v2378_v15 = vpack.c.b16 %v575_v0, %v2290_v11  ;;  %v348_v11 = vld [vmem:[#allocation2 + $0x14] sm:$0xf]  ;;  %v735_v42 = vor.u32 %v734_v21, %v731_v13  ;;  %v1105_v52 = vsel %vm630_vm6, %v2034_v49, 0  ;;  %v343_v13 = vld [vmem:[#allocation2] sm:$0xf] }
  0xba   : > { %v2382_v22 = vpop.permute.xlu1 %428  ;;  %v2384_v24 = vpop.permute.xlu0 %425  ;;  %v2400_v38 = vsel %vm842_vm10, %v2380_v19, %v864_v27  ;;  %v2409_v41 = vsel %vm842_vm10, %v864_v27, %v2349_v53  ;;  %1114 = vmatpush.bf16.msrb.mxu0 %v1105_v52  ;;  %vm492_vm12 = vcmp.eq.s32.totalorder %v2431_v2, 1 }
  0xbb   : > { %v747_v28 = vshrl.u32 %v2375_v14, 16  ;;  %vm481_vm15 = vcmp.eq.s32.totalorder %v2382_v22, 1  ;;  %vm480_vm0 = vcmp.eq.s32.totalorder %v2384_v24, 1  ;;  %v750_v35 = vshll.u32 %v2375_v14, 16 }
  0xbc   : > { %vm503_vm8 = vmpackc.low %vm481_vm15, %vm481_vm15  ;;  %v601_v36 = vrot.slane %v2375_v14, 3  ;;  %v2421_v50 = vsel %vm683_vm4, %v2388_v26, %v735_v42  ;;  %v2426_v55 = vsel %vm683_vm4, %v735_v42, %v744_v34 }
  0xbd   : > { %v525_v43 = vsel %vm503_vm8, %v349_v23, 0  ;;  %vm502_vm3 = vmpackc.low %vm480_vm0, %vm480_vm0  ;;  %v870_v58 = vrot.slane %v747_v28, 3  ;;  %v871_v61 = vrot.slane %v750_v35, 4  ;;  %v749_v62 = vrot.slane %v747_v28, 2 }
  0xbe   : > { %v567_v45 = vunpack.c.l.b16 %v525_v43  ;;  %v524_v47 = vsel %vm502_vm3, %v348_v11, 0  ;;  %v602_v48 = vsel %vm587_vm5, %v599_v31, %v601_v36  ;;  %v752_v0 = vrot.slane %v750_v35, 3  ;;  %v360_v43 = vld [vmem:[#allocation2 + $0x44] sm:$0xf] }
  0xbf   : > { %v566_v51 = vunpack.c.l.b16 %v524_v47  ;;  %2006 = vmatmul.msk.bf16.vlgmr.msra.gmra.mxu3 %vm605_vm9, %v602_v48  ;;  %v2440_v21 = vor.u32 %v871_v61, %v870_v58  ;;  %v600_v35 = vsel %vm587_vm5, %v597_v40, %v599_v31  ;;  %v345_v31 = vld [vmem:[#allocation2 + $0x8] sm:$0xf]  ;;  %v359_v47 = vld [vmem:[#allocation2 + $0x40] sm:$0xf]  ;;  %v346_v58 = vld [vmem:[#allocation2 + $0xc] sm:$0xf] }
  0xc0   : > { %v2429_v59 = vpack.c.b16 %v2288_v9, %v567_v45  ;;  %v2442_v23 = vor.u32 %v752_v0, %v749_v62  ;;  %v1470_v0 = vsel %vm630_vm6, %v2061_v63, 0 }
  0xc1   : > { %v2434_v5 = vpack.c.b16 %v566_v51, %v2405_v44  ;;  %v2436_v6 = vpack.c.b16 %v567_v45, %v566_v51  ;;  %v2468_v17 = vsel %vm842_vm10, %v2349_v53, %v2440_v21  ;;  %v2052_v53 = vld [vmem:[%s2987_s2 + $0x18] sm:$0xf]  ;;  %1479 = vmatpush.bf16.msra.mxu3 %v1470_v0 }
  0xc2   : > { %v414_v7 = vpop.permute.xlu1 %413  ;;  %v411_v10 = vpop.permute.xlu0 %410  ;;  %v593_v12 = vrot.slane %v2429_v59, 3  ;;  %v2472_v29 = vsel %vm683_vm4, %v744_v34, %v2442_v23  ;;  %v2043_v34 = vld [vmem:[%s2987_s2 + $0x14] sm:$0xf]  ;;  %v1358_v62 = vsel %vm630_vm6, %v2052_v53, 0 }
  0xc3   : > { %vm476_vm8 = vcmp.eq.s32.totalorder %v414_v7, 1  ;;  %vm475_vm7 = vcmp.eq.s32.totalorder %v411_v10, 1  ;;  %v2999_v9 = vrot.slane %v2434_v5, 3  ;;  %v1263_v7 = vsel %vm630_vm6, %v2043_v34, 0  ;;  %1367 = vmatpush.bf16.msra.mxu2 %v1358_v62  ;;  %v361_v62 = vld [vmem:[#allocation2 + $0x48] sm:$0xf] }
  0xc4   : > { %vm498_vm3 = vmpackc.low %vm476_vm8, %vm476_vm8 }
  0xc5   : > { %v520_v25 = vsel %vm498_vm3, %v344_v8, 0  ;;  %vm497_vm2 = vmpackc.low %vm475_vm7, %vm475_vm7  ;;  %v594_v11 = vsel %vm587_vm5, %v2999_v9, %v593_v12 }
  0xc6   : > { %v562_v27 = vunpack.c.l.b16 %v520_v25  ;;  %v519_v28 = vsel %vm497_vm2, %v343_v13, 0  ;;  %2002 = vmatmul.msk.bf16.vlgmr.msra.gmra.mxu1 %vm605_vm9, %v594_v11  ;;  %vm2461_vm7 = vmpackc.low %vm492_vm12, %vm492_vm12 }
  0xc7   : > { %v561_v42 = vunpack.c.l.b16 %v519_v28  ;;  %2005 = vmatmul.msk.bf16.gmra.mxu2 %vm605_vm9, %v600_v35  ;;  %vm2477_vm2 = vmpackc.low %vm477_vm1, %vm477_vm1  ;;  %v536_v52 = vsel %vm2461_vm7, %v360_v43, 0  ;;  %1272 = vmatpush.bf16.msra.mxu1 %v1263_v7 }
  0xc8   : > { %v521_v61 = vsel %vm2477_vm2, %v345_v31, 0  ;;  %v2511_v10 = vunpack.c.l.b16 %v536_v52 }
  0xc9   : > { %v2481_v48 = vpack.c.b16 %v562_v27, %v561_v42  ;;  %v563_v28 = vunpack.c.l.b16 %v521_v61 }
  0xca   : > { %v2483_v49 = vpop.permute.xlu1 %458  ;;  %v2485_v51 = vpop.permute.xlu0 %419 }
  0xcb   : > { %3019 = vst [vmem:[#allocation12_spill] sm:$0xff] %v2483_v49  ;;  %vm491_vm1 = vcmp.eq.s32.totalorder %v2483_v49, 1  ;;  %vm478_vm8 = vcmp.eq.s32.totalorder %v2485_v51, 1  ;;  %v685_v13 = vshrl.u32 %v2481_v48, 16  ;;  %v688_v11 = vshll.u32 %v2481_v48, 16 }
  0xcc   : > { %vm513_vm3 = vmpackc.low %vm491_vm1, %vm491_vm1 }
  0xcd   : > { %v535_v8 = vsel %vm513_vm3, %v359_v47, 0  ;;  %vm500_vm7 = vmpackc.low %vm478_vm8, %vm478_vm8  ;;  %v588_v47 = vrot.slane %v2481_v48, 3  ;;  %v843_v63 = vrot.slane %v685_v13, 3  ;;  %v687_v49 = vrot.slane %v685_v13, 2 }
  0xce   : > { %v577_v25 = vunpack.c.l.b16 %v535_v8  ;;  %v522_v27 = vsel %vm500_vm7, %v346_v58, 0  ;;  %v844_v58 = vrot.slane %v688_v11, 4  ;;  %v3021_v13 = vrot.slane %v2434_v5, 3 }
  0xcf   : > { %v2515_v35 = vunpack.c.l.b16 %v522_v27  ;;  %v596_v27 = vsel %vm587_vm5, %v593_v12, %v595_v46  ;;  %v705_v46 = vshll.u32 %v2434_v5, 16 }
  0xd0   : > { %v586_v42 = vpack.c.b16 %v577_v25, %v577_v25  ;;  %v976_v43 = vpack.c.b16 %v2511_v10, %v577_v25  ;;  %v2519_v45 = vpack.c.b16 %v577_v25, %v2351_v54 }
  0xd1   : > { %v2522_v31 = vpack.c.b16 %v2515_v35, %v563_v28 }
  0xd2   : > { %v2524_v40 = vpop.permute.xlu0 %464  ;;  %v603_v53 = vrot.slane %v586_v42, 3  ;;  %v979_v61 = vshrl.u32 %v976_v43, 16  ;;  %v982_v7 = vshll.u32 %v976_v43, 16  ;;  %v2070_v43 = vld [vmem:[%s2987_s2 + $0x20] sm:$0xf] }
  0xd3   : > { %3020 = vst [vmem:[#allocation13_spill] sm:$0xff] %v2524_v40  ;;  %v693_v34 = vshrl.u32 %v2522_v31, 16  ;;  %v696_v52 = vshll.u32 %v2522_v31, 16  ;;  %vm3005_vm2 = vcmp.eq.s32.totalorder %v2524_v40, 1  ;;  %v589_v54 = vrot.slane %v2522_v31, 3 }
  0xd4   : > { %v604_v0 = vsel %vm587_vm5, %v601_v36, %v603_v53  ;;  %vm515_vm3 = vmpackc.low %vm3005_vm2, %vm3005_vm2  ;;  %v845_v36 = vor.u32 %v844_v58, %v843_v63  ;;  %v981_v32 = vrot.slane %v979_v61, 3  ;;  %v984_v53 = vrot.slane %v982_v7, 4 }
  0xd5   : > { %2007 = vmatmul.msk.bf16.gmra.mxu3 %vm605_vm9, %v604_v0  ;;  %v846_v48 = vrot.slane %v693_v34, 3  ;;  %v847_v8 = vrot.slane %v696_v52, 4  ;;  %v590_v25 = vsel %vm587_vm5, %v588_v47, %v589_v54  ;;  %v537_v14 = vsel %vm515_vm3, %v361_v62, 0 }
  0xd6   : > { %2000 = vmatmul.msk.bf16.vlgmr.msra.gmra.mxu0 %vm605_vm9, %v590_v25  ;;  %2003 = vmatmul.msk.bf16.gmra.mxu1 %vm605_vm9, %v596_v27  ;;  %v2549_v31 = vunpack.c.l.b16 %v537_v14  ;;  %v1602_v47 = vsel %vm630_vm6, %v2070_v43, 0  ;;  %v702_v0 = vshrl.u32 %v2434_v5, 16  ;;  %v756_v58 = vshrl.u32 %v586_v42, 16 }
  0xd7   : > { %v848_v28 = vor.u32 %v847_v8, %v846_v48  ;;  %1611 = vmatpush.bf16.msra.mxu0 %v1602_v47  ;;  %v985_v8 = vor.u32 %v984_v53, %v981_v32  ;;  %v695_v25 = vrot.slane %v693_v34, 2  ;;  %v851_v61 = vrot.slane %v705_v46, 4 }
  0xd8   : > { %v977_v63 = vpack.c.b16 %v2549_v31, %v2549_v31  ;;  %v850_v27 = vrot.slane %v702_v0, 3  ;;  %v759_v7 = vshll.u32 %v586_v42, 16  ;;  %v698_v9 = vrot.slane %v696_v52, 3 }
  0xd9   : > { %v849_v12 = vsel %vm842_vm10, %v845_v36, %v848_v28  ;;  %v2560_v36 = vsel %vm842_vm10, %v2440_v21, %v985_v8  ;;  %v874_v47 = vrot.slane %v756_v58, 3  ;;  %v758_v2 = vrot.slane %v756_v58, 2 }
  0xda   : > { %2017 = vmatmul.msk.bf16.vlgmr.msrb.gmra.mxu2 %vm605_vm9, %v849_v12  ;;  %v988_v62 = vshrl.u32 %v977_v63, 16  ;;  %v991_v48 = vshll.u32 %v977_v63, 16  ;;  %v875_v40 = vrot.slane %v759_v7, 4  ;;  %v690_v12 = vrot.slane %v688_v11, 3 }
  0xdb   : > { %v761_v37 = vrot.slane %v759_v7, 3  ;;  %v699_v32 = vor.u32 %v698_v9, %v695_v25  ;;  %v852_v34 = vor.u32 %v851_v61, %v850_v27  ;;  %v592_v9 = vsel %vm587_vm5, %v589_v54, %v3021_v13 }
  0xdc   : > { %v990_v14 = vrot.slane %v988_v62, 3  ;;  %v993_v43 = vrot.slane %v991_v48, 4  ;;  %v876_v63 = vor.u32 %v875_v40, %v874_v47  ;;  %v691_v62 = vor.u32 %v690_v12, %v687_v49 }
  0xdd   : > { %v762_v53 = vor.u32 %v761_v37, %v758_v2  ;;  %v853_v48 = vsel %vm842_vm10, %v848_v28, %v852_v34  ;;  %v714_v2 = vshll.u32 %v2429_v59, 16  ;;  %v704_v49 = vrot.slane %v702_v0, 2 }
  0xde   : > { %v994_v39 = vor.u32 %v993_v43, %v990_v14  ;;  %v877_v52 = vsel %vm842_vm10, %v2440_v21, %v876_v63  ;;  %v700_v37 = vsel %vm683_vm4, %v691_v62, %v699_v32  ;;  %v707_v11 = vrot.slane %v705_v46, 3 }
  0xdf   : > { %v2570_v58 = vsel %vm683_vm4, %v2442_v23, %v762_v53  ;;  %v855_v23 = vrot.slane %v714_v2, 4  ;;  %v2585_v28 = vpack.c.b16 %v2405_v44, %v2515_v35  ;;  %v716_v0 = vrot.slane %v714_v2, 3 }
  0xe0   : > { %v2563_v42 = vsel %vm842_vm10, %v985_v8, %v994_v39  ;;  %v711_v39 = vshrl.u32 %v2429_v59, 16  ;;  %v708_v5 = vor.u32 %v707_v11, %v704_v49  ;;  %v1188_v7 = vshrl.u32 %v2436_v6, 16 }
  0xe1   : > { %v1191_v14 = vshll.u32 %v2296_v16, 16  ;;  %vm1177_vm6 = vsmask.f32 7424  ;;  %v1428_v13 = vrot.slane %v2436_v6, 1  ;;  %vm1427_vm5 = vcmask 1046528  }
  0xe2   : > { %v854_v21 = vrot.slane %v711_v39, 3  ;;  %v709_v8 = vsel %vm683_vm4, %v699_v32, %v708_v5  ;;  %v713_v59 = vrot.slane %v711_v39, 2  ;;  %v1429_v39 = vrot.slane %v2296_v16, 1 }
  0xe3   : > { %v1193_v12 = vrot.slane %v1191_v14, 1  ;;  %v2676_v49 = vpack.c.b16 %v2549_v31, %v2511_v10 }
  0xe4   : > { %v856_v40 = vor.u32 %v855_v23, %v854_v21  ;;  %v717_v46 = vor.u32 %v716_v0, %v713_v59  ;;  %v1430_v23 = vsel %vm1427_vm5, %v1428_v13, %v1429_v39  ;;  %v1205_v13 = vshll.u32 %v2317_v30, 16 }
  0xe5   : > { %2026 = vmatmul.msk.bf16.vlgmr.msrb.gmra.mxu3 %vm605_vm9, %v853_v48 }
  0xe6   : > { %2001 = vmatmul.msk.bf16.gmra.mxu0 %vm605_vm9, %v592_v9  ;;  %2008 = vmatmul.msk.bf16.vlgmr.msrb.gmra.mxu1 %vm605_vm9, %v700_v37  ;;  %v857_v54 = vsel %vm842_vm10, %v852_v34, %v856_v40  ;;  %v861_v25 = vsel %vm842_vm10, %v856_v40, %v2380_v19  ;;  %v718_v44 = vsel %vm683_vm4, %v708_v5, %v717_v46  ;;  %v1180_v34 = vshll.u32 %v2585_v28, 16 }
  0xe7   : > { %v727_v35 = vsel %vm683_vm4, %v717_v46, %v2388_v26  ;;  %v1198_v9 = vshll.u32 %v2322_v33, 16  ;;  %vm1539_vm10 = vsmask.f32 6400 }
  0xe8   : > { %v1182_v62 = vrot.slane %v1180_v34, 1  ;;  %v1431_v34 = vrot.slane %v2322_v33, 1 }
  0xe9   : > { %v1200_v5 = vrot.slane %v1198_v9, 1 }
  0xea   : > { %2018 = vmatmul.msk.bf16.gmra.mxu2 %vm605_vm9, %v853_v48  ;;  %v1178_v48 = vshrl.u32 %v2585_v28, 16 }
  0xec   : > { %v1183_v37 = vor.u32 %v1182_v62, %v1178_v48  ;;  %v1544_v62 = vrot.slane %v1191_v14, 2  ;;  %v1202_v48 = vshrl.u32 %v2322_v33, 16 }
  0xf5   : > { %2027 = vmatmul.msk.bf16.gmra.mxu3 %vm605_vm9, %v857_v54 }
  0xf6   : > { %2009 = vmatmul.msk.bf16.gmra.mxu1 %vm605_vm9, %v709_v8  ;;  %2035 = vmatmul.msk.bf16.vlgmr.msrb.gmra.mxu0 %vm605_vm9, %v2585_v28 }
  0xfa   : > { %2019 = vmatmul.msk.bf16.gmra.mxu2 %vm605_vm9, %v857_v54 }
 0x105   : > { %2028 = vmatmul.msk.bf16.gmra.mxu3 %vm605_vm9, %v861_v25 }
 0x106   : > { %2010 = vmatmul.msk.bf16.gmra.mxu1 %vm605_vm9, %v718_v44  ;;  %2036 = vmatmul.msk.bf16.gmra.mxu0 %vm605_vm9, %v2436_v6  ;;  %v1540_v44 = vrot.slane %v1188_v7, 1 }
 0x10a   : > { %2020 = vmatmul.msk.bf16.gmra.mxu2 %vm605_vm9, %v861_v25 }
 0x115   : > { %2029 = vmatmul.msk.bf16.gmra.mxu3 %vm605_vm9, %v2400_v38 }
 0x116   : > { %2011 = vmatmul.msk.bf16.gmra.mxu1 %vm605_vm9, %v727_v35  ;;  %2037 = vmatmul.msk.bf16.gmra.mxu0 %vm605_vm9, %v2296_v16 }
 0x11a   : > { %2021 = vmatmul.msk.bf16.gmra.mxu2 %vm605_vm9, %v2400_v38 }
 0x125   : > { %2030 = vmatmul.msk.bf16.gmra.mxu3 %vm605_vm9, %v2409_v41 }
 0x126   : > { %2012 = vmatmul.msk.bf16.gmra.mxu1 %vm605_vm9, %v2421_v50  ;;  %2038 = vmatmul.msk.bf16.gmra.mxu0 %vm605_vm9, %v2322_v33 }
 0x12a   : > { %2022 = vmatmul.msk.bf16.gmra.mxu2 %vm605_vm9, %v2409_v41 }
 0x135   : > { %2031 = vmatmul.msk.bf16.gmra.mxu3 %vm605_vm9, %v2468_v17 }
 0x136   : > { %2013 = vmatmul.msk.bf16.gmra.mxu1 %vm605_vm9, %v2426_v55  ;;  %2039 = vmatmul.msk.bf16.gmra.mxu0 %vm605_vm9, %v2317_v30 }
 0x13a   : > { %v2624_v19 = vpop.f32.mrf.mxu2  ;;  %2023 = vmatmul.msk.bf16.gmra.mxu2 %vm605_vm9, %v2468_v17  ;;  %v1184_v17 = vshll.u32 %v2436_v6, 16  ;;  %v1195_v6 = vshrl.u32 %v2296_v16, 16 }
 0x13c   : > { %v1186_v61 = vrot.slane %v1184_v17, 1  ;;  %v1197_v8 = vor.u32 %v1195_v6, %v1193_v12  ;;  %v1541_v35 = vrot.slane %v1184_v17, 2 }
 0x13e   : > { %v1190_v47 = vor.u32 %v1188_v7, %v1186_v61  ;;  %v1187_v54 = vsel %vm1177_vm6, %v1183_v37, %v1186_v61  ;;  %v1201_v10 = vsel %vm1177_vm6, %v1197_v8, %v1200_v5 }
 0x140   : > { %v1194_v32 = vsel %vm1177_vm6, %v1190_v47, %v1193_v12  ;;  %v1542_v12 = vor.u32 %v1541_v35, %v1540_v44  ;;  %v1433_v35 = vrot.slane %v2317_v30, 1 }
 0x142   : > { %v2628_v26 = vpop.f32.mrf.mxu2  ;;  %v2634_v41 = vpop.f32.mrf.mxu3 }
 0x143   : > { %v2630_v38 = vpop.f32.mrf.mxu1 }
 0x145   : > { %2032 = vmatmul.msk.bf16.gmra.mxu3 %vm605_vm9, %v2560_v36 }
 0x146   : > { %2014 = vmatmul.msk.bf16.gmra.mxu1 %vm605_vm9, %v2472_v29  ;;  %2040 = vmatmul.msk.bf16.gmra.mxu0 %vm605_vm9, %v2378_v15 }
 0x14a   : > { %2024 = vmatmul.msk.bf16.gmra.mxu2 %vm605_vm9, %v877_v52  ;;  %v2641_v50 = vpop.f32.mrf.mxu2  ;;  %v2646_v27 = vpop.f32.mrf.mxu3 }
 0x14b   : > { %v2643_v55 = vpop.f32.mrf.mxu1 }
 0x152   : > { %v2652_v36 = vpop.f32.mrf.mxu2 }
 0x153   : > { %v643_v43 = vpop.f32.mrf.mxu0  ;;  %v2650_v29 = vpop.f32.mrf.mxu1 }
 0x155   : > { %2033 = vmatmul.msk.bf16.gmra.mxu3 %vm605_vm9, %v2563_v42 }
 0x156   : > { %2015 = vmatmul.msk.bf16.gmra.mxu1 %vm605_vm9, %v2570_v58  ;;  %2041 = vmatmul.msk.bf16.gmra.mxu0 %vm605_vm9, %v2519_v45 }
 0x158   : > { %v2660_v63 = vpop.f32.mrf.mxu3 }
 0x15a   : > { %2053 = vmatmul.msk.bf16.vlgmr.msra.gmra.mxu2 %vm605_vm9, %v1194_v32 }
 0x15b   : > { %v645_v53 = vpop.f32.mrf.mxu0  ;;  %v2665_v52 = vpop.f32.mrf.mxu1 }
 0x15d   : > { %v914_v42 = vpop.f32.mrf.mxu2 }
 0x160   : > { %v2668_v58 = vpop.f32.mrf.mxu3 }
 0x163   : > { %v648_v2 = vpop.f32.mrf.mxu0  ;;  %v800_v21 = vpop.f32.mrf.mxu1 }
 0x164   : > { %v801_v11 = vadd.f32 %v800_v21, %v643_v43  ;;  %v1543_v43 = vrot.slane %v1195_v6, 1  ;;  %v1207_v6 = vrot.slane %v1205_v13, 1 }
 0x165   : > { %v916_v40 = vpop.f32.mrf.mxu2  ;;  %2062 = vmatmul.msk.bf16.vlgmr.msra.gmra.mxu3 %vm605_vm9, %v1430_v23  ;;  %v1432_v23 = vsel %vm1427_vm5, %v1429_v39, %v1431_v34 }
 0x166   : > { %2042 = vmatmul.msk.bf16.gmra.mxu0 %vm605_vm9, %v2676_v49  ;;  %2044 = vmatmul.msk.bf16.vlgmr.msra.gmra.mxu1 %vm605_vm9, %v1187_v54  ;;  %v954_v28 = vadd.f32 %v914_v42, %v801_v11 }
 0x168   : > { %v1014_v59 = vpop.f32.mrf.mxu3 }
 0x169   : > { %v1054_v0 = vadd.f32 %v1014_v59, %v954_v28 }
 0x16a   : > { %2054 = vmatmul.msk.bf16.gmra.mxu2 %vm605_vm9, %v1201_v10 }
 0x16b   : > { %v650_v31 = vpop.f32.mrf.mxu0  ;;  %v802_v46 = vpop.f32.mrf.mxu1 }
 0x16c   : > { %v803_v25 = vadd.f32 %v802_v46, %v645_v53  ;;  %v1545_v53 = vor.u32 %v1544_v62, %v1543_v43  ;;  %v1547_v46 = vrot.slane %v1202_v48, 1 }
 0x16d   : > { %v919_v16 = vpop.f32.mrf.mxu2 }
 0x16e   : > { %v955_v61 = vadd.f32 %v916_v40, %v803_v25  ;;  %v1204_v40 = vor.u32 %v1202_v48, %v1200_v5  ;;  %v1546_v14 = vsel %vm1539_vm10, %v1542_v12, %v1545_v53  ;;  %v1548_v25 = vrot.slane %v1198_v9, 2 }
 0x16f   : > { %v1434_v12 = vsel %vm1427_vm5, %v1431_v34, %v1433_v35  ;;  %v1209_v9 = vshrl.u32 %v2317_v30, 16 }
 0x170   : > { %v1016_v47 = vpop.f32.mrf.mxu3  ;;  %v1208_v39 = vsel %vm1177_vm6, %v1204_v40, %v1207_v6  ;;  %v1549_v43 = vor.u32 %v1548_v25, %v1547_v46 }
 0x171   : > { %v1055_v42 = vadd.f32 %v1016_v47, %v955_v61  ;;  %v1212_v61 = vshll.u32 %v2378_v15, 16 }
 0x173   : > { %v805_v37 = vpop.f32.mrf.mxu1  ;;  %v1116_v21 = vpop.f32.mrf.mxu0  ;;  %v1214_v48 = vrot.slane %v1212_v61, 1 }
 0x174   : > { %v806_v11 = vadd.f32 %v805_v37, %v648_v2  ;;  %v2690_v7 = vadd.f32 %v1116_v21, %v1054_v0  ;;  %v1550_v21 = vsel %vm1539_vm10, %v1545_v53, %v1549_v43 }
 0x175   : > { %v921_v17 = vpop.f32.mrf.mxu2  ;;  %2063 = vmatmul.msk.bf16.gmra.mxu3 %vm605_vm9, %v1432_v23 }
 0x176   : > { %2045 = vmatmul.msk.bf16.gmra.mxu1 %vm605_vm9, %v1194_v32  ;;  %2071 = vmatmul.msk.bf16.vlgmr.msra.gmra.mxu0 %vm605_vm9, %v1546_v14  ;;  %v956_v33 = vadd.f32 %v919_v16, %v806_v11  ;;  %v1211_v11 = vor.u32 %v1209_v9, %v1207_v6  ;;  %v1435_v6 = vrot.slane %v2378_v15, 1 }
 0x178   : > { %v1019_v54 = vpop.f32.mrf.mxu3 }
 0x179   : > { %v1056_v28 = vadd.f32 %v1019_v54, %v956_v33  ;;  %v1552_v54 = vrot.slane %v1205_v13, 2  ;;  %v1216_v13 = vshrl.u32 %v2378_v15, 16 }
 0x17a   : > { %2055 = vmatmul.msk.bf16.gmra.mxu2 %vm605_vm9, %v1208_v39 }
 0x17b   : > { %v807_v2 = vpop.f32.mrf.mxu1  ;;  %v1118_v8 = vpop.f32.mrf.mxu0 }
 0x17c   : > { %v808_v59 = vadd.f32 %v807_v2, %v650_v31  ;;  %v2698_v0 = vadd.f32 %v1118_v8, %v1055_v42 }
 0x17d   : > { %v924_v5 = vpop.f32.mrf.mxu2 }
 0x17e   : > { %v957_v44 = vadd.f32 %v921_v17, %v808_v59  ;;  %v1219_v59 = vshll.u32 %v2519_v45, 16 }
 0x180   : > { %v1021_v32 = vpop.f32.mrf.mxu3 }
 0x181   : > { %v1057_v16 = vadd.f32 %v1021_v32, %v957_v44  ;;  %v1436_v44 = vsel %vm1427_vm5, %v1433_v35, %v1435_v6  ;;  %v1218_v35 = vor.u32 %v1216_v13, %v1214_v48 }
 0x183   : > { %v810_v47 = vpop.f32.mrf.mxu1  ;;  %v1121_v62 = vpop.f32.mrf.mxu0 }
 0x184   : > { %v811_v37 = vadd.f32 %v810_v47, %v2630_v38  ;;  %v2704_v31 = vadd.f32 %v1121_v62, %v1056_v28  ;;  %v2712_v38 = vsel %vm1177_vm6, %v1211_v11, %v1214_v48  ;;  %v1221_v47 = vrot.slane %v1219_v59, 1 }
 0x185   : > { %v926_v42 = vpop.f32.mrf.mxu2  ;;  %2064 = vmatmul.msk.bf16.gmra.mxu3 %vm605_vm9, %v1434_v12  ;;  %v1556_v11 = vrot.slane %v1212_v61, 2 }
 0x186   : > { %2046 = vmatmul.msk.bf16.gmra.mxu1 %vm605_vm9, %v1201_v10  ;;  %2072 = vmatmul.msk.bf16.gmra.mxu0 %vm605_vm9, %v1550_v21  ;;  %v958_v23 = vadd.f32 %v924_v5, %v811_v37  ;;  %v1551_v10 = vrot.slane %v1209_v9, 1 }
 0x188   : > { %v1024_v17 = vpop.f32.mrf.mxu3  ;;  %v1553_v5 = vor.u32 %v1552_v54, %v1551_v10 }
 0x189   : > { %v1058_v34 = vadd.f32 %v1024_v17, %v958_v23  ;;  %v468_v17 = vpop.permute.xlu1 %467 }
 0x18a   : > { %2056 = vmatmul.msk.bf16.gmra.mxu2 %vm605_vm9, %v2712_v38  ;;  %v1554_v62 = vsel %vm1539_vm10, %v1549_v43, %v1553_v5  ;;  %vm494_vm4 = vcmp.eq.s32.totalorder %v468_v17, 1  ;;  %v1560_v17 = vrot.slane %v1219_v59, 2 }
 0x18b   : > { %v812_v40 = vpop.f32.mrf.mxu1  ;;  %v1123_v14 = vpop.f32.mrf.mxu0  ;;  %vm2743_vm3 = vmpackc.low %vm494_vm4, %vm494_vm4 }
 0x18c   : > { %v813_v30 = vadd.f32 %v812_v40, %v2643_v55  ;;  %v2717_v33 = vadd.f32 %v1123_v14, %v1057_v16  ;;  %v1437_v40 = vrot.slane %v2519_v45, 1  ;;  %v471_v14 = vpop.permute.xlu2 %470 }
 0x18d   : > { %v929_v53 = vpop.f32.mrf.mxu2  ;;  %vm495_vm7 = vcmp.eq.s32.totalorder %v471_v14, 1 }
 0x18e   : > { %v959_v28 = vadd.f32 %v926_v42, %v813_v30  ;;  %v2733_v42 = vsel %vm1177_vm6, %v1218_v35, %v1221_v47  ;;  %vm517_vm2 = vmpackc.low %vm495_vm7, %vm495_vm7 }
 0x190   : > { %v1026_v2 = vpop.f32.mrf.mxu3 }
 0x191   : > { %v1059_v8 = vadd.f32 %v1026_v2, %v959_v28  ;;  %v362_v2 = vld [vmem:[#allocation2 + $0x4c] sm:$0xf] }
 0x193   : > { %v815_v46 = vpop.f32.mrf.mxu1  ;;  %v1126_v25 = vpop.f32.mrf.mxu0 }
 0x194   : > { %v816_v32 = vadd.f32 %v815_v46, %v2650_v29  ;;  %v2723_v55 = vadd.f32 %v1126_v25, %v1058_v34 }
 0x195   : > { %v931_v16 = vpop.f32.mrf.mxu2  ;;  %2065 = vmatmul.msk.bf16.gmra.mxu3 %vm605_vm9, %v1436_v44  ;;  %v1223_v44 = vshrl.u32 %v2519_v45, 16  ;;  %v1230_v45 = vshrl.u32 %v2676_v49, 16 }
 0x196   : > { %2047 = vmatmul.msk.bf16.gmra.mxu1 %vm605_vm9, %v1208_v39  ;;  %2073 = vmatmul.msk.bf16.gmra.mxu0 %vm605_vm9, %v1554_v62  ;;  %v960_v12 = vadd.f32 %v929_v53, %v816_v32  ;;  %v1555_v39 = vrot.slane %v1216_v13, 1  ;;  %v1226_v53 = vshll.u32 %v2676_v49, 16  ;;  %v538_v62 = vsel %vm2743_vm3, %v362_v2, 0 }
 0x197   : > { %v1225_v13 = vor.u32 %v1223_v44, %v1221_v47 }
 0x198   : > { %v1029_v37 = vpop.f32.mrf.mxu3  ;;  %v1557_v10 = vor.u32 %v1556_v11, %v1555_v39  ;;  %v1228_v32 = vrot.slane %v1226_v53, 1  ;;  %v1559_v11 = vrot.slane %v1223_v44, 1 }
 0x199   : > { %v1060_v29 = vadd.f32 %v1029_v37, %v960_v12 }
 0x19a   : > { %2057 = vmatmul.msk.bf16.gmra.mxu2 %vm605_vm9, %v2733_v42  ;;  %v2761_v37 = vsel %vm1177_vm6, %v1225_v13, %v1228_v32 }
 0x19b   : > { %v817_v15 = vpop.f32.mrf.mxu1  ;;  %v1128_v9 = vpop.f32.mrf.mxu0 }
 0x19c   : > { %v818_v21 = vadd.f32 %v817_v15, %v2665_v52  ;;  %v2738_v23 = vadd.f32 %v1128_v9, %v1059_v8  ;;  %v1438_v52 = vsel %vm1427_vm5, %v1435_v6, %v1437_v40  ;;  %v363_v6 = vld [vmem:[#allocation2 + $0x50] sm:$0xf] }
 0x19d   : > { %v934_v43 = vpop.f32.mrf.mxu2 }
 0x19e   : > { %v961_v34 = vadd.f32 %v931_v16, %v818_v21  ;;  %v1558_v16 = vsel %vm1539_vm10, %v1553_v5, %v1557_v10  ;;  %v2765_v5 = vunpack.c.l.b16 %v538_v62  ;;  %v474_v21 = vpop.permute.xlu0 %473 }
 0x1a0   : > { %v1031_v48 = vpop.f32.mrf.mxu3 }
 0x1a1   : > { %v1061_v30 = vadd.f32 %v1031_v48, %v961_v34 }
 0x1a3   : > { %v820_v54 = vpop.f32.mrf.mxu1  ;;  %v1131_v28 = vpop.f32.mrf.mxu0 }
 0x1a4   : > { %v821_v61 = vadd.f32 %v820_v54, %v2624_v19  ;;  %v2748_v46 = vadd.f32 %v1131_v28, %v1060_v29  ;;  %v539_v29 = vsel %vm517_vm2, %v363_v6, 0  ;;  %vm496_vm2 = vcmp.eq.s32.totalorder %v474_v21, 1 }
 0x1a5   : > { %v936_v25 = vpop.f32.mrf.mxu2  ;;  %2066 = vmatmul.msk.bf16.gmra.mxu3 %vm605_vm9, %v1438_v52  ;;  %v1334_v9 = vunpack.c.l.b16 %v539_v29  ;;  %v1439_v54 = vrot.slane %v2676_v49, 1  ;;  %v1561_v52 = vor.u32 %v1560_v17, %v1559_v11  ;;  %vm2777_vm4 = vmpackc.low %vm496_vm2, %vm496_vm2  ;;  %v2787_v6 = vor.u32 %v1230_v45, %v1228_v32 }
 0x1a6   : > { %2048 = vmatmul.msk.bf16.gmra.mxu1 %vm605_vm9, %v2712_v38  ;;  %2074 = vmatmul.msk.bf16.gmra.mxu0 %vm605_vm9, %v1558_v16  ;;  %v962_v19 = vadd.f32 %v934_v43, %v821_v61  ;;  %v1563_v21 = vrot.slane %v1230_v45, 1 }
 0x1a7   : > { %v2773_v34 = vpack.c.b16 %v1334_v9, %v2765_v5  ;;  %v1440_v61 = vsel %vm1427_vm5, %v1437_v40, %v1439_v54  ;;  %v1562_v13 = vsel %vm1539_vm10, %v1557_v10, %v1561_v52 }
 0x1a8   : > { %v1034_v12 = vpop.f32.mrf.mxu3 }
 0x1a9   : > { %v1062_v35 = vadd.f32 %v1034_v12, %v962_v19  ;;  %v1339_v2 = vshll.u32 %v2773_v34, 16  ;;  %v1441_v11 = vrot.slane %v2773_v34, 1 }
 0x1aa   : > { %2058 = vmatmul.msk.bf16.gmra.mxu2 %vm605_vm9, %v2761_v37 }
 0x1ab   : > { %v822_v15 = vpop.f32.mrf.mxu1  ;;  %v1133_v38 = vpop.f32.mrf.mxu0  ;;  %v1341_v62 = vrot.slane %v1339_v2, 1 }
 0x1ac   : > { %v823_v47 = vadd.f32 %v822_v15, %v2628_v26  ;;  %v2768_v43 = vadd.f32 %v1133_v38, %v1061_v30  ;;  %v364_v26 = vld [vmem:[#allocation2 + $0x54] sm:$0xf] }
 0x1ad   : > { %v939_v39 = vpop.f32.mrf.mxu2  ;;  %v540_v19 = vsel %vm2777_vm4, %v364_v26, 0  ;;  %v1342_v29 = vsel %vm1177_vm6, %v2787_v6, %v1341_v62 }
 0x1ae   : > { %v963_v48 = vadd.f32 %v936_v25, %v823_v47  ;;  %v1335_v12 = vunpack.c.l.b16 %v540_v19  ;;  %v1564_v47 = vrot.slane %v1226_v53, 2 }
 0x1b0   : > { %v1036_v14 = vpop.f32.mrf.mxu3  ;;  %v2798_v38 = vpack.c.b16 %v1335_v12, %v1335_v12  ;;  %v1565_v26 = vor.u32 %v1564_v47, %v1563_v21 }
 0x1b1   : > { %v1063_v28 = vadd.f32 %v1036_v14, %v963_v48 }
 0x1b2   : > { %v1347_v48 = vshll.u32 %v2798_v38, 16 }
 0x1b3   : > { %v825_v59 = vpop.f32.mrf.mxu1  ;;  %v1136_v8 = vpop.f32.mrf.mxu0 }
 0x1b4   : > { %v826_v25 = vadd.f32 %v825_v59, %v2641_v50  ;;  %v2784_v44 = vadd.f32 %v1136_v8, %v1062_v35  ;;  %v1442_v8 = vsel %vm1427_vm5, %v1439_v54, %v1441_v11  ;;  %v1349_v53 = vrot.slane %v1347_v48, 1 }
 0x1b5   : > { %v941_v16 = vpop.f32.mrf.mxu2  ;;  %2067 = vmatmul.msk.bf16.gmra.mxu3 %vm605_vm9, %v1440_v61  ;;  %v1566_v61 = vsel %vm1539_vm10, %v1561_v52, %v1565_v26 }
 0x1b6   : > { %2049 = vmatmul.msk.bf16.gmra.mxu1 %vm605_vm9, %v2733_v42  ;;  %2075 = vmatmul.msk.bf16.gmra.mxu0 %vm605_vm9, %v1562_v13  ;;  %v964_v40 = vadd.f32 %v939_v39, %v826_v25 }
 0x1b8   : > { %v1039_v50 = vpop.f32.mrf.mxu3 }
 0x1b9   : > { %v1064_v35 = vadd.f32 %v1039_v50, %v964_v40 }
 0x1ba   : > { %2059 = vmatmul.msk.bf16.gmra.mxu2 %vm605_vm9, %v1342_v29 }
 0x1bb   : > { %v827_v32 = vpop.f32.mrf.mxu1  ;;  %v1138_v15 = vpop.f32.mrf.mxu0 }
 0x1bc   : > { %v828_v10 = vadd.f32 %v827_v32, %v2652_v36  ;;  %v2801_v9 = vadd.f32 %v1138_v15, %v1063_v28  ;;  %v1343_v36 = vshrl.u32 %v2773_v34, 16  ;;  %v1443_v32 = vrot.slane %v2798_v38, 1 }
 0x1bd   : > { %v944_v42 = vpop.f32.mrf.mxu2 }
 0x1be   : > { %v965_v39 = vadd.f32 %v941_v16, %v828_v10  ;;  %v1345_v16 = vor.u32 %v1343_v36, %v1341_v62  ;;  %v1567_v12 = vrot.slane %v1343_v36, 1 }
 0x1c0   : > { %v1041_v17 = vpop.f32.mrf.mxu3  ;;  %v1350_v34 = vsel %vm1177_vm6, %v1345_v16, %v1349_v53 }
 0x1c1   : > { %v1065_v14 = vadd.f32 %v1041_v17, %v965_v39 }
 0x1c3   : > { %v830_v30 = vpop.f32.mrf.mxu1  ;;  %v1141_v59 = vpop.f32.mrf.mxu0 }
 0x1c4   : > { %v831_v28 = vadd.f32 %v830_v30, %v2634_v41  ;;  %v2810_v45 = vadd.f32 %v1141_v59, %v1064_v35  ;;  %v1176_v41 = vpack.c.b16 %v2765_v5, %v2765_v5  ;;  %v1568_v35 = vrot.slane %v1339_v2, 2 }
 0x1c5   : > { %v946_v49 = vpop.f32.mrf.mxu2  ;;  %2068 = vmatmul.msk.bf16.gmra.mxu3 %vm605_vm9, %v1442_v8  ;;  %v1444_v5 = vsel %vm1427_vm5, %v1441_v11, %v1443_v32  ;;  %v1571_v11 = vshrl.u32 %v2798_v38, 16 }
 0x1c6   : > { %2050 = vmatmul.msk.bf16.gmra.mxu1 %vm605_vm9, %v2761_v37  ;;  %2076 = vmatmul.msk.bf16.gmra.mxu0 %vm605_vm9, %v1566_v61  ;;  %v966_v25 = vadd.f32 %v944_v42, %v831_v28  ;;  %v1234_v62 = vshll.u32 %v1176_v41, 16  ;;  %v1569_v42 = vor.u32 %v1568_v35, %v1567_v12 }
 0x1c8   : > { %v1044_v54 = vpop.f32.mrf.mxu3  ;;  %v1236_v21 = vrot.slane %v1234_v62, 1  ;;  %v1570_v30 = vsel %vm1539_vm10, %v1565_v26, %v1569_v42 }
 0x1c9   : > { %v1066_v19 = vadd.f32 %v1044_v54, %v966_v25  ;;  %v1573_v25 = vrot.slane %v1571_v11, 1 }
 0x1ca   : > { %2060 = vmatmul.msk.bf16.gmra.mxu2 %vm605_vm9, %v1350_v34  ;;  %v1237_v2 = vsel %vm1177_vm6, %v2787_v6, %v1236_v21  ;;  %v1574_v6 = vrot.slane %v1347_v48, 2  ;;  %vm1705_vm6 = vcmask 31744  }
 0x1cb   : > { %v832_v13 = vpop.f32.mrf.mxu1  ;;  %v1143_v40 = vpop.f32.mrf.mxu0 }
 0x1cc   : > { %v833_v52 = vadd.f32 %v832_v13, %v2646_v27  ;;  %v2822_v50 = vadd.f32 %v1143_v40, %v1065_v14 }
 0x1cd   : > { %v949_v37 = vpop.f32.mrf.mxu2 }
 0x1ce   : > { %v967_v29 = vadd.f32 %v946_v49, %v833_v52 }
 0x1d0   : > { %v1046_v15 = vpop.f32.mrf.mxu3 }
 0x1d1   : > { %v1067_v10 = vadd.f32 %v1046_v15, %v967_v29  ;;  %v2849_v15 = vld [vmem:[%s2988_s3] ss:$0 sm:$0xff] }
 0x1d3   : > { %v835_v47 = vpop.f32.mrf.mxu1  ;;  %v1146_v39 = vpop.f32.mrf.mxu0 }
 0x1d4   : > { %v836_v17 = vadd.f32 %v835_v47, %v2660_v63  ;;  %v2827_v27 = vadd.f32 %v1146_v39, %v1066_v19  ;;  %v1575_v19 = vor.u32 %v1574_v6, %v1573_v25 }
 0x1d5   : > { %v951_v14 = vpop.f32.mrf.mxu2  ;;  %2069 = vmatmul.msk.bf16.gmra.mxu3 %vm605_vm9, %v1444_v5 }
 0x1d6   : > { %2051 = vmatmul.msk.bf16.gmra.mxu1 %vm605_vm9, %v1237_v2  ;;  %2077 = vmatmul.msk.bf16.gmra.mxu0 %vm605_vm9, %v1570_v30  ;;  %v968_v59 = vadd.f32 %v949_v37, %v836_v17  ;;  %v1576_v38 = vsel %vm1539_vm10, %v1569_v42, %v1575_v19 }
 0x1d8   : > { %v1049_v8 = vpop.f32.mrf.mxu3 }
 0x1d9   : > { %v1068_v36 = vadd.f32 %v1049_v8, %v968_v59 }
 0x1db   : > { %v837_v63 = vpop.f32.mrf.mxu1  ;;  %v1148_v28 = vpop.f32.mrf.mxu0 }
 0x1dc   : > { %v838_v49 = vadd.f32 %v837_v63, %v2668_v58  ;;  %v2837_v53 = vadd.f32 %v1148_v28, %v1067_v10 }
 0x1dd   : > { %v1369_v61 = vpop.f32.mrf.mxu2 }
 0x1de   : > { %v969_v16 = vadd.f32 %v951_v14, %v838_v49 }
 0x1e0   : > { %v1051_v26 = vpop.f32.mrf.mxu3 }
 0x1e1   : > { %v1069_v54 = vadd.f32 %v1051_v26, %v969_v16 }
 0x1e3   : > { %v1151_v34 = vpop.f32.mrf.mxu0  ;;  %v1274_v41 = vpop.f32.mrf.mxu1 }
 0x1e4   : > { %v2839_v13 = vadd.f32 %v1151_v34, %v1068_v36  ;;  %v1314_v12 = vadd.f32 %v1274_v41, %v2690_v7 }
 0x1e5   : > { %v1371_v40 = vpop.f32.mrf.mxu2 }
 0x1e6   : > { %2078 = vmatmul.msk.bf16.gmra.mxu0 %vm605_vm9, %v1576_v38  ;;  %v1409_v62 = vadd.f32 %v1369_v61, %v1314_v12  ;;  %vm1814_vm9 = vcmask 27648  }
 0x1e8   : > { %v1481_v52 = vpop.f32.mrf.mxu3 }
 0x1e9   : > { %v1521_v32 = vadd.f32 %v1481_v52, %v1409_v62 }
 0x1eb   : > { %v1153_v58 = vpop.f32.mrf.mxu0  ;;  %v1276_v37 = vpop.f32.mrf.mxu1 }
 0x1ec   : > { %v2844_v35 = vadd.f32 %v1153_v58, %v1069_v54  ;;  %v1315_v21 = vadd.f32 %v1276_v37, %v2698_v0 }
 0x1ed   : > { %v1374_v48 = vpop.f32.mrf.mxu2 }
 0x1ee   : > { %v1410_v17 = vadd.f32 %v1371_v40, %v1315_v21 }
 0x1f0   : > { %v1483_v29 = vpop.f32.mrf.mxu3 }
 0x1f1   : > { %v1522_v2 = vadd.f32 %v1483_v29, %v1410_v17 }
 0x1f3   : > { %v1279_v10 = vpop.f32.mrf.mxu1  ;;  %v1613_v42 = vpop.f32.mrf.mxu0 }
 0x1f4   : > { %v1653_v47 = vadd.f32 %v1613_v42, %v1521_v32  ;;  %v1316_v8 = vadd.f32 %v1279_v10, %v2704_v31 }
 0x1f5   : > { %v1376_v39 = vpop.f32.mrf.mxu2 }
 0x1f6   : > { %v1673_v7 = vadd.f32 %v2849_v15, %v1653_v47  ;;  %v1411_v61 = vadd.f32 %v1374_v48, %v1316_v8 }
 0x1f8   : > { %v1486_v5 = vpop.f32.mrf.mxu3  ;;  %v1798_v14 = vpack.c.bf16 %v1673_v7, %v1673_v7  ;;  %v1689_v36 = vsel %vm478_vm8, %v1673_v7, 0.0 }
 0x1f9   : > { %v1744_v28 = vmul.f32 %v1689_v36, %v1689_v36  ;;  %v1706_v16 = vsel %vm1705_vm6, %v1689_v36, 0.0  ;;  %v1523_v51 = vadd.f32 %v1486_v5, %v1411_v61 }
 0x1fa   : > { %1815 = vst.msk [vmem:[%s2173_s12] sm:$0xf] %vm1814_vm9, %v1798_v14 }
 0x1fb   : > { %v1281_v30 = vpop.f32.mrf.mxu1  ;;  %v1615_v59 = vpop.f32.mrf.mxu0  ;;  %v1760_v19 = vsel %vm1705_vm6, %v1744_v28, 0.0 }
 0x1fc   : > { %v1654_v0 = vadd.f32 %v1615_v59, %v1522_v2  ;;  %v1317_v60 = vadd.f32 %v1281_v30, %v2717_v33 }
 0x1fd   : > { %v1379_v11 = vpop.f32.mrf.mxu2 }
 0x1fe   : > { %v1674_v63 = vadd.f32 %v2849_v15, %v1654_v0  ;;  %v1412_v48 = vadd.f32 %v1376_v39, %v1317_v60 }
 0x200   : > { %v1488_v49 = vpop.f32.mrf.mxu3  ;;  %v1690_v25 = vsel %vm479_vm14, %v1674_v63, 0.0  ;;  %v1799_v6 = vpack.c.bf16 %v1674_v63, %v1674_v63  ;;  %vm3028_vm14 = vcmp.eq.s32.totalorder %v2301_v18, 1 }
 0x201   : > { %v1707_v31 = vsel %vm1705_vm6, %v1690_v25, 0.0  ;;  %v1745_v26 = vmul.f32 %v1690_v25, %v1690_v25  ;;  %v1524_v42 = vadd.f32 %v1488_v49, %v1412_v48 }
 0x202   : > { %v1708_v54 = vadd.f32 %v1707_v31, %v1706_v16  ;;  %1816 = vst.msk [vmem:[%s2173_s12 + $0x4] sm:$0xf] %vm1814_vm9, %v1799_v6 }
 0x203   : > { %v1761_v34 = vsel %vm1705_vm6, %v1745_v26, 0.0  ;;  %v1284_v41 = vpop.f32.mrf.mxu1  ;;  %v1618_v40 = vpop.f32.mrf.mxu0 }
 0x204   : > { %v1762_v38 = vadd.f32 %v1761_v34, %v1760_v19  ;;  %v1655_v52 = vadd.f32 %v1618_v40, %v1523_v51  ;;  %v1318_v5 = vadd.f32 %v1284_v41, %v2723_v55 }
 0x205   : > { %v1381_v58 = vpop.f32.mrf.mxu2 }
 0x206   : > { %v1675_v37 = vadd.f32 %v2849_v15, %v1655_v52  ;;  %v1413_v30 = vadd.f32 %v1379_v11, %v1318_v5 }
 0x208   : > { %v1491_v12 = vpop.f32.mrf.mxu3  ;;  %v1691_v29 = vsel %vm480_vm0, %v1675_v37, 0.0  ;;  %v1800_v62 = vpack.c.bf16 %v1675_v37, %v1675_v37  ;;  %vm3030_vm0 = vcmp.eq.s32.totalorder %v2245_v57, 1 }
 0x209   : > { %v1709_v32 = vsel %vm1705_vm6, %v1691_v29, 0.0  ;;  %v1746_v10 = vmul.f32 %v1691_v29, %v1691_v29  ;;  %v1525_v63 = vadd.f32 %v1491_v12, %v1413_v30 }
 0x20a   : > { %v1710_v21 = vadd.f32 %v1709_v32, %v1708_v54  ;;  %1817 = vst.msk [vmem:[%s2173_s12 + $0x8] sm:$0xf] %vm1814_vm9, %v1800_v62 }
 0x20b   : > { %v1763_v33 = vsel %vm1705_vm6, %v1746_v10, 0.0  ;;  %v1286_v47 = vpop.f32.mrf.mxu1  ;;  %v1620_v7 = vpop.f32.mrf.mxu0 }
 0x20c   : > { %v1764_v17 = vadd.f32 %v1763_v33, %v1762_v38  ;;  %v1656_v39 = vadd.f32 %v1620_v7, %v1524_v42  ;;  %v1319_v25 = vadd.f32 %v1286_v47, %v2738_v23 }
 0x20d   : > { %v1384_v14 = vpop.f32.mrf.mxu2 }
 0x20e   : > { %v1676_v24 = vadd.f32 %v2849_v15, %v1656_v39  ;;  %v1414_v26 = vadd.f32 %v1381_v58, %v1319_v25 }
 0x210   : > { %v1493_v2 = vpop.f32.mrf.mxu3  ;;  %v1692_v59 = vsel %vm481_vm15, %v1676_v24, 0.0  ;;  %v1801_v8 = vpack.c.bf16 %v1676_v24, %v1676_v24  ;;  %vm3029_vm15 = vcmp.eq.s32.totalorder %v2243_v56, 1 }
 0x211   : > { %v1711_v36 = vsel %vm1705_vm6, %v1692_v59, 0.0  ;;  %v1747_v0 = vmul.f32 %v1692_v59, %v1692_v59  ;;  %v1526_v41 = vadd.f32 %v1493_v2, %v1414_v26 }
 0x212   : > { %v1712_v28 = vadd.f32 %v1711_v36, %v1710_v21  ;;  %1818 = vst.msk [vmem:[%s2173_s12 + $0xc] sm:$0xf] %vm1814_vm9, %v1801_v8 }
 0x213   : > { %v1765_v55 = vsel %vm1705_vm6, %v1747_v0, 0.0  ;;  %v1289_v49 = vpop.f32.mrf.mxu1  ;;  %v1623_v61 = vpop.f32.mrf.mxu0 }
 0x214   : > { %v1766_v6 = vadd.f32 %v1765_v55, %v1764_v17  ;;  %v1657_v11 = vadd.f32 %v1623_v61, %v1525_v63  ;;  %v1320_v52 = vadd.f32 %v1289_v49, %v2748_v46 }
 0x215   : > { %v1386_v16 = vpop.f32.mrf.mxu2 }
 0x216   : > { %v1677_v22 = vadd.f32 %v2849_v15, %v1657_v11  ;;  %v1415_v48 = vadd.f32 %v1384_v14, %v1320_v52 }
 0x218   : > { %v1496_v31 = vpop.f32.mrf.mxu3  ;;  %v1693_v51 = vsel %vm482_vm11, %v1677_v22, 0.0  ;;  %v1802_v54 = vpack.c.bf16 %v1677_v22, %v1677_v22  ;;  %vm3026_vm11 = vcmp.eq.s32.totalorder %v2303_v20, 1 }
 0x219   : > { %v1713_v19 = vsel %vm1705_vm6, %v1693_v51, 0.0  ;;  %v1748_v34 = vmul.f32 %v1693_v51, %v1693_v51  ;;  %v1527_v21 = vadd.f32 %v1496_v31, %v1415_v48 }
 0x21a   : > { %v1714_v40 = vadd.f32 %v1713_v19, %v1712_v28  ;;  %1819 = vst.msk [vmem:[%s2173_s12 + $0x10] sm:$0xf] %vm1814_vm9, %v1802_v54 }
 0x21b   : > { %v1767_v23 = vsel %vm1705_vm6, %v1748_v34, 0.0  ;;  %v1291_v60 = vpop.f32.mrf.mxu1  ;;  %v1625_v38 = vpop.f32.mrf.mxu0 }
 0x21c   : > { %v1768_v37 = vadd.f32 %v1767_v23, %v1766_v6  ;;  %v1658_v58 = vadd.f32 %v1625_v38, %v1526_v41  ;;  %v1321_v5 = vadd.f32 %v1291_v60, %v2768_v43 }
 0x21d   : > { %v1389_v32 = vpop.f32.mrf.mxu2 }
 0x21e   : > { %v1678_v1 = vadd.f32 %v2849_v15, %v1658_v58  ;;  %v1416_v24 = vadd.f32 %v1386_v16, %v1321_v5 }
 0x220   : > { %v1498_v12 = vpop.f32.mrf.mxu3  ;;  %v1694_v29 = vsel %vm483_vm13, %v1678_v1, 0.0  ;;  %v1803_v62 = vpack.c.bf16 %v1678_v1, %v1678_v1  ;;  %vm3027_vm13 = vcmp.eq.s32.totalorder %v2271_v3, 1 }
 0x221   : > { %v1715_v10 = vsel %vm1705_vm6, %v1694_v29, 0.0  ;;  %v1749_v42 = vmul.f32 %v1694_v29, %v1694_v29  ;;  %v1528_v36 = vadd.f32 %v1498_v12, %v1416_v24 }
 0x222   : > { %v1716_v33 = vadd.f32 %v1715_v10, %v1714_v40  ;;  %1820 = vst.msk [vmem:[%s2173_s12 + $0x14] sm:$0xf] %vm1814_vm9, %v1803_v62 }
 0x223   : > { %v1769_v46 = vsel %vm1705_vm6, %v1749_v42, 0.0  ;;  %v1294_v47 = vpop.f32.mrf.mxu1  ;;  %v1628_v7 = vpop.f32.mrf.mxu0 }
 0x224   : > { %v1770_v17 = vadd.f32 %v1769_v46, %v1768_v37  ;;  %v1659_v39 = vadd.f32 %v1628_v7, %v1527_v21  ;;  %v1322_v49 = vadd.f32 %v1294_v47, %v2784_v44 }
 0x225   : > { %v1391_v63 = vpop.f32.mrf.mxu2 }
 0x226   : > { %v1679_v4 = vadd.f32 %v2849_v15, %v1659_v39  ;;  %v1417_v11 = vadd.f32 %v1389_v32, %v1322_v49 }
 0x228   : > { %v1501_v14 = vpop.f32.mrf.mxu3  ;;  %v1695_v2 = vsel %vm3026_vm11, %v1679_v4, 0.0  ;;  %v1804_v30 = vpack.c.bf16 %v1679_v4, %v1679_v4 }
 0x229   : > { %v1717_v59 = vsel %vm1705_vm6, %v1695_v2, 0.0  ;;  %v1750_v8 = vmul.f32 %v1695_v2, %v1695_v2  ;;  %v1529_v51 = vadd.f32 %v1501_v14, %v1417_v11 }
 0x22a   : > { %v1718_v0 = vadd.f32 %v1717_v59, %v1716_v33  ;;  %1821 = vst.msk [vmem:[%s2173_s12 + $0x18] sm:$0xf] %vm1814_vm9, %v1804_v30 }
 0x22b   : > { %v1771_v43 = vsel %vm1705_vm6, %v1750_v8, 0.0  ;;  %v1296_v28 = vpop.f32.mrf.mxu1  ;;  %v1630_v55 = vpop.f32.mrf.mxu0 }
 0x22c   : > { %v1772_v61 = vadd.f32 %v1771_v43, %v1770_v17  ;;  %v1660_v25 = vadd.f32 %v1630_v55, %v1528_v36  ;;  %v1323_v41 = vadd.f32 %v1296_v28, %v2801_v9 }
 0x22d   : > { %v1394_v23 = vpop.f32.mrf.mxu2 }
 0x22e   : > { %v1680_v20 = vadd.f32 %v2849_v15, %v1660_v25  ;;  %v1418_v52 = vadd.f32 %v1391_v63, %v1323_v41 }
 0x230   : > { %v1503_v6 = vpop.f32.mrf.mxu3  ;;  %v1696_v22 = vsel %vm3027_vm13, %v1680_v20, 0.0  ;;  %v1805_v16 = vpack.c.bf16 %v1680_v20, %v1680_v20 }
 0x231   : > { %v1719_v31 = vsel %vm1705_vm6, %v1696_v22, 0.0  ;;  %v1751_v26 = vmul.f32 %v1696_v22, %v1696_v22  ;;  %v1530_v48 = vadd.f32 %v1503_v6, %v1418_v52 }
 0x232   : > { %v1720_v54 = vadd.f32 %v1719_v31, %v1718_v0  ;;  %1822 = vst.msk [vmem:[%s2173_s12 + $0x1c] sm:$0xf] %vm1814_vm9, %v1805_v16 }
 0x233   : > { %v1773_v19 = vsel %vm1705_vm6, %v1751_v26, 0.0  ;;  %v1299_v44 = vpop.f32.mrf.mxu1  ;;  %v1633_v34 = vpop.f32.mrf.mxu0  ;;  %v3031_v26 = vld [vmem:[#allocation10_spill] sm:$0xff] }
 0x234   : > { %v1774_v40 = vadd.f32 %v1773_v19, %v1772_v61  ;;  %v1661_v60 = vadd.f32 %v1633_v34, %v1529_v51  ;;  %v1324_v10 = vadd.f32 %v1299_v44, %v2810_v45  ;;  %vm3032_vm8 = vcmp.eq.s32.totalorder %v3031_v26, 1 }
 0x235   : > { %v1396_v33 = vpop.f32.mrf.mxu2 }
 0x236   : > { %v1681_v3 = vadd.f32 %v2849_v15, %v1661_v60  ;;  %v1419_v47 = vadd.f32 %v1394_v23, %v1324_v10 }
 0x238   : > { %v1506_v38 = vpop.f32.mrf.mxu3  ;;  %v1697_v37 = vsel %vm3028_vm14, %v1681_v3, 0.0  ;;  %v1806_v58 = vpack.c.bf16 %v1681_v3, %v1681_v3 }
 0x239   : > { %v1721_v1 = vsel %vm1705_vm6, %v1697_v37, 0.0  ;;  %v1752_v12 = vmul.f32 %v1697_v37, %v1697_v37  ;;  %v1531_v4 = vadd.f32 %v1506_v38, %v1419_v47 }
 0x23a   : > { %v1722_v29 = vadd.f32 %v1721_v1, %v1720_v54  ;;  %1823 = vst.msk [vmem:[%s2173_s12 + $0x20] sm:$0xf] %vm1814_vm9, %v1806_v58 }
 0x23b   : > { %v1775_v9 = vsel %vm1705_vm6, %v1752_v12, 0.0  ;;  %v1301_v62 = vpop.f32.mrf.mxu1  ;;  %v1635_v32 = vpop.f32.mrf.mxu0  ;;  %v3033_v12 = vld [vmem:[#allocation9_spill] sm:$0xff] }
 0x23c   : > { %v1776_v42 = vadd.f32 %v1775_v9, %v1774_v40  ;;  %v1662_v21 = vadd.f32 %v1635_v32, %v1530_v48  ;;  %v1325_v30 = vadd.f32 %v1301_v62, %v2822_v50  ;;  %vm3034_vm5 = vcmp.eq.s32.totalorder %v3033_v12, 1 }
 0x23d   : > { %v1399_v36 = vpop.f32.mrf.mxu2 }
 0x23e   : > { %v1682_v18 = vadd.f32 %v2849_v15, %v1662_v21  ;;  %v1420_v0 = vadd.f32 %v1396_v33, %v1325_v30 }
 0x240   : > { %v1508_v46 = vpop.f32.mrf.mxu3  ;;  %v1698_v7 = vsel %vm3029_vm15, %v1682_v18, 0.0  ;;  %v1807_v5 = vpack.c.bf16 %v1682_v18, %v1682_v18 }
 0x241   : > { %v1723_v17 = vsel %vm1705_vm6, %v1698_v7, 0.0  ;;  %v1753_v39 = vmul.f32 %v1698_v7, %v1698_v7  ;;  %v1532_v61 = vadd.f32 %v1508_v46, %v1420_v0 }
 0x242   : > { %v1724_v14 = vadd.f32 %v1723_v17, %v1722_v29  ;;  %1824 = vst.msk [vmem:[%s2173_s12 + $0x24] sm:$0xf] %vm1814_vm9, %v1807_v5 }
 0x243   : > { %v1777_v45 = vsel %vm1705_vm6, %v1753_v39, 0.0  ;;  %v1304_v24 = vpop.f32.mrf.mxu1  ;;  %v1638_v2 = vpop.f32.mrf.mxu0 }
 0x244   : > { %v1778_v59 = vadd.f32 %v1777_v45, %v1776_v42  ;;  %v1663_v8 = vadd.f32 %v1638_v2, %v1531_v4  ;;  %v1326_v6 = vadd.f32 %v1304_v24, %v2827_v27 }
 0x245   : > { %v1401_v34 = vpop.f32.mrf.mxu2 }
 0x246   : > { %v1683_v56 = vadd.f32 %v2849_v15, %v1663_v8  ;;  %v1421_v31 = vadd.f32 %v1399_v36, %v1326_v6 }
 0x248   : > { %v1699_v63 = vsel %vm3030_vm0, %v1683_v56, 0.0  ;;  %v1808_v43 = vpack.c.bf16 %v1683_v56, %v1683_v56  ;;  %v1511_v49 = vpop.f32.mrf.mxu3 }
 0x249   : > { %v1725_v28 = vsel %vm1705_vm6, %v1699_v63, 0.0  ;;  %v1754_v55 = vmul.f32 %v1699_v63, %v1699_v63  ;;  %v1533_v41 = vadd.f32 %v1511_v49, %v1421_v31  ;;  %v3037_v31 = vld [vmem:[#allocation13_spill] sm:$0xff] }
 0x24a   : > { %v1726_v25 = vadd.f32 %v1725_v28, %v1724_v14  ;;  %1825 = vst.msk [vmem:[%s2173_s12 + $0x28] sm:$0xf] %vm1814_vm9, %v1808_v43 }
 0x24b   : > { %v1779_v50 = vsel %vm1705_vm6, %v1754_v55, 0.0  ;;  %v1640_v20 = vpop.f32.mrf.mxu0  ;;  %v1306_v16 = vpop.f32.mrf.mxu1 }
 0x24c   : > { %v1780_v11 = vadd.f32 %v1779_v50, %v1778_v59  ;;  %v1664_v22 = vadd.f32 %v1640_v20, %v1532_v61  ;;  %v1327_v3 = vadd.f32 %v1306_v16, %v2837_v53 }
 0x24d   : > { %v1404_v46 = vpop.f32.mrf.mxu2 }
 0x24e   : > { %v1684_v57 = vadd.f32 %v2849_v15, %v1664_v22  ;;  %v1422_v1 = vadd.f32 %v1401_v34, %v1327_v3 }
 0x250   : > { %v1700_v51 = vsel %vm3032_vm8, %v1684_v57, 0.0  ;;  %v1809_v54 = vpack.c.bf16 %v1684_v57, %v1684_v57  ;;  %v1513_v23 = vpop.f32.mrf.mxu3 }
 0x251   : > { %v1727_v19 = vsel %vm1705_vm6, %v1700_v51, 0.0  ;;  %v1755_v44 = vmul.f32 %v1700_v51, %v1700_v51  ;;  %v1534_v32 = vadd.f32 %v1513_v23, %v1422_v1 }
 0x252   : > { %v1728_v40 = vadd.f32 %v1727_v19, %v1726_v25  ;;  %1826 = vst.msk [vmem:[%s2173_s12 + $0x2c] sm:$0xf] %vm1814_vm9, %v1809_v54 }
 0x253   : > { %v1781_v27 = vsel %vm1705_vm6, %v1755_v44, 0.0  ;;  %v1643_v60 = vpop.f32.mrf.mxu0  ;;  %v1309_v58 = vpop.f32.mrf.mxu1 }
 0x254   : > { %v1782_v38 = vadd.f32 %v1781_v27, %v1780_v11  ;;  %v1665_v52 = vadd.f32 %v1643_v60, %v1533_v41  ;;  %v1328_v21 = vadd.f32 %v1309_v58, %v2839_v13 }
 0x255   : > { %v1406_v63 = vpop.f32.mrf.mxu2 }
 0x256   : > { %v1685_v37 = vadd.f32 %v2849_v15, %v1665_v52  ;;  %v1423_v5 = vadd.f32 %v1404_v46, %v1328_v21 }
 0x258   : > { %v1701_v48 = vsel %vm3034_vm5, %v1685_v37, 0.0  ;;  %v1810_v29 = vpack.c.bf16 %v1685_v37, %v1685_v37  ;;  %v1516_v47 = vpop.f32.mrf.mxu3 }
 0x259   : > { %v1729_v9 = vsel %vm1705_vm6, %v1701_v48, 0.0  ;;  %v1756_v62 = vmul.f32 %v1701_v48, %v1701_v48  ;;  %v1535_v2 = vadd.f32 %v1516_v47, %v1423_v5 }
 0x25a   : > { %v1730_v10 = vadd.f32 %v1729_v9, %v1728_v40  ;;  %1827 = vst.msk [vmem:[%s2173_s12 + $0x30] sm:$0xf] %vm1814_vm9, %v1810_v29 }
 0x25b   : > { %v1783_v42 = vsel %vm1705_vm6, %v1756_v62, 0.0  ;;  %v1645_v53 = vpop.f32.mrf.mxu0  ;;  %v1311_v14 = vpop.f32.mrf.mxu1 }
 0x25c   : > { %v1784_v33 = vadd.f32 %v1783_v42, %v1782_v38  ;;  %v1666_v18 = vadd.f32 %v1645_v53, %v1534_v32  ;;  %v1329_v8 = vadd.f32 %v1311_v14, %v2844_v35 }
 0x25e   : > { %v1686_v7 = vadd.f32 %v2849_v15, %v1666_v18  ;;  %v1424_v28 = vadd.f32 %v1406_v63, %v1329_v8 }
 0x260   : > { %v1702_v39 = vsel %vm491_vm1, %v1686_v7, 0.0  ;;  %v1811_v4 = vpack.c.bf16 %v1686_v7, %v1686_v7  ;;  %v1518_v43 = vpop.f32.mrf.mxu3  ;;  %vm3038_vm1 = vcmp.eq.s32.totalorder %v3037_v31, 1 }
 0x261   : > { %v1731_v45 = vsel %vm1705_vm6, %v1702_v39, 0.0  ;;  %v1757_v24 = vmul.f32 %v1702_v39, %v1702_v39  ;;  %v1536_v20 = vadd.f32 %v1518_v43, %v1424_v28 }
 0x262   : > { %v1732_v30 = vadd.f32 %v1731_v45, %v1730_v10  ;;  %1828 = vst.msk [vmem:[%s2173_s12 + $0x34] sm:$0xf] %vm1814_vm9, %v1811_v4 }
 0x263   : > { %v1785_v13 = vsel %vm1705_vm6, %v1757_v24, 0.0  ;;  %v1648_v59 = vpop.f32.mrf.mxu0 }
 0x264   : > { %v1786_v56 = vadd.f32 %v1785_v13, %v1784_v33  ;;  %v1667_v36 = vadd.f32 %v1648_v59, %v1535_v2 }
 0x266   : > { %v1687_v0 = vadd.f32 %v2849_v15, %v1667_v36 }
 0x268   : > { %v1703_v49 = vsel %vm492_vm12, %v1687_v0, 0.0  ;;  %v1812_v61 = vpack.c.bf16 %v1687_v0, %v1687_v0 }
 0x269   : > { %v1733_v25 = vsel %vm1705_vm6, %v1703_v49, 0.0  ;;  %v1758_v50 = vmul.f32 %v1703_v49, %v1703_v49 }
 0x26a   : > { %v1734_v6 = vadd.f32 %v1733_v25, %v1732_v30  ;;  %1829 = vst.msk [vmem:[%s2173_s12 + $0x38] sm:$0xf] %vm1814_vm9, %v1812_v61 }
 0x26b   : > { %v1787_v35 = vsel %vm1705_vm6, %v1758_v50, 0.0  ;;  %v1650_v11 = vpop.f32.mrf.mxu0 }
 0x26c   : > { %v1788_v22 = vadd.f32 %v1787_v35, %v1786_v56  ;;  %v1668_v16 = vadd.f32 %v1650_v11, %v1536_v20 }
 0x26e   : > { %v1688_v57 = vadd.f32 %v2849_v15, %v1668_v16 }
 0x270   : > { %v1704_v26 = vsel %vm3038_vm1, %v1688_v57, 0.0  ;;  %v1813_v51 = vpack.c.bf16 %v1688_v57, %v1688_v57 }
 0x271   : > { %v1735_v54 = vsel %vm1705_vm6, %v1704_v26, 0.0  ;;  %v1759_v19 = vmul.f32 %v1704_v26, %v1704_v26 }
 0x272   : > { %v1736_v44 = vadd.f32 %v1735_v54, %v1734_v6  ;;  %1830 = vst.msk [vmem:[%s2173_s12 + $0x3c] sm:$0xf] %vm1814_vm9, %v1813_v51 }
 0x273   : > { %v1789_v34 = vsel %vm1705_vm6, %v1759_v19, 0.0 }
 0x274   : > { %v1737_v41 = vrot.slane %v1736_v44, 4  ;;  %v1790_v40 = vadd.f32 %v1789_v34, %v1788_v22 }
 0x276   : > { %v1738_v27 = vadd.f32 %v1737_v41, %v1736_v44  ;;  %v1791_v23 = vrot.slane %v1790_v40, 4 }
 0x278   : > { %v1739_v60 = vrot.slane %v1738_v27, 2  ;;  %v1792_v15 = vadd.f32 %v1791_v23, %v1790_v40 }
 0x27a   : > { %v1740_v3 = vadd.f32 %v1739_v60, %v1738_v27  ;;  %v1793_v38 = vrot.slane %v1792_v15, 2 }
 0x27c   : > { %v1741_v52 = vrot.slane %v1740_v3, 1  ;;  %v1794_v37 = vadd.f32 %v1793_v38, %v1792_v15 }
 0x27e   : > { %v1742_v58 = vadd.f32 %v1741_v52, %v1740_v3  ;;  %v1795_v1 = vrot.slane %v1794_v37, 1 }
 0x280   : > { %1743 = vst.msk [vmem:[%s2168_s9] sm:$0xff] %vm1705_vm6, %v1742_v58  ;;  %v1796_v12 = vadd.f32 %v1795_v1, %v1794_v37 }
 0x282   : > { %1797 = vst.msk [vmem:[%s2178_s15] sm:$0xff] %vm1705_vm6, %v1796_v12 }
 0x283 PF: > { %s17_s21 = sadd.s32 1, %s2111_s21  }
 0x284   : > { %p14_p5 = scmp.ge.s32.totalorder %s17_s21, 8  }
 0x286   :  { %16 = sbr.rel (!%p14_p5) target bundleno = 1 (0x1), region = 137 }
 0x28b   :  { %1884 = vsyncmov [#allocation4] }
 0x28e   :  { %s1885_s12 = vpop.sfrf %1884 }
 0x28f   :  { %p2081_p6 = scmp.ne.s32.totalorder %s1885_s12, 0 }
 0x291   :  { %1889 = shalt.err (%p2081_p6)  }
 0x292   :  { %1891 = vsyncmov [#allocation4 + $0x1] }
 0x295   :  { %s1892_s22 = vpop.sfrf %1891 }
 0x296   :  { %p2082_p7 = scmp.ne.s32.totalorder %s1892_s22, 0 }
 0x298   :  { %1896 = shalt.err (%p2082_p7)  }

// kernel: up_block_forward.9
= control target key start
LH: loop header
LB: loop body
LE: loop exit
PB: predicated region body
PF: predicated region fallthrough
CT: control target
= control target key end

     0   :  { %s303_s12 = smov 0   ;;  %s326_s0 = inlined_call_operand.vmem [shape: bf16[32,128], index: 0, kind: input, shape index: {}]   ;;  %s327_s1 = inlined_call_operand.vmem [shape: f32[1,128], index: 1, kind: input, shape index: {}]   ;;  %s328_s2 = inlined_call_operand.vmem [shape: f32[1,128], index: 2, kind: input, shape index: {}]   ;;  %s329_s3 = inlined_call_operand.vmem [shape: f32[32,128], index: 3, kind: output, shape index: {}]  }
   0x1 LB: > { %s250_s13 = sadd.s32 4294967295, %s281_s12   ;;  %p254_p0 = scmp.ge.s32.totalorder %s281_s12, 1  ;;  %s281_s12 = sphi %s303_s12, %s13_s12  }
   0x2   : > { %p138_p1 = scmp.lt.s32.totalorder %s281_s12, 3 }
   0x4   : > { %p139_p2 = pnand %p254_p0, %p138_p1 }
   0x5   : > { %s255_s14 = sshll.u32 (!%p139_p2), %s250_s13, 1 }
   0x6   : > { %142 = sbr.rel (%p139_p2) target bundleno = 25 (0x19), region = 32  ;;  %p163_p3 = scmp.lt.s32.totalorder (!%p139_p2), %s255_s14, 3 }
   0xb   : > { %s331_s14 = smov (!%p163_p3, %s255_s14), 3  ;;  %v273_v0 = vld [vmem:[%s327_s1] ss:$0 sm:$0xff] }
   0xc   : > { %s256_s15 = sshll.u32 %s331_s14, 2  ;;  %v274_v4 = vld [vmem:[%s328_s2] ss:$0 sm:$0xff]  ;;  %s258_s23 = sshll.u32 %s331_s14, 3 }
   0xd   : > { %s166_s18 = scalar_lea.vmem %s326_s0, %s256_s15  ;;  %s172_s26 = scalar_lea.vmem %s329_s3, %s258_s23 }
   0xe   : > { %v262_v1 = vld [vmem:[%s166_s18] sm:$0xff]  }
   0xf   : > { %v263_v2 = vunpack.c.l.bf16 %v262_v1  ;;  %v264_v3 = vunpack.c.h.bf16 %v262_v1 }
  0x11   : > { %v182_v5 = vmul.f32 %v273_v0, %v263_v2  ;;  %v183_v6 = vmul.f32 %v273_v0, %v264_v3 }
  0x13   : > { %v188_v7 = vadd.f32 %v274_v4, %v182_v5  ;;  %v189_v8 = vadd.f32 %v274_v4, %v183_v6 }
  0x15   : > { %v190_v9 = vmax.f32 %v188_v7, 0.0  ;;  %v191_v10 = vmax.f32 %v189_v8, 0.0 }
  0x17   : > { %192 = vst [vmem:[%s172_s26] sm:$0xff] %v190_v9 }
  0x18   : > { %193 = vst [vmem:[%s172_s26 + $0x8] sm:$0xff] %v191_v10 }
  0x19 PF: > { %s13_s12 = sadd.s32 1, %s281_s12  }
  0x1a   : > { %p10_p4 = scmp.ge.s32.totalorder %s13_s12, 4  }
  0x1c   :  { %12 = sbr.rel (!%p10_p4) target bundleno = 1 (0x1), region = 62 }

// kernel: up_block_forward.8
= control target key start
LH: loop header
LB: loop body
LE: loop exit
PB: predicated region body
PF: predicated region fallthrough
CT: control target
= control target key end

     0   :  { %s2148_s21 = smov 0   ;;  %s2984_s0 = inlined_call_operand.vmem [shape: bf16[1024,4], index: 0, kind: input, shape index: {}]   ;;  %s2985_s1 = inlined_call_operand.vmem [shape: f32[1024,1], index: 1, kind: input, shape index: {}]   ;;  %s2986_s2 = inlined_call_operand.vmem [shape: bf16[3,3,4,4], index: 2, kind: input, shape index: {}]   ;;  %s2987_s3 = inlined_call_operand.vmem [shape: f32[1,4], index: 3, kind: input, shape index: {}]   ;;  %s2988_s4 = inlined_call_operand.vmem [shape: bf16[1024,4], index: 4, kind: output, shape index: {0}]   ;;  %s2989_s5 = inlined_call_operand.vmem [shape: f32[48,4], index: 5, kind: output, shape index: {1}]   ;;  %s2990_s6 = inlined_call_operand.vmem [shape: f32[48,4], index: 6, kind: output, shape index: {2}]  }
   0x1 LB: > { %s2154_s22 = sadd.s32 4294967295, %s2110_s21   ;;  %p1968_p0 = scmp.ge.s32.totalorder %s2110_s21, 1  ;;  %s2110_s21 = sphi %s2148_s21, %s17_s21  }
   0x2   : > { %p161_p1 = scmp.lt.s32.totalorder %s2110_s21, 7 }
   0x4   : > { %p162_p2 = pnand %p1968_p0, %p161_p1 }
   0x6   : > { %165 = sbr.rel (%p162_p2) target bundleno = 643 (0x283), region = 28 }
   0xb   : > { %s2082_s23 = sshll.u32 %s2154_s22, 4  ;;  %p199_p3 = scmp.lt.s32.totalorder %s2154_s22, 5 }
   0xc   : > { %s2083_s24 = sadd.s32 16, %s2082_s23  ;;  %s1973_s25 = sshll.u32 %s2154_s22, 7 }
   0xd   : > { %p193_p4 = scmp.lt.s32.totalorder %s2083_s24, 127  ;;  %s209_s26 = sadd.s32 104, %s1973_s25 }
   0xe   : > { %s200_s27 = scalar_select %p199_p3, %s2154_s22, 5 }
   0xf   : > { %s3039_s24 = smov (!%p193_p4, %s2083_s24), 127  ;;  %s210_s29 = sshra.s32 %s209_s26, 3 }
  0x10   : > { %s1971_s28 = sshll.u32 %s200_s27, 3  ;;  %s1970_s30 = sshll.u32 %s3039_s24, 2 }
  0x11   : > { %s2167_s9 = scalar_lea.vmem %s2989_s5, %s1971_s28  ;;  %s2172_s12 = scalar_lea.vmem %s2988_s4, %s1970_s30 }
  0x12   : > { %s2177_s15 = scalar_lea.vmem %s2990_s6, %s1971_s28  ;;  %s1974_s16 = sshll.u32 %s210_s29, 2 }
  0x13   : > { %s213_s19 = scalar_lea.vmem %s2984_s0, %s1974_s16 }
  0x14   : > { %v224_v0 = vld [vmem:[%s213_s19] sm:$0xff]  ;;  %v226_v1 = vld [vmem:[%s213_s19 + $0x8] sm:$0xff]  ;;  %v228_v2 = vld [vmem:[%s213_s19 + $0x10] sm:$0xff] }
  0x15   : > { %225 = vst [vmem:[#allocation2] sm:$0xff] %v224_v0  ;;  %v230_v3 = vld [vmem:[%s213_s19 + $0x18] sm:$0xff]  ;;  %v232_v4 = vld [vmem:[%s213_s19 + $0x20] sm:$0xff]  ;;  %v234_v5 = vld [vmem:[%s213_s19 + $0x28] sm:$0xff] }
  0x16   : > { %227 = vst [vmem:[#allocation2 + $0x8] sm:$0xff] %v226_v1  ;;  %v236_v6 = vld [vmem:[%s213_s19 + $0x30] sm:$0xff]  ;;  %v238_v7 = vld [vmem:[%s213_s19 + $0x38] sm:$0xff]  ;;  %v240_v8 = vld [vmem:[%s213_s19 + $0x40] sm:$0xff] }
  0x17   : > { %229 = vst [vmem:[#allocation2 + $0x10] sm:$0xff] %v228_v2  ;;  %v242_v9 = vld [vmem:[%s213_s19 + $0x48] sm:$0xff]  ;;  %v244_v10 = vld [vmem:[%s213_s19 + $0x50] sm:$0xff] }
  0x18   : > { %231 = vst [vmem:[#allocation2 + $0x18] sm:$0xff] %v230_v3 }
  0x19   : > { %233 = vst [vmem:[#allocation2 + $0x20] sm:$0xff] %v232_v4 }
  0x1a   : > { %235 = vst [vmem:[#allocation2 + $0x28] sm:$0xff] %v234_v5 }
  0x1b   : > { %237 = vst [vmem:[#allocation2 + $0x30] sm:$0xff] %v236_v6 }
  0x1c   : > { %239 = vst [vmem:[#allocation2 + $0x38] sm:$0xff] %v238_v7 }
  0x1d   : > { %241 = vst [vmem:[#allocation2 + $0x40] sm:$0xff] %v240_v8 }
  0x1e   : > { %243 = vst [vmem:[#allocation2 + $0x48] sm:$0xff] %v242_v9 }
  0x1f   : > { %245 = vst [vmem:[#allocation2 + $0x50] sm:$0xff] %v244_v10 }
  0x20   : > { %251 = vsyncadd [#allocation4], 1408  ;;  %s1911_s24 = scalar_lea.vmem %s2985_s1, %s1973_s25 }
  0x21   : > { %v2187_v11 = vld [vmem:[%s1911_s24 + $0x68] sm:$0xff]  ;;  %v2189_v12 = vld [vmem:[%s1911_s24 + $0x70] sm:$0xff]  ;;  %v2191_v13 = vld [vmem:[%s1911_s24 + $0x78] sm:$0xff] }
  0x22   : > { %v2193_v14 = vld [vmem:[%s1911_s24 + $0x80] sm:$0xff]  ;;  %v1980_v15 = vld [vmem:[%s1911_s24 + $0x88] sm:$0xff]  ;;  %v1981_v16 = vld [vmem:[%s1911_s24 + $0x90] sm:$0xff] }
  0x23   : > { %v1982_v17 = vld [vmem:[%s1911_s24 + $0x98] sm:$0xff]  ;;  %v1983_v18 = vld [vmem:[%s1911_s24 + $0xa0] sm:$0xff]  ;;  %v1984_v19 = vld [vmem:[%s1911_s24 + $0xa8] sm:$0xff] }
  0x24   : > { %v1985_v20 = vld [vmem:[%s1911_s24 + $0xb0] sm:$0xff]  ;;  %v1986_v21 = vld [vmem:[%s1911_s24 + $0xb8] sm:$0xff]  ;;  %v1987_v22 = vld [vmem:[%s1911_s24 + $0xc0] sm:$0xff] }
  0x25   : > { %v1988_v23 = vld [vmem:[%s1911_s24 + $0xc8] sm:$0xff]  ;;  %v1989_v24 = vld [vmem:[%s1911_s24 + $0xd0] sm:$0xff]  ;;  %v1990_v25 = vld [vmem:[%s1911_s24 + $0xd8] sm:$0xff] }
  0x26   : > { %v1991_v26 = vld [vmem:[%s1911_s24 + $0xe0] sm:$0xff]  ;;  %v2195_v27 = vld [vmem:[%s1911_s24 + $0xe8] sm:$0xff]  ;;  %v2197_v28 = vld [vmem:[%s1911_s24 + $0xf0] sm:$0xff] }
  0x27   : > { %v2199_v29 = vld [vmem:[%s1911_s24 + $0xf8] sm:$0xff]  ;;  %v2201_v30 = vld [vmem:[%s1911_s24 + $0x100] sm:$0xff]  ;;  %v2203_v31 = vld [vmem:[%s1911_s24 + $0x108] sm:$0xff] }
  0x28   : > { %v2205_v32 = vld [vmem:[%s1911_s24 + $0x110] sm:$0xff] }
  0x29   : > { %313 = vsyncadd [#allocation4 + $0x1], 2816 }
  0x2a   : > { %2104 = dma.done.wait [#allocation4], 1408 }
  0x2b   : > { %2105 = vsyncadd [#allocation4], 4294965888  ;;  %vm377_vm0 = vcmp.gt.f32.partialorder %v1988_v23, 0.0  ;;  %vm375_vm1 = vcmp.gt.f32.partialorder %v1986_v21, 0.0  ;;  %vm373_vm2 = vcmp.gt.f32.partialorder %v1984_v19, 0.0 }
  0x2c   : > { %2106 = dma.done.wait [#allocation4 + $0x1], 2816 }
  0x2d   : > { %2107 = vsyncadd [#allocation4 + $0x1], 4294964480  ;;  %v2112_v33 = vmov 0   ;;  %vm378_vm3 = vcmp.gt.f32.partialorder %v1989_v24, 0.0  ;;  %vm376_vm4 = vcmp.gt.f32.partialorder %v1987_v22, 0.0  ;;  %vm374_vm5 = vcmp.gt.f32.partialorder %v1985_v20, 0.0 }
  0x2e   : > { %2098 = vset.pattern.permute.xlu2 %v2112_v33  ;;  %2097 = vset.pattern.permute.xlu1 %v2112_v33  ;;  %v399_v34 = vsel %vm377_vm0, 1, %v2112_v33  ;;  %v397_v35 = vsel %vm375_vm1, 1, %v2112_v33  ;;  %v395_v36 = vsel %vm373_vm2, 1, %v2112_v33  ;;  %v400_v37 = vsel %vm378_vm3, 1, %v2112_v33  ;;  %v1998_v58 = vld [vmem:[%s2986_s2 + $0x2] sm:$0x3] }
  0x2f   : > { %2096 = vset.pattern.permute.xlu0 %v2112_v33  ;;  %446 = vperm.xlu2 %2098, %v399_v34   ;;  %v398_v38 = vsel %vm376_vm4, 1, %v2112_v33  ;;  %v396_v39 = vsel %vm374_vm5, 1, %v2112_v33  ;;  %vm369_vm6 = vcmp.gt.f32.partialorder %v1980_v15, 0.0  ;;  %vm380_vm7 = vcmp.gt.f32.partialorder %v1991_v26, 0.0  ;;  %v355_v63 = vld [vmem:[#allocation2 + $0x30] sm:$0xf] }
  0x30   : > { %440 = vperm.xlu1 %2097, %v397_v35   ;;  %434 = vperm.xlu0 %2096, %v395_v36   ;;  %vm379_vm8 = vcmp.gt.f32.partialorder %v1990_v25, 0.0  ;;  %v391_v40 = vsel %vm369_vm6, 1, %v2112_v33  ;;  %v402_v41 = vsel %vm380_vm7, 1, %v2112_v33  ;;  %vm372_vm9 = vcmp.gt.f32.partialorder %v1983_v18, 0.0  ;;  %v356_v0 = vld [vmem:[#allocation2 + $0x34] sm:$0xf] }
  0x31   : > { %v401_v42 = vsel %vm379_vm8, 1, %v2112_v33  ;;  %vm371_vm10 = vcmp.gt.f32.partialorder %v1982_v17, 0.0  ;;  %vm370_vm11 = vcmp.gt.f32.partialorder %v1981_v16, 0.0  ;;  %v394_v43 = vsel %vm372_vm9, 1, %v2112_v33  ;;  %v350_v2 = vld [vmem:[#allocation2 + $0x1c] sm:$0xf] }
  0x32   : > { %v393_v44 = vsel %vm371_vm10, 1, %v2112_v33  ;;  %v392_v45 = vsel %vm370_vm11, 1, %v2112_v33  ;;  %vm367_vm12 = vcmp.gt.f32.partialorder %v2191_v13, 0.0  ;;  %vm366_vm13 = vcmp.gt.f32.partialorder %v2189_v12, 0.0  ;;  %v351_v7 = vld [vmem:[#allocation2 + $0x20] sm:$0xf] }
  0x33   : > { %vm365_vm14 = vcmp.gt.f32.partialorder %v2187_v11, 0.0  ;;  %v389_v46 = vsel %vm367_vm12, 1, %v2112_v33  ;;  %v388_v47 = vsel %vm366_vm13, 1, %v2112_v33  ;;  %vm382_vm15 = vcmp.gt.f32.partialorder %v2197_v28, 0.0  ;;  %v353_v12 = vld [vmem:[#allocation2 + $0x28] sm:$0xf] }
  0x34   : > { %v387_v48 = vsel %vm365_vm14, 1, %v2112_v33  ;;  %vm381_vm0 = vcmp.gt.f32.partialorder %v2195_v27, 0.0  ;;  %vm368_vm1 = vcmp.gt.f32.partialorder %v2193_v14, 0.0  ;;  %v404_v49 = vsel %vm382_vm15, 1, %v2112_v33  ;;  %v354_v19 = vld [vmem:[#allocation2 + $0x2c] sm:$0xf] }
  0x35   : > { %v403_v50 = vsel %vm381_vm0, 1, %v2112_v33  ;;  %v390_v51 = vsel %vm368_vm1, 1, %v2112_v33  ;;  %vm385_vm2 = vcmp.gt.f32.partialorder %v2203_v31, 0.0  ;;  %vm384_vm3 = vcmp.gt.f32.partialorder %v2201_v30, 0.0  ;;  %v352_v21 = vld [vmem:[#allocation2 + $0x24] sm:$0xf] }
  0x36   : > { %vm383_vm4 = vcmp.gt.f32.partialorder %v2199_v29, 0.0  ;;  %v407_v52 = vsel %vm385_vm2, 1, %v2112_v33  ;;  %v406_v53 = vsel %vm384_vm3, 1, %v2112_v33  ;;  %vm386_vm5 = vcmp.gt.f32.partialorder %v2205_v32, 0.0  ;;  %v541_v61 = vld [vmem:[%s2986_s2] sm:$0x3] }
  0x37   : > { %449 = vperm.xlu2 %2098, %v400_v37   ;;  %v405_v54 = vsel %vm383_vm4, 1, %v2112_v33  ;;  %v408_v55 = vsel %vm386_vm5, 1, %v2112_v33  ;;  %vm630_vm6 = vcmask 1041408   ;;  %vm587_vm5 = vcmask 1044480  }
  0x38   : > { %443 = vperm.xlu1 %2097, %v398_v38   ;;  %437 = vperm.xlu0 %2096, %v396_v39   ;;  %v632_v59 = vsel %vm630_vm6, %v1998_v58, 0  ;;  %v358_v38 = vld [vmem:[#allocation2 + $0x3c] sm:$0xf] }
  0x39   : > { %2085 = vmatpush.bf16.msra.mxu2 %v632_v59  ;;  %2086 = vmatpush.bf16.msra.mxu3 %v632_v59 }
  0x3a   : > { %2084 = vmatpush.bf16.msra.mxu1 %v632_v59  ;;  %641 = vmatpush.bf16.msra.mxu0 %v632_v59 }
  0x3f   : > { %422 = vperm.xlu2 %2098, %v391_v40  }
  0x40   : > { %455 = vperm.xlu1 %2097, %v402_v41   ;;  %452 = vperm.xlu0 %2096, %v401_v42  }
  0x47   : > { %431 = vperm.xlu2 %2098, %v394_v43  }
  0x48   : > { %428 = vperm.xlu1 %2097, %v393_v44   ;;  %425 = vperm.xlu0 %2096, %v392_v45   ;;  %v357_v44 = vld [vmem:[#allocation2 + $0x38] sm:$0xf] }
  0x4f   : > { %416 = vperm.xlu2 %2098, %v389_v46  }
  0x50   : > { %413 = vperm.xlu1 %2097, %v388_v47   ;;  %410 = vperm.xlu0 %2096, %v387_v48  }
  0x57   : > { %461 = vperm.xlu2 %2098, %v404_v49  }
  0x58   : > { %458 = vperm.xlu1 %2097, %v403_v50   ;;  %419 = vperm.xlu0 %2096, %v390_v51   ;;  %v2015_v50 = vld [vmem:[%s2986_s2 + $0x4] sm:$0x3]  ;;  %v2024_v51 = vld [vmem:[%s2986_s2 + $0x6] sm:$0x3] }
  0x59   : > { %v903_v59 = vsel %vm630_vm6, %v2015_v50, 0 }
  0x5a   : > { %912 = vmatpush.bf16.msrb.mxu2 %v903_v59 }
  0x5f   : > { %470 = vperm.xlu2 %2098, %v407_v52  }
  0x60   : > { %467 = vperm.xlu1 %2097, %v406_v53   ;;  %464 = vperm.xlu0 %2096, %v405_v54  }
  0x68   : > { %473 = vperm.xlu0 %2096, %v408_v55  }
  0x89   : > { %v2242_v56 = vpop.permute.xlu2 %446 }
  0x8a   : > { %vm2994_vm7 = vcmp.eq.s32.totalorder %v2242_v56, 1 }
  0x8b   : > { %vm2257_vm9 = vmpackc.low %vm2994_vm7, %vm2994_vm7 }
  0x8c   : > { %v531_v5 = vsel %vm2257_vm9, %v355_v63, 0  ;;  %vm605_vm9 = vcmask 31744  }
  0x8d   : > { %v573_v10 = vunpack.c.l.b16 %v531_v5  ;;  %v1003_v5 = vsel %vm630_vm6, %v2024_v51, 0 }
  0x8e   : > { %1012 = vmatpush.bf16.msrb.mxu3 %v1003_v5 }
  0x91   : > { %v2244_v57 = vpop.permute.xlu2 %449 }
  0x92   : > { %vm2993_vm8 = vcmp.eq.s32.totalorder %v2244_v57, 1 }
  0x93   : > { %vm2264_vm10 = vmpackc.low %vm2993_vm8, %vm2993_vm8 }
  0x94   : > { %v532_v6 = vsel %vm2264_vm10, %v356_v0, 0  ;;  %vm842_vm10 = vsmask.f32 4352 }
  0x95   : > { %v2289_v11 = vunpack.c.l.b16 %v532_v6  ;;  %v789_v6 = vsel %vm630_vm6, %v541_v61, 0 }
  0x96   : > { %798 = vmatpush.bf16.msrb.mxu1 %v789_v6 }
  0x97   : > { %v2298_v17 = vpack.c.b16 %v2289_v11, %v573_v10 }
  0x99   : > { %v2250_v60 = vpop.permute.xlu2 %422  ;;  %v738_v24 = vshrl.u32 %v2298_v17, 16  ;;  %v741_v25 = vshll.u32 %v2298_v17, 16  ;;  %v599_v31 = vrot.slane %v2298_v17, 3 }
  0x9b   : > { %v866_v34 = vrot.slane %v738_v24, 3  ;;  %v867_v35 = vrot.slane %v741_v25, 4  ;;  %v740_v41 = vrot.slane %v738_v24, 2  ;;  %v743_v48 = vrot.slane %v741_v25, 3 }
  0x9d   : > { %v2348_v53 = vor.u32 %v867_v35, %v866_v34  ;;  %v744_v34 = vor.u32 %v743_v48, %v740_v41 }
  0xa1   : > { %v2268_v1 = vpop.permute.xlu2 %431 }
  0xa2   : > { %v2270_v3 = vpop.permute.xlu1 %440  ;;  %v2272_v4 = vpop.permute.xlu0 %434  ;;  %vm482_vm11 = vcmp.eq.s32.totalorder %v2268_v1, 1 }
  0xa3   : > { %vm2996_vm12 = vcmp.eq.s32.totalorder %v2270_v3, 1  ;;  %vm483_vm13 = vcmp.eq.s32.totalorder %v2272_v4, 1  ;;  %vm504_vm14 = vmpackc.low %vm482_vm11, %vm482_vm11 }
  0xa4   : > { %v526_v8 = vsel %vm504_vm14, %v350_v2, 0  ;;  %vm505_vm15 = vmpackc.low %vm483_vm13, %vm483_vm13  ;;  %vm479_vm14 = vcmp.eq.s32.totalorder %v2250_v60, 1  ;;  %v347_v2 = vld [vmem:[#allocation2 + $0x10] sm:$0xf] }
  0xa5   : > { %v2287_v9 = vunpack.c.l.b16 %v526_v8  ;;  %vm507_vm0 = vmpackc.low %vm2996_vm12, %vm2996_vm12  ;;  %v527_v13 = vsel %vm505_vm15, %v351_v7, 0 }
  0xa6   : > { %v569_v14 = vunpack.c.l.b16 %v527_v13  ;;  %v529_v15 = vsel %vm507_vm0, %v353_v12, 0 }
  0xa7   : > { %v571_v22 = vunpack.c.l.b16 %v529_v15 }
  0xa8   : > { %v2295_v16 = vpack.c.b16 %v569_v14, %v2287_v9 }
  0xa9   : > { %v2368_v63 = vpop.permute.xlu2 %416 }
  0xaa   : > { %v2300_v18 = vpop.permute.xlu1 %443  ;;  %v2302_v20 = vpop.permute.xlu0 %437 }
  0xab   : > { %vm2995_vm1 = vcmp.eq.s32.totalorder %v2300_v18, 1  ;;  %vm2997_vm2 = vcmp.eq.s32.totalorder %v2302_v20, 1 }
  0xac   : > { %vm508_vm3 = vmpackc.low %vm2995_vm1, %vm2995_vm1  ;;  %vm477_vm1 = vcmp.eq.s32.totalorder %v2368_v63, 1  ;;  %v2060_v63 = vld [vmem:[%s2986_s2 + $0xe] sm:$0x3] }
  0xad   : > { %v530_v23 = vsel %vm508_vm3, %v354_v19, 0  ;;  %vm506_vm4 = vmpackc.low %vm2997_vm2, %vm2997_vm2 }
  0xae   : > { %v572_v26 = vunpack.c.l.b16 %v530_v23  ;;  %v528_v27 = vsel %vm506_vm4, %v352_v21, 0  ;;  %v349_v23 = vld [vmem:[#allocation2 + $0x18] sm:$0xf] }
  0xaf   : > { %v570_v28 = vunpack.c.l.b16 %v528_v27 }
  0xb0   : > { %v2314_v29 = vpack.c.b16 %v572_v26, %v571_v22  ;;  %v2316_v30 = vpack.c.b16 %v573_v10, %v572_v26 }
  0xb1   : > { %v2319_v32 = vpack.c.b16 %v570_v28, %v569_v14  ;;  %v2321_v33 = vpack.c.b16 %v571_v22, %v570_v28 }
  0xb2   : > { %v729_v36 = vshrl.u32 %v2314_v29, 16  ;;  %v2325_v37 = vpop.permute.xlu1 %455  ;;  %v2327_v39 = vpop.permute.xlu0 %452  ;;  %v597_v40 = vrot.slane %v2314_v29, 3  ;;  %v732_v45 = vshll.u32 %v2314_v29, 16 }
  0xb3   : > { %3009 = vst [vmem:[#allocation9_spill] sm:$0xff] %v2325_v37  ;;  %v720_v42 = vshrl.u32 %v2319_v32, 16  ;;  %v723_v43 = vshll.u32 %v2319_v32, 16  ;;  %vm2991_vm15 = vcmp.eq.s32.totalorder %v2325_v37, 1  ;;  %vm2992_vm0 = vcmp.eq.s32.totalorder %v2327_v39, 1 }
  0xb4   : > { %3010 = vst [vmem:[#allocation10_spill] sm:$0xff] %v2327_v39  ;;  %vm512_vm3 = vmpackc.low %vm2991_vm15, %vm2991_vm15  ;;  %v595_v46 = vrot.slane %v2319_v32, 3  ;;  %v862_v47 = vrot.slane %v729_v36, 3  ;;  %v863_v12 = vrot.slane %v732_v45, 4  ;;  %v731_v13 = vrot.slane %v729_v36, 2 }
  0xb5   : > { %v534_v49 = vsel %vm512_vm3, %v358_v38, 0  ;;  %vm511_vm4 = vmpackc.low %vm2992_vm0, %vm2992_vm0  ;;  %v858_v52 = vrot.slane %v720_v42, 3  ;;  %v859_v7 = vrot.slane %v723_v43, 4  ;;  %v722_v8 = vrot.slane %v720_v42, 2 }
  0xb6   : > { %v2350_v54 = vunpack.c.l.b16 %v534_v49  ;;  %v533_v55 = vsel %vm511_vm4, %v357_v44, 0  ;;  %v598_v58 = vsel %vm587_vm5, %v595_v46, %v597_v40  ;;  %vm2364_vm3 = vmpackc.low %vm479_vm14, %vm479_vm14  ;;  %v725_v10 = vrot.slane %v723_v43, 3  ;;  %v2033_v49 = vld [vmem:[%s2986_s2 + $0x8] sm:$0x3] }
  0xb7   : > { %v575_v0 = vunpack.c.l.b16 %v533_v55  ;;  %2003 = vmatmul.msk.bf16.vlgmr.msra.gmra.mxu2 %vm605_vm9, %v598_v58  ;;  %v2379_v19 = vor.u32 %v859_v7, %v858_v52  ;;  %v734_v21 = vrot.slane %v732_v45, 3  ;;  %v523_v25 = vsel %vm2364_vm3, %v347_v2, 0  ;;  %v2430_v2 = vpop.permute.xlu2 %461 }
  0xb8   : > { %vm683_vm4 = vsmask.f32 5376  ;;  %v2387_v26 = vor.u32 %v725_v10, %v722_v8  ;;  %v864_v27 = vor.u32 %v863_v12, %v862_v47  ;;  %v2404_v44 = vunpack.c.l.b16 %v523_v25  ;;  %3013 = vst [vmem:[#allocation11_spill] sm:$0xff] %v2430_v2  ;;  %v344_v8 = vld [vmem:[#allocation2 + $0x4] sm:$0xf] }
  0xb9   : > { %v2374_v14 = vpack.c.b16 %v2350_v54, %v575_v0  ;;  %v2377_v15 = vpack.c.b16 %v575_v0, %v2289_v11  ;;  %v348_v11 = vld [vmem:[#allocation2 + $0x14] sm:$0xf]  ;;  %v735_v42 = vor.u32 %v734_v21, %v731_v13  ;;  %v1105_v52 = vsel %vm630_vm6, %v2033_v49, 0  ;;  %v343_v13 = vld [vmem:[#allocation2] sm:$0xf] }
  0xba   : > { %v2381_v22 = vpop.permute.xlu1 %428  ;;  %v2383_v24 = vpop.permute.xlu0 %425  ;;  %v2399_v38 = vsel %vm842_vm10, %v2379_v19, %v864_v27  ;;  %v2408_v41 = vsel %vm842_vm10, %v864_v27, %v2348_v53  ;;  %1114 = vmatpush.bf16.msrb.mxu0 %v1105_v52  ;;  %vm492_vm12 = vcmp.eq.s32.totalorder %v2430_v2, 1 }
  0xbb   : > { %v747_v28 = vshrl.u32 %v2374_v14, 16  ;;  %vm481_vm15 = vcmp.eq.s32.totalorder %v2381_v22, 1  ;;  %vm480_vm0 = vcmp.eq.s32.totalorder %v2383_v24, 1  ;;  %v750_v35 = vshll.u32 %v2374_v14, 16 }
  0xbc   : > { %vm503_vm8 = vmpackc.low %vm481_vm15, %vm481_vm15  ;;  %v601_v36 = vrot.slane %v2374_v14, 3  ;;  %v2420_v50 = vsel %vm683_vm4, %v2387_v26, %v735_v42  ;;  %v2425_v55 = vsel %vm683_vm4, %v735_v42, %v744_v34 }
  0xbd   : > { %v525_v43 = vsel %vm503_vm8, %v349_v23, 0  ;;  %vm502_vm3 = vmpackc.low %vm480_vm0, %vm480_vm0  ;;  %v870_v58 = vrot.slane %v747_v28, 3  ;;  %v871_v61 = vrot.slane %v750_v35, 4  ;;  %v749_v62 = vrot.slane %v747_v28, 2 }
  0xbe   : > { %v567_v45 = vunpack.c.l.b16 %v525_v43  ;;  %v524_v47 = vsel %vm502_vm3, %v348_v11, 0  ;;  %v602_v48 = vsel %vm587_vm5, %v599_v31, %v601_v36  ;;  %v752_v0 = vrot.slane %v750_v35, 3  ;;  %v360_v43 = vld [vmem:[#allocation2 + $0x44] sm:$0xf] }
  0xbf   : > { %v566_v51 = vunpack.c.l.b16 %v524_v47  ;;  %2005 = vmatmul.msk.bf16.vlgmr.msra.gmra.mxu3 %vm605_vm9, %v602_v48  ;;  %v2439_v21 = vor.u32 %v871_v61, %v870_v58  ;;  %v600_v35 = vsel %vm587_vm5, %v597_v40, %v599_v31  ;;  %v345_v31 = vld [vmem:[#allocation2 + $0x8] sm:$0xf]  ;;  %v359_v47 = vld [vmem:[#allocation2 + $0x40] sm:$0xf]  ;;  %v346_v58 = vld [vmem:[#allocation2 + $0xc] sm:$0xf] }
  0xc0   : > { %v2428_v59 = vpack.c.b16 %v2287_v9, %v567_v45  ;;  %v2441_v23 = vor.u32 %v752_v0, %v749_v62  ;;  %v1470_v0 = vsel %vm630_vm6, %v2060_v63, 0 }
  0xc1   : > { %v2433_v5 = vpack.c.b16 %v566_v51, %v2404_v44  ;;  %v2435_v6 = vpack.c.b16 %v567_v45, %v566_v51  ;;  %v2467_v17 = vsel %vm842_vm10, %v2348_v53, %v2439_v21  ;;  %v2051_v53 = vld [vmem:[%s2986_s2 + $0xc] sm:$0x3]  ;;  %1479 = vmatpush.bf16.msra.mxu3 %v1470_v0 }
  0xc2   : > { %v414_v7 = vpop.permute.xlu1 %413  ;;  %v411_v10 = vpop.permute.xlu0 %410  ;;  %v593_v12 = vrot.slane %v2428_v59, 3  ;;  %v2471_v29 = vsel %vm683_vm4, %v744_v34, %v2441_v23  ;;  %v2042_v34 = vld [vmem:[%s2986_s2 + $0xa] sm:$0x3]  ;;  %v1358_v62 = vsel %vm630_vm6, %v2051_v53, 0 }
  0xc3   : > { %vm476_vm8 = vcmp.eq.s32.totalorder %v414_v7, 1  ;;  %vm475_vm7 = vcmp.eq.s32.totalorder %v411_v10, 1  ;;  %v2998_v9 = vrot.slane %v2433_v5, 3  ;;  %v1263_v7 = vsel %vm630_vm6, %v2042_v34, 0  ;;  %1367 = vmatpush.bf16.msra.mxu2 %v1358_v62  ;;  %v361_v62 = vld [vmem:[#allocation2 + $0x48] sm:$0xf] }
  0xc4   : > { %vm498_vm3 = vmpackc.low %vm476_vm8, %vm476_vm8 }
  0xc5   : > { %v520_v25 = vsel %vm498_vm3, %v344_v8, 0  ;;  %vm497_vm2 = vmpackc.low %vm475_vm7, %vm475_vm7  ;;  %v594_v11 = vsel %vm587_vm5, %v2998_v9, %v593_v12 }
  0xc6   : > { %v562_v27 = vunpack.c.l.b16 %v520_v25  ;;  %v519_v28 = vsel %vm497_vm2, %v343_v13, 0  ;;  %2001 = vmatmul.msk.bf16.vlgmr.msra.gmra.mxu1 %vm605_vm9, %v594_v11  ;;  %vm2460_vm7 = vmpackc.low %vm492_vm12, %vm492_vm12 }
  0xc7   : > { %v561_v42 = vunpack.c.l.b16 %v519_v28  ;;  %2004 = vmatmul.msk.bf16.gmra.mxu2 %vm605_vm9, %v600_v35  ;;  %vm2476_vm2 = vmpackc.low %vm477_vm1, %vm477_vm1  ;;  %v536_v52 = vsel %vm2460_vm7, %v360_v43, 0  ;;  %1272 = vmatpush.bf16.msra.mxu1 %v1263_v7 }
  0xc8   : > { %v521_v61 = vsel %vm2476_vm2, %v345_v31, 0  ;;  %v2510_v10 = vunpack.c.l.b16 %v536_v52 }
  0xc9   : > { %v2480_v48 = vpack.c.b16 %v562_v27, %v561_v42  ;;  %v563_v28 = vunpack.c.l.b16 %v521_v61 }
  0xca   : > { %v2482_v49 = vpop.permute.xlu1 %458  ;;  %v2484_v51 = vpop.permute.xlu0 %419 }
  0xcb   : > { %3018 = vst [vmem:[#allocation12_spill] sm:$0xff] %v2482_v49  ;;  %vm491_vm1 = vcmp.eq.s32.totalorder %v2482_v49, 1  ;;  %vm478_vm8 = vcmp.eq.s32.totalorder %v2484_v51, 1  ;;  %v685_v13 = vshrl.u32 %v2480_v48, 16  ;;  %v688_v11 = vshll.u32 %v2480_v48, 16 }
  0xcc   : > { %vm513_vm3 = vmpackc.low %vm491_vm1, %vm491_vm1 }
  0xcd   : > { %v535_v8 = vsel %vm513_vm3, %v359_v47, 0  ;;  %vm500_vm7 = vmpackc.low %vm478_vm8, %vm478_vm8  ;;  %v588_v47 = vrot.slane %v2480_v48, 3  ;;  %v843_v63 = vrot.slane %v685_v13, 3  ;;  %v687_v49 = vrot.slane %v685_v13, 2 }
  0xce   : > { %v577_v25 = vunpack.c.l.b16 %v535_v8  ;;  %v522_v27 = vsel %vm500_vm7, %v346_v58, 0  ;;  %v844_v58 = vrot.slane %v688_v11, 4  ;;  %v3020_v13 = vrot.slane %v2433_v5, 3 }
  0xcf   : > { %v2514_v35 = vunpack.c.l.b16 %v522_v27  ;;  %v596_v27 = vsel %vm587_vm5, %v593_v12, %v595_v46  ;;  %v705_v46 = vshll.u32 %v2433_v5, 16 }
  0xd0   : > { %v586_v42 = vpack.c.b16 %v577_v25, %v577_v25  ;;  %v976_v43 = vpack.c.b16 %v2510_v10, %v577_v25  ;;  %v2518_v45 = vpack.c.b16 %v577_v25, %v2350_v54 }
  0xd1   : > { %v2521_v31 = vpack.c.b16 %v2514_v35, %v563_v28 }
  0xd2   : > { %v2523_v40 = vpop.permute.xlu0 %464  ;;  %v603_v53 = vrot.slane %v586_v42, 3  ;;  %v979_v61 = vshrl.u32 %v976_v43, 16  ;;  %v982_v7 = vshll.u32 %v976_v43, 16  ;;  %v2069_v43 = vld [vmem:[%s2986_s2 + $0x10] sm:$0x3] }
  0xd3   : > { %3019 = vst [vmem:[#allocation13_spill] sm:$0xff] %v2523_v40  ;;  %v693_v34 = vshrl.u32 %v2521_v31, 16  ;;  %v696_v52 = vshll.u32 %v2521_v31, 16  ;;  %vm3004_vm2 = vcmp.eq.s32.totalorder %v2523_v40, 1  ;;  %v589_v54 = vrot.slane %v2521_v31, 3 }
  0xd4   : > { %v604_v0 = vsel %vm587_vm5, %v601_v36, %v603_v53  ;;  %vm515_vm3 = vmpackc.low %vm3004_vm2, %vm3004_vm2  ;;  %v845_v36 = vor.u32 %v844_v58, %v843_v63  ;;  %v981_v32 = vrot.slane %v979_v61, 3  ;;  %v984_v53 = vrot.slane %v982_v7, 4 }
  0xd5   : > { %2006 = vmatmul.msk.bf16.gmra.mxu3 %vm605_vm9, %v604_v0  ;;  %v846_v48 = vrot.slane %v693_v34, 3  ;;  %v847_v8 = vrot.slane %v696_v52, 4  ;;  %v590_v25 = vsel %vm587_vm5, %v588_v47, %v589_v54  ;;  %v537_v14 = vsel %vm515_vm3, %v361_v62, 0 }
  0xd6   : > { %1999 = vmatmul.msk.bf16.vlgmr.msra.gmra.mxu0 %vm605_vm9, %v590_v25  ;;  %2002 = vmatmul.msk.bf16.gmra.mxu1 %vm605_vm9, %v596_v27  ;;  %v2548_v31 = vunpack.c.l.b16 %v537_v14  ;;  %v1602_v47 = vsel %vm630_vm6, %v2069_v43, 0  ;;  %v702_v0 = vshrl.u32 %v2433_v5, 16  ;;  %v756_v58 = vshrl.u32 %v586_v42, 16 }
  0xd7   : > { %v848_v28 = vor.u32 %v847_v8, %v846_v48  ;;  %1611 = vmatpush.bf16.msra.mxu0 %v1602_v47  ;;  %v985_v8 = vor.u32 %v984_v53, %v981_v32  ;;  %v695_v25 = vrot.slane %v693_v34, 2  ;;  %v851_v61 = vrot.slane %v705_v46, 4 }
  0xd8   : > { %v977_v63 = vpack.c.b16 %v2548_v31, %v2548_v31  ;;  %v850_v27 = vrot.slane %v702_v0, 3  ;;  %v759_v7 = vshll.u32 %v586_v42, 16  ;;  %v698_v9 = vrot.slane %v696_v52, 3 }
  0xd9   : > { %v849_v12 = vsel %vm842_vm10, %v845_v36, %v848_v28  ;;  %v2559_v36 = vsel %vm842_vm10, %v2439_v21, %v985_v8  ;;  %v874_v47 = vrot.slane %v756_v58, 3  ;;  %v758_v2 = vrot.slane %v756_v58, 2 }
  0xda   : > { %2016 = vmatmul.msk.bf16.vlgmr.msrb.gmra.mxu2 %vm605_vm9, %v849_v12  ;;  %v988_v62 = vshrl.u32 %v977_v63, 16  ;;  %v991_v48 = vshll.u32 %v977_v63, 16  ;;  %v875_v40 = vrot.slane %v759_v7, 4  ;;  %v690_v12 = vrot.slane %v688_v11, 3 }
  0xdb   : > { %v761_v37 = vrot.slane %v759_v7, 3  ;;  %v699_v32 = vor.u32 %v698_v9, %v695_v25  ;;  %v852_v34 = vor.u32 %v851_v61, %v850_v27  ;;  %v592_v9 = vsel %vm587_vm5, %v589_v54, %v3020_v13 }
  0xdc   : > { %v990_v14 = vrot.slane %v988_v62, 3  ;;  %v993_v43 = vrot.slane %v991_v48, 4  ;;  %v876_v63 = vor.u32 %v875_v40, %v874_v47  ;;  %v691_v62 = vor.u32 %v690_v12, %v687_v49 }
  0xdd   : > { %v762_v53 = vor.u32 %v761_v37, %v758_v2  ;;  %v853_v48 = vsel %vm842_vm10, %v848_v28, %v852_v34  ;;  %v714_v2 = vshll.u32 %v2428_v59, 16  ;;  %v704_v49 = vrot.slane %v702_v0, 2 }
  0xde   : > { %v994_v39 = vor.u32 %v993_v43, %v990_v14  ;;  %v877_v52 = vsel %vm842_vm10, %v2439_v21, %v876_v63  ;;  %v700_v37 = vsel %vm683_vm4, %v691_v62, %v699_v32  ;;  %v707_v11 = vrot.slane %v705_v46, 3 }
  0xdf   : > { %v2569_v58 = vsel %vm683_vm4, %v2441_v23, %v762_v53  ;;  %v855_v23 = vrot.slane %v714_v2, 4  ;;  %v2584_v28 = vpack.c.b16 %v2404_v44, %v2514_v35  ;;  %v716_v0 = vrot.slane %v714_v2, 3 }
  0xe0   : > { %v2562_v42 = vsel %vm842_vm10, %v985_v8, %v994_v39  ;;  %v711_v39 = vshrl.u32 %v2428_v59, 16  ;;  %v708_v5 = vor.u32 %v707_v11, %v704_v49  ;;  %v1188_v7 = vshrl.u32 %v2435_v6, 16 }
  0xe1   : > { %v1191_v14 = vshll.u32 %v2295_v16, 16  ;;  %vm1177_vm6 = vsmask.f32 7424  ;;  %v1428_v13 = vrot.slane %v2435_v6, 1  ;;  %vm1427_vm5 = vcmask 1046528  }
  0xe2   : > { %v854_v21 = vrot.slane %v711_v39, 3  ;;  %v709_v8 = vsel %vm683_vm4, %v699_v32, %v708_v5  ;;  %v713_v59 = vrot.slane %v711_v39, 2  ;;  %v1429_v39 = vrot.slane %v2295_v16, 1 }
  0xe3   : > { %v1193_v12 = vrot.slane %v1191_v14, 1  ;;  %v2675_v49 = vpack.c.b16 %v2548_v31, %v2510_v10 }
  0xe4   : > { %v856_v40 = vor.u32 %v855_v23, %v854_v21  ;;  %v717_v46 = vor.u32 %v716_v0, %v713_v59  ;;  %v1430_v23 = vsel %vm1427_vm5, %v1428_v13, %v1429_v39  ;;  %v1205_v13 = vshll.u32 %v2316_v30, 16 }
  0xe5   : > { %2025 = vmatmul.msk.bf16.vlgmr.msrb.gmra.mxu3 %vm605_vm9, %v853_v48 }
  0xe6   : > { %2000 = vmatmul.msk.bf16.gmra.mxu0 %vm605_vm9, %v592_v9  ;;  %2007 = vmatmul.msk.bf16.vlgmr.msrb.gmra.mxu1 %vm605_vm9, %v700_v37  ;;  %v857_v54 = vsel %vm842_vm10, %v852_v34, %v856_v40  ;;  %v861_v25 = vsel %vm842_vm10, %v856_v40, %v2379_v19  ;;  %v718_v44 = vsel %vm683_vm4, %v708_v5, %v717_v46  ;;  %v1180_v34 = vshll.u32 %v2584_v28, 16 }
  0xe7   : > { %v727_v35 = vsel %vm683_vm4, %v717_v46, %v2387_v26  ;;  %v1198_v9 = vshll.u32 %v2321_v33, 16  ;;  %vm1539_vm10 = vsmask.f32 6400 }
  0xe8   : > { %v1182_v62 = vrot.slane %v1180_v34, 1  ;;  %v1431_v34 = vrot.slane %v2321_v33, 1 }
  0xe9   : > { %v1200_v5 = vrot.slane %v1198_v9, 1 }
  0xea   : > { %2017 = vmatmul.msk.bf16.gmra.mxu2 %vm605_vm9, %v853_v48  ;;  %v1178_v48 = vshrl.u32 %v2584_v28, 16 }
  0xec   : > { %v1183_v37 = vor.u32 %v1182_v62, %v1178_v48  ;;  %v1544_v62 = vrot.slane %v1191_v14, 2  ;;  %v1202_v48 = vshrl.u32 %v2321_v33, 16 }
  0xf5   : > { %2026 = vmatmul.msk.bf16.gmra.mxu3 %vm605_vm9, %v857_v54 }
  0xf6   : > { %2008 = vmatmul.msk.bf16.gmra.mxu1 %vm605_vm9, %v709_v8  ;;  %2034 = vmatmul.msk.bf16.vlgmr.msrb.gmra.mxu0 %vm605_vm9, %v2584_v28 }
  0xfa   : > { %2018 = vmatmul.msk.bf16.gmra.mxu2 %vm605_vm9, %v857_v54 }
 0x105   : > { %2027 = vmatmul.msk.bf16.gmra.mxu3 %vm605_vm9, %v861_v25 }
 0x106   : > { %2009 = vmatmul.msk.bf16.gmra.mxu1 %vm605_vm9, %v718_v44  ;;  %2035 = vmatmul.msk.bf16.gmra.mxu0 %vm605_vm9, %v2435_v6  ;;  %v1540_v44 = vrot.slane %v1188_v7, 1 }
 0x10a   : > { %2019 = vmatmul.msk.bf16.gmra.mxu2 %vm605_vm9, %v861_v25 }
 0x115   : > { %2028 = vmatmul.msk.bf16.gmra.mxu3 %vm605_vm9, %v2399_v38 }
 0x116   : > { %2010 = vmatmul.msk.bf16.gmra.mxu1 %vm605_vm9, %v727_v35  ;;  %2036 = vmatmul.msk.bf16.gmra.mxu0 %vm605_vm9, %v2295_v16 }
 0x11a   : > { %2020 = vmatmul.msk.bf16.gmra.mxu2 %vm605_vm9, %v2399_v38 }
 0x125   : > { %2029 = vmatmul.msk.bf16.gmra.mxu3 %vm605_vm9, %v2408_v41 }
 0x126   : > { %2011 = vmatmul.msk.bf16.gmra.mxu1 %vm605_vm9, %v2420_v50  ;;  %2037 = vmatmul.msk.bf16.gmra.mxu0 %vm605_vm9, %v2321_v33 }
 0x12a   : > { %2021 = vmatmul.msk.bf16.gmra.mxu2 %vm605_vm9, %v2408_v41 }
 0x135   : > { %2030 = vmatmul.msk.bf16.gmra.mxu3 %vm605_vm9, %v2467_v17 }
 0x136   : > { %2012 = vmatmul.msk.bf16.gmra.mxu1 %vm605_vm9, %v2425_v55  ;;  %2038 = vmatmul.msk.bf16.gmra.mxu0 %vm605_vm9, %v2316_v30 }
 0x13a   : > { %v2623_v19 = vpop.f32.mrf.mxu2  ;;  %2022 = vmatmul.msk.bf16.gmra.mxu2 %vm605_vm9, %v2467_v17  ;;  %v1184_v17 = vshll.u32 %v2435_v6, 16  ;;  %v1195_v6 = vshrl.u32 %v2295_v16, 16 }
 0x13c   : > { %v1186_v61 = vrot.slane %v1184_v17, 1  ;;  %v1197_v8 = vor.u32 %v1195_v6, %v1193_v12  ;;  %v1541_v35 = vrot.slane %v1184_v17, 2 }
 0x13e   : > { %v1190_v47 = vor.u32 %v1188_v7, %v1186_v61  ;;  %v1187_v54 = vsel %vm1177_vm6, %v1183_v37, %v1186_v61  ;;  %v1201_v10 = vsel %vm1177_vm6, %v1197_v8, %v1200_v5 }
 0x140   : > { %v1194_v32 = vsel %vm1177_vm6, %v1190_v47, %v1193_v12  ;;  %v1542_v12 = vor.u32 %v1541_v35, %v1540_v44  ;;  %v1433_v35 = vrot.slane %v2316_v30, 1 }
 0x142   : > { %v2627_v26 = vpop.f32.mrf.mxu2  ;;  %v2633_v41 = vpop.f32.mrf.mxu3 }
 0x143   : > { %v2629_v38 = vpop.f32.mrf.mxu1 }
 0x145   : > { %2031 = vmatmul.msk.bf16.gmra.mxu3 %vm605_vm9, %v2559_v36 }
 0x146   : > { %2013 = vmatmul.msk.bf16.gmra.mxu1 %vm605_vm9, %v2471_v29  ;;  %2039 = vmatmul.msk.bf16.gmra.mxu0 %vm605_vm9, %v2377_v15 }
 0x14a   : > { %2023 = vmatmul.msk.bf16.gmra.mxu2 %vm605_vm9, %v877_v52  ;;  %v2640_v50 = vpop.f32.mrf.mxu2  ;;  %v2645_v27 = vpop.f32.mrf.mxu3 }
 0x14b   : > { %v2642_v55 = vpop.f32.mrf.mxu1 }
 0x152   : > { %v2651_v36 = vpop.f32.mrf.mxu2 }
 0x153   : > { %v643_v43 = vpop.f32.mrf.mxu0  ;;  %v2649_v29 = vpop.f32.mrf.mxu1 }
 0x155   : > { %2032 = vmatmul.msk.bf16.gmra.mxu3 %vm605_vm9, %v2562_v42 }
 0x156   : > { %2014 = vmatmul.msk.bf16.gmra.mxu1 %vm605_vm9, %v2569_v58  ;;  %2040 = vmatmul.msk.bf16.gmra.mxu0 %vm605_vm9, %v2518_v45 }
 0x158   : > { %v2659_v63 = vpop.f32.mrf.mxu3 }
 0x15a   : > { %2052 = vmatmul.msk.bf16.vlgmr.msra.gmra.mxu2 %vm605_vm9, %v1194_v32 }
 0x15b   : > { %v645_v53 = vpop.f32.mrf.mxu0  ;;  %v2664_v52 = vpop.f32.mrf.mxu1 }
 0x15d   : > { %v914_v42 = vpop.f32.mrf.mxu2 }
 0x160   : > { %v2667_v58 = vpop.f32.mrf.mxu3 }
 0x163   : > { %v648_v2 = vpop.f32.mrf.mxu0  ;;  %v800_v21 = vpop.f32.mrf.mxu1 }
 0x164   : > { %v801_v11 = vadd.f32 %v800_v21, %v643_v43  ;;  %v1543_v43 = vrot.slane %v1195_v6, 1  ;;  %v1207_v6 = vrot.slane %v1205_v13, 1 }
 0x165   : > { %v916_v40 = vpop.f32.mrf.mxu2  ;;  %2061 = vmatmul.msk.bf16.vlgmr.msra.gmra.mxu3 %vm605_vm9, %v1430_v23  ;;  %v1432_v23 = vsel %vm1427_vm5, %v1429_v39, %v1431_v34 }
 0x166   : > { %2041 = vmatmul.msk.bf16.gmra.mxu0 %vm605_vm9, %v2675_v49  ;;  %2043 = vmatmul.msk.bf16.vlgmr.msra.gmra.mxu1 %vm605_vm9, %v1187_v54  ;;  %v954_v28 = vadd.f32 %v914_v42, %v801_v11 }
 0x168   : > { %v1014_v59 = vpop.f32.mrf.mxu3 }
 0x169   : > { %v1054_v0 = vadd.f32 %v1014_v59, %v954_v28 }
 0x16a   : > { %2053 = vmatmul.msk.bf16.gmra.mxu2 %vm605_vm9, %v1201_v10 }
 0x16b   : > { %v650_v31 = vpop.f32.mrf.mxu0  ;;  %v802_v46 = vpop.f32.mrf.mxu1 }
 0x16c   : > { %v803_v25 = vadd.f32 %v802_v46, %v645_v53  ;;  %v1545_v53 = vor.u32 %v1544_v62, %v1543_v43  ;;  %v1547_v46 = vrot.slane %v1202_v48, 1 }
 0x16d   : > { %v919_v16 = vpop.f32.mrf.mxu2 }
 0x16e   : > { %v955_v61 = vadd.f32 %v916_v40, %v803_v25  ;;  %v1204_v40 = vor.u32 %v1202_v48, %v1200_v5  ;;  %v1546_v14 = vsel %vm1539_vm10, %v1542_v12, %v1545_v53  ;;  %v1548_v25 = vrot.slane %v1198_v9, 2 }
 0x16f   : > { %v1434_v12 = vsel %vm1427_vm5, %v1431_v34, %v1433_v35  ;;  %v1209_v9 = vshrl.u32 %v2316_v30, 16 }
 0x170   : > { %v1016_v47 = vpop.f32.mrf.mxu3  ;;  %v1208_v39 = vsel %vm1177_vm6, %v1204_v40, %v1207_v6  ;;  %v1549_v43 = vor.u32 %v1548_v25, %v1547_v46 }
 0x171   : > { %v1055_v42 = vadd.f32 %v1016_v47, %v955_v61  ;;  %v1212_v61 = vshll.u32 %v2377_v15, 16 }
 0x173   : > { %v805_v37 = vpop.f32.mrf.mxu1  ;;  %v1116_v21 = vpop.f32.mrf.mxu0  ;;  %v1214_v48 = vrot.slane %v1212_v61, 1 }
 0x174   : > { %v806_v11 = vadd.f32 %v805_v37, %v648_v2  ;;  %v2689_v7 = vadd.f32 %v1116_v21, %v1054_v0  ;;  %v1550_v21 = vsel %vm1539_vm10, %v1545_v53, %v1549_v43 }
 0x175   : > { %v921_v17 = vpop.f32.mrf.mxu2  ;;  %2062 = vmatmul.msk.bf16.gmra.mxu3 %vm605_vm9, %v1432_v23 }
 0x176   : > { %2044 = vmatmul.msk.bf16.gmra.mxu1 %vm605_vm9, %v1194_v32  ;;  %2070 = vmatmul.msk.bf16.vlgmr.msra.gmra.mxu0 %vm605_vm9, %v1546_v14  ;;  %v956_v33 = vadd.f32 %v919_v16, %v806_v11  ;;  %v1211_v11 = vor.u32 %v1209_v9, %v1207_v6  ;;  %v1435_v6 = vrot.slane %v2377_v15, 1 }
 0x178   : > { %v1019_v54 = vpop.f32.mrf.mxu3 }
 0x179   : > { %v1056_v28 = vadd.f32 %v1019_v54, %v956_v33  ;;  %v1552_v54 = vrot.slane %v1205_v13, 2  ;;  %v1216_v13 = vshrl.u32 %v2377_v15, 16 }
 0x17a   : > { %2054 = vmatmul.msk.bf16.gmra.mxu2 %vm605_vm9, %v1208_v39 }
 0x17b   : > { %v807_v2 = vpop.f32.mrf.mxu1  ;;  %v1118_v8 = vpop.f32.mrf.mxu0 }
 0x17c   : > { %v808_v59 = vadd.f32 %v807_v2, %v650_v31  ;;  %v2697_v0 = vadd.f32 %v1118_v8, %v1055_v42 }
 0x17d   : > { %v924_v5 = vpop.f32.mrf.mxu2 }
 0x17e   : > { %v957_v44 = vadd.f32 %v921_v17, %v808_v59  ;;  %v1219_v59 = vshll.u32 %v2518_v45, 16 }
 0x180   : > { %v1021_v32 = vpop.f32.mrf.mxu3 }
 0x181   : > { %v1057_v16 = vadd.f32 %v1021_v32, %v957_v44  ;;  %v1436_v44 = vsel %vm1427_vm5, %v1433_v35, %v1435_v6  ;;  %v1218_v35 = vor.u32 %v1216_v13, %v1214_v48 }
 0x183   : > { %v810_v47 = vpop.f32.mrf.mxu1  ;;  %v1121_v62 = vpop.f32.mrf.mxu0 }
 0x184   : > { %v811_v37 = vadd.f32 %v810_v47, %v2629_v38  ;;  %v2703_v31 = vadd.f32 %v1121_v62, %v1056_v28  ;;  %v2711_v38 = vsel %vm1177_vm6, %v1211_v11, %v1214_v48  ;;  %v1221_v47 = vrot.slane %v1219_v59, 1 }
 0x185   : > { %v926_v42 = vpop.f32.mrf.mxu2  ;;  %2063 = vmatmul.msk.bf16.gmra.mxu3 %vm605_vm9, %v1434_v12  ;;  %v1556_v11 = vrot.slane %v1212_v61, 2 }
 0x186   : > { %2045 = vmatmul.msk.bf16.gmra.mxu1 %vm605_vm9, %v1201_v10  ;;  %2071 = vmatmul.msk.bf16.gmra.mxu0 %vm605_vm9, %v1550_v21  ;;  %v958_v23 = vadd.f32 %v924_v5, %v811_v37  ;;  %v1551_v10 = vrot.slane %v1209_v9, 1 }
 0x188   : > { %v1024_v17 = vpop.f32.mrf.mxu3  ;;  %v1553_v5 = vor.u32 %v1552_v54, %v1551_v10 }
 0x189   : > { %v1058_v34 = vadd.f32 %v1024_v17, %v958_v23  ;;  %v468_v17 = vpop.permute.xlu1 %467 }
 0x18a   : > { %2055 = vmatmul.msk.bf16.gmra.mxu2 %vm605_vm9, %v2711_v38  ;;  %v1554_v62 = vsel %vm1539_vm10, %v1549_v43, %v1553_v5  ;;  %vm494_vm4 = vcmp.eq.s32.totalorder %v468_v17, 1  ;;  %v1560_v17 = vrot.slane %v1219_v59, 2 }
 0x18b   : > { %v812_v40 = vpop.f32.mrf.mxu1  ;;  %v1123_v14 = vpop.f32.mrf.mxu0  ;;  %vm2742_vm3 = vmpackc.low %vm494_vm4, %vm494_vm4 }
 0x18c   : > { %v813_v30 = vadd.f32 %v812_v40, %v2642_v55  ;;  %v2716_v33 = vadd.f32 %v1123_v14, %v1057_v16  ;;  %v1437_v40 = vrot.slane %v2518_v45, 1  ;;  %v471_v14 = vpop.permute.xlu2 %470 }
 0x18d   : > { %v929_v53 = vpop.f32.mrf.mxu2  ;;  %vm495_vm7 = vcmp.eq.s32.totalorder %v471_v14, 1 }
 0x18e   : > { %v959_v28 = vadd.f32 %v926_v42, %v813_v30  ;;  %v2732_v42 = vsel %vm1177_vm6, %v1218_v35, %v1221_v47  ;;  %vm517_vm2 = vmpackc.low %vm495_vm7, %vm495_vm7 }
 0x190   : > { %v1026_v2 = vpop.f32.mrf.mxu3 }
 0x191   : > { %v1059_v8 = vadd.f32 %v1026_v2, %v959_v28  ;;  %v362_v2 = vld [vmem:[#allocation2 + $0x4c] sm:$0xf] }
 0x193   : > { %v815_v46 = vpop.f32.mrf.mxu1  ;;  %v1126_v25 = vpop.f32.mrf.mxu0 }
 0x194   : > { %v816_v32 = vadd.f32 %v815_v46, %v2649_v29  ;;  %v2722_v55 = vadd.f32 %v1126_v25, %v1058_v34 }
 0x195   : > { %v931_v16 = vpop.f32.mrf.mxu2  ;;  %2064 = vmatmul.msk.bf16.gmra.mxu3 %vm605_vm9, %v1436_v44  ;;  %v1223_v44 = vshrl.u32 %v2518_v45, 16  ;;  %v1230_v45 = vshrl.u32 %v2675_v49, 16 }
 0x196   : > { %2046 = vmatmul.msk.bf16.gmra.mxu1 %vm605_vm9, %v1208_v39  ;;  %2072 = vmatmul.msk.bf16.gmra.mxu0 %vm605_vm9, %v1554_v62  ;;  %v960_v12 = vadd.f32 %v929_v53, %v816_v32  ;;  %v1555_v39 = vrot.slane %v1216_v13, 1  ;;  %v1226_v53 = vshll.u32 %v2675_v49, 16  ;;  %v538_v62 = vsel %vm2742_vm3, %v362_v2, 0 }
 0x197   : > { %v1225_v13 = vor.u32 %v1223_v44, %v1221_v47 }
 0x198   : > { %v1029_v37 = vpop.f32.mrf.mxu3  ;;  %v1557_v10 = vor.u32 %v1556_v11, %v1555_v39  ;;  %v1228_v32 = vrot.slane %v1226_v53, 1  ;;  %v1559_v11 = vrot.slane %v1223_v44, 1 }
 0x199   : > { %v1060_v29 = vadd.f32 %v1029_v37, %v960_v12 }
 0x19a   : > { %2056 = vmatmul.msk.bf16.gmra.mxu2 %vm605_vm9, %v2732_v42  ;;  %v2760_v37 = vsel %vm1177_vm6, %v1225_v13, %v1228_v32 }
 0x19b   : > { %v817_v15 = vpop.f32.mrf.mxu1  ;;  %v1128_v9 = vpop.f32.mrf.mxu0 }
 0x19c   : > { %v818_v21 = vadd.f32 %v817_v15, %v2664_v52  ;;  %v2737_v23 = vadd.f32 %v1128_v9, %v1059_v8  ;;  %v1438_v52 = vsel %vm1427_vm5, %v1435_v6, %v1437_v40  ;;  %v363_v6 = vld [vmem:[#allocation2 + $0x50] sm:$0xf] }
 0x19d   : > { %v934_v43 = vpop.f32.mrf.mxu2 }
 0x19e   : > { %v961_v34 = vadd.f32 %v931_v16, %v818_v21  ;;  %v1558_v16 = vsel %vm1539_vm10, %v1553_v5, %v1557_v10  ;;  %v2764_v5 = vunpack.c.l.b16 %v538_v62  ;;  %v474_v21 = vpop.permute.xlu0 %473 }
 0x1a0   : > { %v1031_v48 = vpop.f32.mrf.mxu3 }
 0x1a1   : > { %v1061_v30 = vadd.f32 %v1031_v48, %v961_v34 }
 0x1a3   : > { %v820_v54 = vpop.f32.mrf.mxu1  ;;  %v1131_v28 = vpop.f32.mrf.mxu0 }
 0x1a4   : > { %v821_v61 = vadd.f32 %v820_v54, %v2623_v19  ;;  %v2747_v46 = vadd.f32 %v1131_v28, %v1060_v29  ;;  %v539_v29 = vsel %vm517_vm2, %v363_v6, 0  ;;  %vm496_vm2 = vcmp.eq.s32.totalorder %v474_v21, 1 }
 0x1a5   : > { %v936_v25 = vpop.f32.mrf.mxu2  ;;  %2065 = vmatmul.msk.bf16.gmra.mxu3 %vm605_vm9, %v1438_v52  ;;  %v1334_v9 = vunpack.c.l.b16 %v539_v29  ;;  %v1439_v54 = vrot.slane %v2675_v49, 1  ;;  %v1561_v52 = vor.u32 %v1560_v17, %v1559_v11  ;;  %vm2776_vm4 = vmpackc.low %vm496_vm2, %vm496_vm2  ;;  %v2786_v6 = vor.u32 %v1230_v45, %v1228_v32 }
 0x1a6   : > { %2047 = vmatmul.msk.bf16.gmra.mxu1 %vm605_vm9, %v2711_v38  ;;  %2073 = vmatmul.msk.bf16.gmra.mxu0 %vm605_vm9, %v1558_v16  ;;  %v962_v19 = vadd.f32 %v934_v43, %v821_v61  ;;  %v1563_v21 = vrot.slane %v1230_v45, 1 }
 0x1a7   : > { %v2772_v34 = vpack.c.b16 %v1334_v9, %v2764_v5  ;;  %v1440_v61 = vsel %vm1427_vm5, %v1437_v40, %v1439_v54  ;;  %v1562_v13 = vsel %vm1539_vm10, %v1557_v10, %v1561_v52 }
 0x1a8   : > { %v1034_v12 = vpop.f32.mrf.mxu3 }
 0x1a9   : > { %v1062_v35 = vadd.f32 %v1034_v12, %v962_v19  ;;  %v1339_v2 = vshll.u32 %v2772_v34, 16  ;;  %v1441_v11 = vrot.slane %v2772_v34, 1 }
 0x1aa   : > { %2057 = vmatmul.msk.bf16.gmra.mxu2 %vm605_vm9, %v2760_v37 }
 0x1ab   : > { %v822_v15 = vpop.f32.mrf.mxu1  ;;  %v1133_v38 = vpop.f32.mrf.mxu0  ;;  %v1341_v62 = vrot.slane %v1339_v2, 1 }
 0x1ac   : > { %v823_v47 = vadd.f32 %v822_v15, %v2627_v26  ;;  %v2767_v43 = vadd.f32 %v1133_v38, %v1061_v30  ;;  %v364_v26 = vld [vmem:[#allocation2 + $0x54] sm:$0xf] }
 0x1ad   : > { %v939_v39 = vpop.f32.mrf.mxu2  ;;  %v540_v19 = vsel %vm2776_vm4, %v364_v26, 0  ;;  %v1342_v29 = vsel %vm1177_vm6, %v2786_v6, %v1341_v62 }
 0x1ae   : > { %v963_v48 = vadd.f32 %v936_v25, %v823_v47  ;;  %v1335_v12 = vunpack.c.l.b16 %v540_v19  ;;  %v1564_v47 = vrot.slane %v1226_v53, 2 }
 0x1b0   : > { %v1036_v14 = vpop.f32.mrf.mxu3  ;;  %v2797_v38 = vpack.c.b16 %v1335_v12, %v1335_v12  ;;  %v1565_v26 = vor.u32 %v1564_v47, %v1563_v21 }
 0x1b1   : > { %v1063_v28 = vadd.f32 %v1036_v14, %v963_v48 }
 0x1b2   : > { %v1347_v48 = vshll.u32 %v2797_v38, 16 }
 0x1b3   : > { %v825_v59 = vpop.f32.mrf.mxu1  ;;  %v1136_v8 = vpop.f32.mrf.mxu0 }
 0x1b4   : > { %v826_v25 = vadd.f32 %v825_v59, %v2640_v50  ;;  %v2783_v44 = vadd.f32 %v1136_v8, %v1062_v35  ;;  %v1442_v8 = vsel %vm1427_vm5, %v1439_v54, %v1441_v11  ;;  %v1349_v53 = vrot.slane %v1347_v48, 1 }
 0x1b5   : > { %v941_v16 = vpop.f32.mrf.mxu2  ;;  %2066 = vmatmul.msk.bf16.gmra.mxu3 %vm605_vm9, %v1440_v61  ;;  %v1566_v61 = vsel %vm1539_vm10, %v1561_v52, %v1565_v26 }
 0x1b6   : > { %2048 = vmatmul.msk.bf16.gmra.mxu1 %vm605_vm9, %v2732_v42  ;;  %2074 = vmatmul.msk.bf16.gmra.mxu0 %vm605_vm9, %v1562_v13  ;;  %v964_v40 = vadd.f32 %v939_v39, %v826_v25 }
 0x1b8   : > { %v1039_v50 = vpop.f32.mrf.mxu3 }
 0x1b9   : > { %v1064_v35 = vadd.f32 %v1039_v50, %v964_v40 }
 0x1ba   : > { %2058 = vmatmul.msk.bf16.gmra.mxu2 %vm605_vm9, %v1342_v29 }
 0x1bb   : > { %v827_v32 = vpop.f32.mrf.mxu1  ;;  %v1138_v15 = vpop.f32.mrf.mxu0 }
 0x1bc   : > { %v828_v10 = vadd.f32 %v827_v32, %v2651_v36  ;;  %v2800_v9 = vadd.f32 %v1138_v15, %v1063_v28  ;;  %v1343_v36 = vshrl.u32 %v2772_v34, 16  ;;  %v1443_v32 = vrot.slane %v2797_v38, 1 }
 0x1bd   : > { %v944_v42 = vpop.f32.mrf.mxu2 }
 0x1be   : > { %v965_v39 = vadd.f32 %v941_v16, %v828_v10  ;;  %v1345_v16 = vor.u32 %v1343_v36, %v1341_v62  ;;  %v1567_v12 = vrot.slane %v1343_v36, 1 }
 0x1c0   : > { %v1041_v17 = vpop.f32.mrf.mxu3  ;;  %v1350_v34 = vsel %vm1177_vm6, %v1345_v16, %v1349_v53 }
 0x1c1   : > { %v1065_v14 = vadd.f32 %v1041_v17, %v965_v39 }
 0x1c3   : > { %v830_v30 = vpop.f32.mrf.mxu1  ;;  %v1141_v59 = vpop.f32.mrf.mxu0 }
 0x1c4   : > { %v831_v28 = vadd.f32 %v830_v30, %v2633_v41  ;;  %v2809_v45 = vadd.f32 %v1141_v59, %v1064_v35  ;;  %v1176_v41 = vpack.c.b16 %v2764_v5, %v2764_v5  ;;  %v1568_v35 = vrot.slane %v1339_v2, 2 }
 0x1c5   : > { %v946_v49 = vpop.f32.mrf.mxu2  ;;  %2067 = vmatmul.msk.bf16.gmra.mxu3 %vm605_vm9, %v1442_v8  ;;  %v1444_v5 = vsel %vm1427_vm5, %v1441_v11, %v1443_v32  ;;  %v1571_v11 = vshrl.u32 %v2797_v38, 16 }
 0x1c6   : > { %2049 = vmatmul.msk.bf16.gmra.mxu1 %vm605_vm9, %v2760_v37  ;;  %2075 = vmatmul.msk.bf16.gmra.mxu0 %vm605_vm9, %v1566_v61  ;;  %v966_v25 = vadd.f32 %v944_v42, %v831_v28  ;;  %v1234_v62 = vshll.u32 %v1176_v41, 16  ;;  %v1569_v42 = vor.u32 %v1568_v35, %v1567_v12 }
 0x1c8   : > { %v1044_v54 = vpop.f32.mrf.mxu3  ;;  %v1236_v21 = vrot.slane %v1234_v62, 1  ;;  %v1570_v30 = vsel %vm1539_vm10, %v1565_v26, %v1569_v42 }
 0x1c9   : > { %v1066_v19 = vadd.f32 %v1044_v54, %v966_v25  ;;  %v1573_v25 = vrot.slane %v1571_v11, 1 }
 0x1ca   : > { %2059 = vmatmul.msk.bf16.gmra.mxu2 %vm605_vm9, %v1350_v34  ;;  %v1237_v2 = vsel %vm1177_vm6, %v2786_v6, %v1236_v21  ;;  %v1574_v6 = vrot.slane %v1347_v48, 2  ;;  %vm1813_vm6 = vcmask 27648  }
 0x1cb   : > { %v832_v13 = vpop.f32.mrf.mxu1  ;;  %v1143_v40 = vpop.f32.mrf.mxu0 }
 0x1cc   : > { %v833_v52 = vadd.f32 %v832_v13, %v2645_v27  ;;  %v2821_v50 = vadd.f32 %v1143_v40, %v1065_v14 }
 0x1cd   : > { %v949_v37 = vpop.f32.mrf.mxu2 }
 0x1ce   : > { %v967_v29 = vadd.f32 %v946_v49, %v833_v52 }
 0x1d0   : > { %v1046_v15 = vpop.f32.mrf.mxu3 }
 0x1d1   : > { %v1067_v10 = vadd.f32 %v1046_v15, %v967_v29  ;;  %v2848_v15 = vld [vmem:[%s2987_s3] ss:$0 sm:$0xff] }
 0x1d3   : > { %v835_v47 = vpop.f32.mrf.mxu1  ;;  %v1146_v39 = vpop.f32.mrf.mxu0 }
 0x1d4   : > { %v836_v17 = vadd.f32 %v835_v47, %v2659_v63  ;;  %v2826_v27 = vadd.f32 %v1146_v39, %v1066_v19  ;;  %v1575_v19 = vor.u32 %v1574_v6, %v1573_v25 }
 0x1d5   : > { %v951_v14 = vpop.f32.mrf.mxu2  ;;  %2068 = vmatmul.msk.bf16.gmra.mxu3 %vm605_vm9, %v1444_v5 }
 0x1d6   : > { %2050 = vmatmul.msk.bf16.gmra.mxu1 %vm605_vm9, %v1237_v2  ;;  %2076 = vmatmul.msk.bf16.gmra.mxu0 %vm605_vm9, %v1570_v30  ;;  %v968_v59 = vadd.f32 %v949_v37, %v836_v17  ;;  %v1576_v38 = vsel %vm1539_vm10, %v1569_v42, %v1575_v19 }
 0x1d8   : > { %v1049_v8 = vpop.f32.mrf.mxu3 }
 0x1d9   : > { %v1068_v36 = vadd.f32 %v1049_v8, %v968_v59 }
 0x1db   : > { %v837_v63 = vpop.f32.mrf.mxu1  ;;  %v1148_v28 = vpop.f32.mrf.mxu0 }
 0x1dc   : > { %v838_v49 = vadd.f32 %v837_v63, %v2667_v58  ;;  %v2836_v53 = vadd.f32 %v1148_v28, %v1067_v10 }
 0x1dd   : > { %v1369_v61 = vpop.f32.mrf.mxu2 }
 0x1de   : > { %v969_v16 = vadd.f32 %v951_v14, %v838_v49 }
 0x1e0   : > { %v1051_v26 = vpop.f32.mrf.mxu3 }
 0x1e1   : > { %v1069_v54 = vadd.f32 %v1051_v26, %v969_v16 }
 0x1e3   : > { %v1151_v34 = vpop.f32.mrf.mxu0  ;;  %v1274_v41 = vpop.f32.mrf.mxu1 }
 0x1e4   : > { %v2838_v13 = vadd.f32 %v1151_v34, %v1068_v36  ;;  %v1314_v12 = vadd.f32 %v1274_v41, %v2689_v7 }
 0x1e5   : > { %v1371_v40 = vpop.f32.mrf.mxu2 }
 0x1e6   : > { %2077 = vmatmul.msk.bf16.gmra.mxu0 %vm605_vm9, %v1576_v38  ;;  %v1409_v62 = vadd.f32 %v1369_v61, %v1314_v12 }
 0x1e8   : > { %v1481_v52 = vpop.f32.mrf.mxu3 }
 0x1e9   : > { %v1521_v32 = vadd.f32 %v1481_v52, %v1409_v62 }
 0x1eb   : > { %v1153_v58 = vpop.f32.mrf.mxu0  ;;  %v1276_v37 = vpop.f32.mrf.mxu1 }
 0x1ec   : > { %v2843_v35 = vadd.f32 %v1153_v58, %v1069_v54  ;;  %v1315_v21 = vadd.f32 %v1276_v37, %v2697_v0 }
 0x1ed   : > { %v1374_v48 = vpop.f32.mrf.mxu2 }
 0x1ee   : > { %v1410_v17 = vadd.f32 %v1371_v40, %v1315_v21 }
 0x1f0   : > { %v1483_v29 = vpop.f32.mrf.mxu3 }
 0x1f1   : > { %v1522_v2 = vadd.f32 %v1483_v29, %v1410_v17 }
 0x1f3   : > { %v1279_v10 = vpop.f32.mrf.mxu1  ;;  %v1613_v42 = vpop.f32.mrf.mxu0 }
 0x1f4   : > { %v1653_v47 = vadd.f32 %v1613_v42, %v1521_v32  ;;  %v1316_v8 = vadd.f32 %v1279_v10, %v2703_v31 }
 0x1f5   : > { %v1376_v39 = vpop.f32.mrf.mxu2 }
 0x1f6   : > { %v1673_v7 = vadd.f32 %v2848_v15, %v1653_v47  ;;  %v1411_v61 = vadd.f32 %v1374_v48, %v1316_v8 }
 0x1f8   : > { %v1486_v5 = vpop.f32.mrf.mxu3  ;;  %v1797_v14 = vpack.c.bf16 %v1673_v7, %v1673_v7  ;;  %v1689_v36 = vsel %vm478_vm8, %v1673_v7, 0.0 }
 0x1f9   : > { %v1743_v28 = vmul.f32 %v1689_v36, %v1689_v36  ;;  %v1705_v16 = vsel %vm605_vm9, %v1689_v36, 0.0  ;;  %v1523_v31 = vadd.f32 %v1486_v5, %v1411_v61 }
 0x1fa   : > { %1814 = vst.msk [vmem:[%s2172_s12] sm:$0xf] %vm1813_vm6, %v1797_v14 }
 0x1fb   : > { %v1281_v30 = vpop.f32.mrf.mxu1  ;;  %v1615_v59 = vpop.f32.mrf.mxu0  ;;  %v1759_v51 = vsel %vm605_vm9, %v1743_v28, 0.0 }
 0x1fc   : > { %v1654_v0 = vadd.f32 %v1615_v59, %v1522_v2  ;;  %v1317_v60 = vadd.f32 %v1281_v30, %v2716_v33 }
 0x1fd   : > { %v1379_v11 = vpop.f32.mrf.mxu2 }
 0x1fe   : > { %v1674_v63 = vadd.f32 %v2848_v15, %v1654_v0  ;;  %v1412_v48 = vadd.f32 %v1376_v39, %v1317_v60 }
 0x200   : > { %v1488_v49 = vpop.f32.mrf.mxu3  ;;  %v1690_v25 = vsel %vm479_vm14, %v1674_v63, 0.0  ;;  %v1798_v6 = vpack.c.bf16 %v1674_v63, %v1674_v63  ;;  %vm3027_vm14 = vcmp.eq.s32.totalorder %v2300_v18, 1 }
 0x201   : > { %v1706_v26 = vsel %vm605_vm9, %v1690_v25, 0.0  ;;  %v1744_v54 = vmul.f32 %v1690_v25, %v1690_v25  ;;  %v1524_v42 = vadd.f32 %v1488_v49, %v1412_v48 }
 0x202   : > { %v1707_v19 = vadd.f32 %v1706_v26, %v1705_v16  ;;  %1815 = vst.msk [vmem:[%s2172_s12 + $0x4] sm:$0xf] %vm1813_vm6, %v1798_v6 }
 0x203   : > { %v1760_v34 = vsel %vm605_vm9, %v1744_v54, 0.0  ;;  %v1284_v41 = vpop.f32.mrf.mxu1  ;;  %v1618_v40 = vpop.f32.mrf.mxu0 }
 0x204   : > { %v1761_v38 = vadd.f32 %v1760_v34, %v1759_v51  ;;  %v1655_v52 = vadd.f32 %v1618_v40, %v1523_v31  ;;  %v1318_v5 = vadd.f32 %v1284_v41, %v2722_v55 }
 0x205   : > { %v1381_v58 = vpop.f32.mrf.mxu2 }
 0x206   : > { %v1675_v37 = vadd.f32 %v2848_v15, %v1655_v52  ;;  %v1413_v30 = vadd.f32 %v1379_v11, %v1318_v5 }
 0x208   : > { %v1491_v12 = vpop.f32.mrf.mxu3  ;;  %v1691_v29 = vsel %vm480_vm0, %v1675_v37, 0.0  ;;  %v1799_v62 = vpack.c.bf16 %v1675_v37, %v1675_v37  ;;  %vm3029_vm0 = vcmp.eq.s32.totalorder %v2244_v57, 1 }
 0x209   : > { %v1708_v32 = vsel %vm605_vm9, %v1691_v29, 0.0  ;;  %v1745_v10 = vmul.f32 %v1691_v29, %v1691_v29  ;;  %v1525_v63 = vadd.f32 %v1491_v12, %v1413_v30 }
 0x20a   : > { %v1709_v21 = vadd.f32 %v1708_v32, %v1707_v19  ;;  %1816 = vst.msk [vmem:[%s2172_s12 + $0x8] sm:$0xf] %vm1813_vm6, %v1799_v62 }
 0x20b   : > { %v1762_v33 = vsel %vm605_vm9, %v1745_v10, 0.0  ;;  %v1286_v47 = vpop.f32.mrf.mxu1  ;;  %v1620_v7 = vpop.f32.mrf.mxu0 }
 0x20c   : > { %v1763_v17 = vadd.f32 %v1762_v33, %v1761_v38  ;;  %v1656_v39 = vadd.f32 %v1620_v7, %v1524_v42  ;;  %v1319_v25 = vadd.f32 %v1286_v47, %v2737_v23 }
 0x20d   : > { %v1384_v14 = vpop.f32.mrf.mxu2 }
 0x20e   : > { %v1676_v24 = vadd.f32 %v2848_v15, %v1656_v39  ;;  %v1414_v54 = vadd.f32 %v1381_v58, %v1319_v25 }
 0x210   : > { %v1493_v2 = vpop.f32.mrf.mxu3  ;;  %v1692_v59 = vsel %vm481_vm15, %v1676_v24, 0.0  ;;  %v1800_v8 = vpack.c.bf16 %v1676_v24, %v1676_v24  ;;  %vm3028_vm15 = vcmp.eq.s32.totalorder %v2242_v56, 1 }
 0x211   : > { %v1710_v36 = vsel %vm605_vm9, %v1692_v59, 0.0  ;;  %v1746_v0 = vmul.f32 %v1692_v59, %v1692_v59  ;;  %v1526_v41 = vadd.f32 %v1493_v2, %v1414_v54 }
 0x212   : > { %v1711_v28 = vadd.f32 %v1710_v36, %v1709_v21  ;;  %1817 = vst.msk [vmem:[%s2172_s12 + $0xc] sm:$0xf] %vm1813_vm6, %v1800_v8 }
 0x213   : > { %v1764_v55 = vsel %vm605_vm9, %v1746_v0, 0.0  ;;  %v1289_v49 = vpop.f32.mrf.mxu1  ;;  %v1623_v61 = vpop.f32.mrf.mxu0 }
 0x214   : > { %v1765_v6 = vadd.f32 %v1764_v55, %v1763_v17  ;;  %v1657_v11 = vadd.f32 %v1623_v61, %v1525_v63  ;;  %v1320_v52 = vadd.f32 %v1289_v49, %v2747_v46 }
 0x215   : > { %v1386_v16 = vpop.f32.mrf.mxu2 }
 0x216   : > { %v1677_v22 = vadd.f32 %v2848_v15, %v1657_v11  ;;  %v1415_v48 = vadd.f32 %v1384_v14, %v1320_v52 }
 0x218   : > { %v1496_v26 = vpop.f32.mrf.mxu3  ;;  %v1693_v31 = vsel %vm482_vm11, %v1677_v22, 0.0  ;;  %v1801_v19 = vpack.c.bf16 %v1677_v22, %v1677_v22  ;;  %vm3025_vm11 = vcmp.eq.s32.totalorder %v2302_v20, 1 }
 0x219   : > { %v1712_v51 = vsel %vm605_vm9, %v1693_v31, 0.0  ;;  %v1747_v34 = vmul.f32 %v1693_v31, %v1693_v31  ;;  %v1527_v21 = vadd.f32 %v1496_v26, %v1415_v48 }
 0x21a   : > { %v1713_v40 = vadd.f32 %v1712_v51, %v1711_v28  ;;  %1818 = vst.msk [vmem:[%s2172_s12 + $0x10] sm:$0xf] %vm1813_vm6, %v1801_v19 }
 0x21b   : > { %v1766_v23 = vsel %vm605_vm9, %v1747_v34, 0.0  ;;  %v1291_v60 = vpop.f32.mrf.mxu1  ;;  %v1625_v38 = vpop.f32.mrf.mxu0 }
 0x21c   : > { %v1767_v37 = vadd.f32 %v1766_v23, %v1765_v6  ;;  %v1658_v58 = vadd.f32 %v1625_v38, %v1526_v41  ;;  %v1321_v5 = vadd.f32 %v1291_v60, %v2767_v43 }
 0x21d   : > { %v1389_v32 = vpop.f32.mrf.mxu2 }
 0x21e   : > { %v1678_v1 = vadd.f32 %v2848_v15, %v1658_v58  ;;  %v1416_v24 = vadd.f32 %v1386_v16, %v1321_v5 }
 0x220   : > { %v1498_v12 = vpop.f32.mrf.mxu3  ;;  %v1694_v29 = vsel %vm483_vm13, %v1678_v1, 0.0  ;;  %v1802_v62 = vpack.c.bf16 %v1678_v1, %v1678_v1  ;;  %vm3026_vm13 = vcmp.eq.s32.totalorder %v2270_v3, 1 }
 0x221   : > { %v1714_v10 = vsel %vm605_vm9, %v1694_v29, 0.0  ;;  %v1748_v42 = vmul.f32 %v1694_v29, %v1694_v29  ;;  %v1528_v36 = vadd.f32 %v1498_v12, %v1416_v24 }
 0x222   : > { %v1715_v33 = vadd.f32 %v1714_v10, %v1713_v40  ;;  %1819 = vst.msk [vmem:[%s2172_s12 + $0x14] sm:$0xf] %vm1813_vm6, %v1802_v62 }
 0x223   : > { %v1768_v46 = vsel %vm605_vm9, %v1748_v42, 0.0  ;;  %v1294_v47 = vpop.f32.mrf.mxu1  ;;  %v1628_v7 = vpop.f32.mrf.mxu0 }
 0x224   : > { %v1769_v17 = vadd.f32 %v1768_v46, %v1767_v37  ;;  %v1659_v39 = vadd.f32 %v1628_v7, %v1527_v21  ;;  %v1322_v49 = vadd.f32 %v1294_v47, %v2783_v44 }
 0x225   : > { %v1391_v63 = vpop.f32.mrf.mxu2 }
 0x226   : > { %v1679_v4 = vadd.f32 %v2848_v15, %v1659_v39  ;;  %v1417_v11 = vadd.f32 %v1389_v32, %v1322_v49 }
 0x228   : > { %v1501_v14 = vpop.f32.mrf.mxu3  ;;  %v1695_v2 = vsel %vm3025_vm11, %v1679_v4, 0.0  ;;  %v1803_v30 = vpack.c.bf16 %v1679_v4, %v1679_v4 }
 0x229   : > { %v1716_v59 = vsel %vm605_vm9, %v1695_v2, 0.0  ;;  %v1749_v8 = vmul.f32 %v1695_v2, %v1695_v2  ;;  %v1529_v31 = vadd.f32 %v1501_v14, %v1417_v11 }
 0x22a   : > { %v1717_v0 = vadd.f32 %v1716_v59, %v1715_v33  ;;  %1820 = vst.msk [vmem:[%s2172_s12 + $0x18] sm:$0xf] %vm1813_vm6, %v1803_v30 }
 0x22b   : > { %v1770_v43 = vsel %vm605_vm9, %v1749_v8, 0.0  ;;  %v1296_v28 = vpop.f32.mrf.mxu1  ;;  %v1630_v55 = vpop.f32.mrf.mxu0 }
 0x22c   : > { %v1771_v61 = vadd.f32 %v1770_v43, %v1769_v17  ;;  %v1660_v25 = vadd.f32 %v1630_v55, %v1528_v36  ;;  %v1323_v41 = vadd.f32 %v1296_v28, %v2800_v9 }
 0x22d   : > { %v1394_v23 = vpop.f32.mrf.mxu2 }
 0x22e   : > { %v1680_v20 = vadd.f32 %v2848_v15, %v1660_v25  ;;  %v1418_v52 = vadd.f32 %v1391_v63, %v1323_v41 }
 0x230   : > { %v1503_v6 = vpop.f32.mrf.mxu3  ;;  %v1696_v22 = vsel %vm3026_vm13, %v1680_v20, 0.0  ;;  %v1804_v16 = vpack.c.bf16 %v1680_v20, %v1680_v20 }
 0x231   : > { %v1718_v26 = vsel %vm605_vm9, %v1696_v22, 0.0  ;;  %v1750_v54 = vmul.f32 %v1696_v22, %v1696_v22  ;;  %v1530_v48 = vadd.f32 %v1503_v6, %v1418_v52 }
 0x232   : > { %v1719_v19 = vadd.f32 %v1718_v26, %v1717_v0  ;;  %1821 = vst.msk [vmem:[%s2172_s12 + $0x1c] sm:$0xf] %vm1813_vm6, %v1804_v16 }
 0x233   : > { %v1772_v51 = vsel %vm605_vm9, %v1750_v54, 0.0  ;;  %v1299_v44 = vpop.f32.mrf.mxu1  ;;  %v1633_v34 = vpop.f32.mrf.mxu0  ;;  %v3030_v54 = vld [vmem:[#allocation10_spill] sm:$0xff] }
 0x234   : > { %v1773_v40 = vadd.f32 %v1772_v51, %v1771_v61  ;;  %v1661_v60 = vadd.f32 %v1633_v34, %v1529_v31  ;;  %v1324_v10 = vadd.f32 %v1299_v44, %v2809_v45  ;;  %vm3031_vm8 = vcmp.eq.s32.totalorder %v3030_v54, 1 }
 0x235   : > { %v1396_v33 = vpop.f32.mrf.mxu2 }
 0x236   : > { %v1681_v3 = vadd.f32 %v2848_v15, %v1661_v60  ;;  %v1419_v47 = vadd.f32 %v1394_v23, %v1324_v10 }
 0x238   : > { %v1506_v38 = vpop.f32.mrf.mxu3  ;;  %v1697_v37 = vsel %vm3027_vm14, %v1681_v3, 0.0  ;;  %v1805_v58 = vpack.c.bf16 %v1681_v3, %v1681_v3 }
 0x239   : > { %v1720_v1 = vsel %vm605_vm9, %v1697_v37, 0.0  ;;  %v1751_v12 = vmul.f32 %v1697_v37, %v1697_v37  ;;  %v1531_v4 = vadd.f32 %v1506_v38, %v1419_v47 }
 0x23a   : > { %v1721_v29 = vadd.f32 %v1720_v1, %v1719_v19  ;;  %1822 = vst.msk [vmem:[%s2172_s12 + $0x20] sm:$0xf] %vm1813_vm6, %v1805_v58 }
 0x23b   : > { %v1774_v9 = vsel %vm605_vm9, %v1751_v12, 0.0  ;;  %v1301_v62 = vpop.f32.mrf.mxu1  ;;  %v1635_v32 = vpop.f32.mrf.mxu0  ;;  %v3032_v12 = vld [vmem:[#allocation9_spill] sm:$0xff] }
 0x23c   : > { %v1775_v42 = vadd.f32 %v1774_v9, %v1773_v40  ;;  %v1662_v21 = vadd.f32 %v1635_v32, %v1530_v48  ;;  %v1325_v30 = vadd.f32 %v1301_v62, %v2821_v50  ;;  %vm3033_vm5 = vcmp.eq.s32.totalorder %v3032_v12, 1 }
 0x23d   : > { %v1399_v36 = vpop.f32.mrf.mxu2 }
 0x23e   : > { %v1682_v18 = vadd.f32 %v2848_v15, %v1662_v21  ;;  %v1420_v0 = vadd.f32 %v1396_v33, %v1325_v30 }
 0x240   : > { %v1508_v46 = vpop.f32.mrf.mxu3  ;;  %v1698_v7 = vsel %vm3028_vm15, %v1682_v18, 0.0  ;;  %v1806_v5 = vpack.c.bf16 %v1682_v18, %v1682_v18 }
 0x241   : > { %v1722_v17 = vsel %vm605_vm9, %v1698_v7, 0.0  ;;  %v1752_v39 = vmul.f32 %v1698_v7, %v1698_v7  ;;  %v1532_v61 = vadd.f32 %v1508_v46, %v1420_v0 }
 0x242   : > { %v1723_v14 = vadd.f32 %v1722_v17, %v1721_v29  ;;  %1823 = vst.msk [vmem:[%s2172_s12 + $0x24] sm:$0xf] %vm1813_vm6, %v1806_v5 }
 0x243   : > { %v1776_v45 = vsel %vm605_vm9, %v1752_v39, 0.0  ;;  %v1304_v24 = vpop.f32.mrf.mxu1  ;;  %v1638_v2 = vpop.f32.mrf.mxu0 }
 0x244   : > { %v1777_v59 = vadd.f32 %v1776_v45, %v1775_v42  ;;  %v1663_v8 = vadd.f32 %v1638_v2, %v1531_v4  ;;  %v1326_v6 = vadd.f32 %v1304_v24, %v2826_v27 }
 0x245   : > { %v1401_v34 = vpop.f32.mrf.mxu2 }
 0x246   : > { %v1683_v56 = vadd.f32 %v2848_v15, %v1663_v8  ;;  %v1421_v26 = vadd.f32 %v1399_v36, %v1326_v6 }
 0x248   : > { %v1699_v63 = vsel %vm3029_vm0, %v1683_v56, 0.0  ;;  %v1807_v43 = vpack.c.bf16 %v1683_v56, %v1683_v56  ;;  %v1511_v49 = vpop.f32.mrf.mxu3 }
 0x249   : > { %v1724_v28 = vsel %vm605_vm9, %v1699_v63, 0.0  ;;  %v1753_v55 = vmul.f32 %v1699_v63, %v1699_v63  ;;  %v1533_v41 = vadd.f32 %v1511_v49, %v1421_v26  ;;  %v3036_v26 = vld [vmem:[#allocation13_spill] sm:$0xff] }
 0x24a   : > { %v1725_v25 = vadd.f32 %v1724_v28, %v1723_v14  ;;  %1824 = vst.msk [vmem:[%s2172_s12 + $0x28] sm:$0xf] %vm1813_vm6, %v1807_v43 }
 0x24b   : > { %v1778_v50 = vsel %vm605_vm9, %v1753_v55, 0.0  ;;  %v1640_v20 = vpop.f32.mrf.mxu0  ;;  %v1306_v16 = vpop.f32.mrf.mxu1 }
 0x24c   : > { %v1779_v11 = vadd.f32 %v1778_v50, %v1777_v59  ;;  %v1664_v22 = vadd.f32 %v1640_v20, %v1532_v61  ;;  %v1327_v3 = vadd.f32 %v1306_v16, %v2836_v53 }
 0x24d   : > { %v1404_v46 = vpop.f32.mrf.mxu2 }
 0x24e   : > { %v1684_v57 = vadd.f32 %v2848_v15, %v1664_v22  ;;  %v1422_v1 = vadd.f32 %v1401_v34, %v1327_v3 }
 0x250   : > { %v1700_v31 = vsel %vm3031_vm8, %v1684_v57, 0.0  ;;  %v1808_v19 = vpack.c.bf16 %v1684_v57, %v1684_v57  ;;  %v1513_v23 = vpop.f32.mrf.mxu3 }
 0x251   : > { %v1726_v51 = vsel %vm605_vm9, %v1700_v31, 0.0  ;;  %v1754_v44 = vmul.f32 %v1700_v31, %v1700_v31  ;;  %v1534_v32 = vadd.f32 %v1513_v23, %v1422_v1 }
 0x252   : > { %v1727_v40 = vadd.f32 %v1726_v51, %v1725_v25  ;;  %1825 = vst.msk [vmem:[%s2172_s12 + $0x2c] sm:$0xf] %vm1813_vm6, %v1808_v19 }
 0x253   : > { %v1780_v27 = vsel %vm605_vm9, %v1754_v44, 0.0  ;;  %v1643_v60 = vpop.f32.mrf.mxu0  ;;  %v1309_v58 = vpop.f32.mrf.mxu1 }
 0x254   : > { %v1781_v38 = vadd.f32 %v1780_v27, %v1779_v11  ;;  %v1665_v52 = vadd.f32 %v1643_v60, %v1533_v41  ;;  %v1328_v21 = vadd.f32 %v1309_v58, %v2838_v13 }
 0x255   : > { %v1406_v63 = vpop.f32.mrf.mxu2 }
 0x256   : > { %v1685_v37 = vadd.f32 %v2848_v15, %v1665_v52  ;;  %v1423_v5 = vadd.f32 %v1404_v46, %v1328_v21 }
 0x258   : > { %v1701_v48 = vsel %vm3033_vm5, %v1685_v37, 0.0  ;;  %v1809_v29 = vpack.c.bf16 %v1685_v37, %v1685_v37  ;;  %v1516_v47 = vpop.f32.mrf.mxu3 }
 0x259   : > { %v1728_v9 = vsel %vm605_vm9, %v1701_v48, 0.0  ;;  %v1755_v62 = vmul.f32 %v1701_v48, %v1701_v48  ;;  %v1535_v2 = vadd.f32 %v1516_v47, %v1423_v5 }
 0x25a   : > { %v1729_v10 = vadd.f32 %v1728_v9, %v1727_v40  ;;  %1826 = vst.msk [vmem:[%s2172_s12 + $0x30] sm:$0xf] %vm1813_vm6, %v1809_v29 }
 0x25b   : > { %v1782_v42 = vsel %vm605_vm9, %v1755_v62, 0.0  ;;  %v1645_v53 = vpop.f32.mrf.mxu0  ;;  %v1311_v14 = vpop.f32.mrf.mxu1 }
 0x25c   : > { %v1783_v33 = vadd.f32 %v1782_v42, %v1781_v38  ;;  %v1666_v18 = vadd.f32 %v1645_v53, %v1534_v32  ;;  %v1329_v8 = vadd.f32 %v1311_v14, %v2843_v35 }
 0x25e   : > { %v1686_v7 = vadd.f32 %v2848_v15, %v1666_v18  ;;  %v1424_v28 = vadd.f32 %v1406_v63, %v1329_v8 }
 0x260   : > { %v1702_v39 = vsel %vm491_vm1, %v1686_v7, 0.0  ;;  %v1810_v4 = vpack.c.bf16 %v1686_v7, %v1686_v7  ;;  %v1518_v43 = vpop.f32.mrf.mxu3  ;;  %vm3037_vm1 = vcmp.eq.s32.totalorder %v3036_v26, 1 }
 0x261   : > { %v1730_v45 = vsel %vm605_vm9, %v1702_v39, 0.0  ;;  %v1756_v24 = vmul.f32 %v1702_v39, %v1702_v39  ;;  %v1536_v20 = vadd.f32 %v1518_v43, %v1424_v28 }
 0x262   : > { %v1731_v30 = vadd.f32 %v1730_v45, %v1729_v10  ;;  %1827 = vst.msk [vmem:[%s2172_s12 + $0x34] sm:$0xf] %vm1813_vm6, %v1810_v4 }
 0x263   : > { %v1784_v13 = vsel %vm605_vm9, %v1756_v24, 0.0  ;;  %v1648_v59 = vpop.f32.mrf.mxu0 }
 0x264   : > { %v1785_v56 = vadd.f32 %v1784_v13, %v1783_v33  ;;  %v1667_v36 = vadd.f32 %v1648_v59, %v1535_v2 }
 0x266   : > { %v1687_v0 = vadd.f32 %v2848_v15, %v1667_v36 }
 0x268   : > { %v1703_v49 = vsel %vm492_vm12, %v1687_v0, 0.0  ;;  %v1811_v61 = vpack.c.bf16 %v1687_v0, %v1687_v0 }
 0x269   : > { %v1732_v25 = vsel %vm605_vm9, %v1703_v49, 0.0  ;;  %v1757_v50 = vmul.f32 %v1703_v49, %v1703_v49 }
 0x26a   : > { %v1733_v6 = vadd.f32 %v1732_v25, %v1731_v30  ;;  %1828 = vst.msk [vmem:[%s2172_s12 + $0x38] sm:$0xf] %vm1813_vm6, %v1811_v61 }
 0x26b   : > { %v1786_v35 = vsel %vm605_vm9, %v1757_v50, 0.0  ;;  %v1650_v11 = vpop.f32.mrf.mxu0 }
 0x26c   : > { %v1787_v22 = vadd.f32 %v1786_v35, %v1785_v56  ;;  %v1668_v16 = vadd.f32 %v1650_v11, %v1536_v20 }
 0x26e   : > { %v1688_v57 = vadd.f32 %v2848_v15, %v1668_v16 }
 0x270   : > { %v1704_v54 = vsel %vm3037_vm1, %v1688_v57, 0.0  ;;  %v1812_v31 = vpack.c.bf16 %v1688_v57, %v1688_v57 }
 0x271   : > { %v1734_v19 = vsel %vm605_vm9, %v1704_v54, 0.0  ;;  %v1758_v51 = vmul.f32 %v1704_v54, %v1704_v54 }
 0x272   : > { %v1735_v44 = vadd.f32 %v1734_v19, %v1733_v6  ;;  %1829 = vst.msk [vmem:[%s2172_s12 + $0x3c] sm:$0xf] %vm1813_vm6, %v1812_v31 }
 0x273   : > { %v1788_v34 = vsel %vm605_vm9, %v1758_v51, 0.0 }
 0x274   : > { %v1736_v41 = vrot.slane %v1735_v44, 4  ;;  %v1789_v40 = vadd.f32 %v1788_v34, %v1787_v22 }
 0x276   : > { %v1737_v27 = vadd.f32 %v1736_v41, %v1735_v44  ;;  %v1790_v23 = vrot.slane %v1789_v40, 4 }
 0x278   : > { %v1738_v60 = vrot.slane %v1737_v27, 2  ;;  %v1791_v15 = vadd.f32 %v1790_v23, %v1789_v40 }
 0x27a   : > { %v1739_v3 = vadd.f32 %v1738_v60, %v1737_v27  ;;  %v1792_v38 = vrot.slane %v1791_v15, 2 }
 0x27c   : > { %v1740_v52 = vrot.slane %v1739_v3, 1  ;;  %v1793_v37 = vadd.f32 %v1792_v38, %v1791_v15 }
 0x27e   : > { %v1741_v58 = vadd.f32 %v1740_v52, %v1739_v3  ;;  %v1794_v1 = vrot.slane %v1793_v37, 1 }
 0x280   : > { %1742 = vst.msk [vmem:[%s2167_s9] sm:$0xff] %vm605_vm9, %v1741_v58  ;;  %v1795_v12 = vadd.f32 %v1794_v1, %v1793_v37 }
 0x282   : > { %1796 = vst.msk [vmem:[%s2177_s15] sm:$0xff] %vm605_vm9, %v1795_v12 }
 0x283 PF: > { %s17_s21 = sadd.s32 1, %s2110_s21  }
 0x284   : > { %p14_p5 = scmp.ge.s32.totalorder %s17_s21, 8  }
 0x286   :  { %16 = sbr.rel (!%p14_p5) target bundleno = 1 (0x1), region = 137 }
 0x28b   :  { %1883 = vsyncmov [#allocation4] }
 0x28e   :  { %s1884_s12 = vpop.sfrf %1883 }
 0x28f   :  { %p2080_p6 = scmp.ne.s32.totalorder %s1884_s12, 0 }
 0x291   :  { %1888 = shalt.err (%p2080_p6)  }
 0x292   :  { %1890 = vsyncmov [#allocation4 + $0x1] }
 0x295   :  { %s1891_s22 = vpop.sfrf %1890 }
 0x296   :  { %p2081_p7 = scmp.ne.s32.totalorder %s1891_s22, 0 }
 0x298   :  { %1895 = shalt.err (%p2081_p7)  }

</bundles_post_ra>
